<compile_context>
chip_gen: v7x
topology: tpu7x:2x2x1
jax: 0.10.0
libtpu: 0.0.40
codegen_flags: <defaults>
</compile_context>

<pallas_src>
import functools

import jax
import jax.numpy as jnp
from jax import lax
from jax.experimental import pallas as pl
from jax.experimental.pallas import tpu as pltpu


# ----------------------------- helpers -----------------------------

def _compiler_params(n_grid_dims=1):
    return pltpu.CompilerParams(
        dimension_semantics=("parallel",) * n_grid_dims,
        vmem_limit_bytes=48 * 1024 * 1024)


def _row_tile(n, max_tile=512):
    """Largest multiple-of-8 divisor of n that is <= max_tile (else the whole n)."""
    if n <= max_tile:
        return n
    for t in range(max_tile, 7, -8):
        if n % t == 0:
            return t
    return n


# ----------------------------- Pallas kernels -----------------------------

def _mha_core(q, k, v, num_heads, mask=None):
    """Multi-head attention for one batch element.
    q: (T, D), k: (S, D), v: (S, D); head split via static lane slices.
    Returns (out (T, D), [per-head (T, S) post-softmax (masked) probs]).
    Unused probs are dead-code-eliminated for the standard path."""
    d = q.shape[-1]
    dh = d // num_heads
    scale = float(dh) ** -0.5
    outs, probs = [], []
    # TODO(synk): for very large S (real MaskFormer memory) the (T, S) score block
    # should be S-tiled with an online softmax; at DeOP decoder shapes it fits VMEM.
    for h in range(num_heads):
        lo, hi = h * dh, (h + 1) * dh
        qh = q[:, lo:hi] * scale
        s = lax.dot_general(qh, k[:, lo:hi], (((1,), (1,)), ((), ())),
                            preferred_element_type=jnp.float32)        # (T, S)
        s = s - jnp.max(s, axis=-1, keepdims=True)
        e = jnp.exp(s)
        p = e / jnp.sum(e, axis=-1, keepdims=True)                      # softmax over S
        if mask is not None:
            p = p * mask                       # multiplicative mask AFTER softmax (no renorm)
        probs.append(p)
        outs.append(jnp.dot(p, v[:, lo:hi], preferred_element_type=jnp.float32))
    return jnp.concatenate(outs, axis=-1), probs


def _self_attn_kernel(num_heads, tgt_ref, qpos_ref, wqkv_ref, bqkv_ref,
                      wo_ref, bo_ref, o_ref):
    # standard nn.MultiheadAttention, query == key == tgt+query_pos, value == tgt
    t = tgt_ref[0]                                  # (T, D)
    x = t + qpos_ref[0]
    w, bias = wqkv_ref[...], bqkv_ref[...]          # (D, 3D), (1, 3D)
    d = t.shape[-1]
    qk = jnp.dot(x, w[:, :2 * d], preferred_element_type=jnp.float32) + bias[:, :2 * d]
    v = jnp.dot(t, w[:, 2 * d:], preferred_element_type=jnp.float32) + bias[:, 2 * d:]
    attn, _ = _mha_core(qk[:, :d], qk[:, d:], v, num_heads)
    o_ref[0] = jnp.dot(attn, wo_ref[...], preferred_element_type=jnp.float32) + bo_ref[...]


def _cross_attn_kernel(num_heads, tgt_ref, qpos_ref, kmem_ref, vmem_ref,
                       wqkv_ref, bqkv_ref, wo_ref, bo_ref, o_ref):
    # standard nn.MultiheadAttention, query = tgt+query_pos, key = memory+pos, value = memory
    d = tgt_ref.shape[-1]
    w, bias = wqkv_ref[...], bqkv_ref[...]
    xq = tgt_ref[0] + qpos_ref[0]
    q = jnp.dot(xq, w[:, :d], preferred_element_type=jnp.float32) + bias[:, :d]
    k = jnp.dot(kmem_ref[0], w[:, d:2 * d], preferred_element_type=jnp.float32) + bias[:, d:2 * d]
    v = jnp.dot(vmem_ref[0], w[:, 2 * d:], preferred_element_type=jnp.float32) + bias[:, 2 * d:]
    attn, _ = _mha_core(q, k, v, num_heads)
    o_ref[0] = jnp.dot(attn, wo_ref[...], preferred_element_type=jnp.float32) + bo_ref[...]


def _outlayer_attn_kernel(num_heads, tgt_ref, qpos_ref, kmem_ref, vmem_ref, mask_ref,
                          wqk_ref, bqk_ref, o_ref, w_out_ref):
    # MultiHeadAttentionMy with outDecoderLayer=True:
    #   value = raw memory (no V projection), no out_proj,
    #   proposal mask multiplied into post-softmax weights (same mask for all heads).
    d = tgt_ref.shape[-1]
    w, bias = wqk_ref[...], bqk_ref[...]            # (D, 2D), (1, 2D)
    xq = tgt_ref[0] + qpos_ref[0]
    q = jnp.dot(xq, w[:, :d], preferred_element_type=jnp.float32) + bias[:, :d]
    k = jnp.dot(kmem_ref[0], w[:, d:], preferred_element_type=jnp.float32) + bias[:, d:]
    v = vmem_ref[0]
    attn, probs = _mha_core(q, k, v, num_heads, mask=mask_ref[0])
    o_ref[0] = attn                                 # NOT out-projected
    for h in range(num_heads):
        w_out_ref[0, h] = probs[h]


def _add_ln_kernel(x_ref, y_ref, g_ref, b_ref, o_ref):
    # LayerNorm(x + y), eps = 1e-5 (nn.LayerNorm default)
    s = x_ref[...] + y_ref[...]
    mu = jnp.mean(s, axis=-1, keepdims=True)
    c = s - mu
    var = jnp.mean(c * c, axis=-1, keepdims=True)
    o_ref[...] = c * lax.rsqrt(var + 1e-5) * g_ref[...] + b_ref[...]


def _ffn_add_ln_kernel(x_ref, w1_ref, b1_ref, w2_ref, b2_ref, g_ref, bn_ref, o_ref):
    # LayerNorm(x + lin2(relu(lin1(x)))); the (tile, DFF) intermediate stays in VMEM.
    x = x_ref[...]
    h = jnp.maximum(
        jnp.dot(x, w1_ref[...], preferred_element_type=jnp.float32) + b1_ref[...], 0.0)
    y = jnp.dot(h, w2_ref[...], preferred_element_type=jnp.float32) + b2_ref[...]
    s = x + y
    mu = jnp.mean(s, axis=-1, keepdims=True)
    c = s - mu
    var = jnp.mean(c * c, axis=-1, keepdims=True)
    o_ref[...] = c * lax.rsqrt(var + 1e-5) * g_ref[...] + bn_ref[...]


def _l2norm_kernel(x_ref, o_ref):
    # replicates PyTorch: if (norm==0).any(): x/(norm+1e-10) else x/norm.
    # The branch is GLOBAL over the whole tensor, so this kernel is intentionally
    # un-gridded (a single block); gridding it would silently change semantics.
    x = x_ref[...]
    n = jnp.sqrt(jnp.sum(x * x, axis=-1, keepdims=True))                        # (N, 1)
    zero_flag = jnp.max(jnp.where(n == 0.0, 1.0, 0.0), axis=0, keepdims=True)   # (1, 1)
    o_ref[...] = x / (n + 1e-10 * zero_flag)


# ----------------------------- kernel wrappers -----------------------------

def mha_self_pallas(tgt_b, qpos_b, p, num_heads):
    b, t, d = tgt_b.shape
    return pl.pallas_call(
        functools.partial(_self_attn_kernel, num_heads),
        out_shape=jax.ShapeDtypeStruct((b, t, d), jnp.float32),
        grid=(b,),
        in_specs=[pl.BlockSpec((1, t, d), lambda i: (i, 0, 0)),
                  pl.BlockSpec((1, t, d), lambda i: (i, 0, 0)),
                  pl.BlockSpec((d, 3 * d), lambda i: (0, 0)),
                  pl.BlockSpec((1, 3 * d), lambda i: (0, 0)),
                  pl.BlockSpec((d, d), lambda i: (0, 0)),
                  pl.BlockSpec((1, d), lambda i: (0, 0))],
        out_specs=pl.BlockSpec((1, t, d), lambda i: (i, 0, 0)),
        compiler_params=_compiler_params(1),
    )(tgt_b, qpos_b, p['in_w_t'], p['in_b'], p['out_w_t'], p['out_b'])


def mha_cross_pallas(tgt_b, qpos_b, mem_pos_b, mem_b, p, num_heads):
    b, t, d = tgt_b.shape
    s = mem_b.shape[1]
    return pl.pallas_call(
        functools.partial(_cross_attn_kernel, num_heads),
        out_shape=jax.ShapeDtypeStruct((b, t, d), jnp.float32),
        grid=(b,),
        in_specs=[pl.BlockSpec((1, t, d), lambda i: (i, 0, 0)),
                  pl.BlockSpec((1, t, d), lambda i: (i, 0, 0)),
                  pl.BlockSpec((1, s, d), lambda i: (i, 0, 0)),
                  pl.BlockSpec((1, s, d), lambda i: (i, 0, 0)),
                  pl.BlockSpec((d, 3 * d), lambda i: (0, 0)),
                  pl.BlockSpec((1, 3 * d), lambda i: (0, 0)),
                  pl.BlockSpec((d, d), lambda i: (0, 0)),
                  pl.BlockSpec((1, d), lambda i: (0, 0))],
        out_specs=pl.BlockSpec((1, t, d), lambda i: (i, 0, 0)),
        compiler_params=_compiler_params(1),
    )(tgt_b, qpos_b, mem_pos_b, mem_b, p['in_w_t'], p['in_b'], p['out_w_t'], p['out_b'])


def outlayer_attn_pallas(tgt_b, qpos_b, mem_pos_b, mem_b, pm, p, num_heads):
    b, t, d = tgt_b.shape
    s = mem_b.shape[1]
    out, w = pl.pallas_call(
        functools.partial(_outlayer_attn_kernel, num_heads),
        out_shape=(jax.ShapeDtypeStruct((b, t, d), jnp.float32),
                   jax.ShapeDtypeStruct((b, num_heads, t, s), jnp.float32)),
        grid=(b,),
        in_specs=[pl.BlockSpec((1, t, d), lambda i: (i, 0, 0)),
                  pl.BlockSpec((1, t, d), lambda i: (i, 0, 0)),
                  pl.BlockSpec((1, s, d), lambda i: (i, 0, 0)),
                  pl.BlockSpec((1, s, d), lambda i: (i, 0, 0)),
                  pl.BlockSpec((1, t, s), lambda i: (i, 0, 0)),
                  pl.BlockSpec((d, 2 * d), lambda i: (0, 0)),
                  pl.BlockSpec((1, 2 * d), lambda i: (0, 0))],
        out_specs=(pl.BlockSpec((1, t, d), lambda i: (i, 0, 0)),
                   pl.BlockSpec((1, num_heads, t, s), lambda i: (i, 0, 0, 0))),
        compiler_params=_compiler_params(1),
    )(tgt_b, qpos_b, mem_pos_b, mem_b, pm, p['cross_qk_w_t'], p['cross_qk_b'])
    return out, w


def add_layernorm_pallas(x, y, g, b):
    shp = x.shape
    d = shp[-1]
    x2, y2 = x.reshape(-1, d), y.reshape(-1, d)
    n = x2.shape[0]
    tile = _row_tile(n)
    out = pl.pallas_call(
        _add_ln_kernel,
        out_shape=jax.ShapeDtypeStruct((n, d), jnp.float32),
        grid=(n // tile,),
        in_specs=[pl.BlockSpec((tile, d), lambda i: (i, 0)),
                  pl.BlockSpec((tile, d), lambda i: (i, 0)),
                  pl.BlockSpec((1, d), lambda i: (0, 0)),
                  pl.BlockSpec((1, d), lambda i: (0, 0))],
        out_specs=pl.BlockSpec((tile, d), lambda i: (i, 0)),
        compiler_params=_compiler_params(1),
    )(x2, y2, g, b)
    return out.reshape(shp)


def ffn_add_layernorm_pallas(x, p):
    shp = x.shape
    d = shp[-1]
    dff = p['lin1_w_t'].shape[1]
    x2 = x.reshape(-1, d)
    n = x2.shape[0]
    tile = _row_tile(n)
    out = pl.pallas_call(
        _ffn_add_ln_kernel,
        out_shape=jax.ShapeDtypeStruct((n, d), jnp.float32),
        grid=(n // tile,),
        in_specs=[pl.BlockSpec((tile, d), lambda i: (i, 0)),
                  pl.BlockSpec((d, dff), lambda i: (0, 0)),
                  pl.BlockSpec((1, dff), lambda i: (0, 0)),
                  pl.BlockSpec((dff, d), lambda i: (0, 0)),
                  pl.BlockSpec((1, d), lambda i: (0, 0)),
                  pl.BlockSpec((1, d), lambda i: (0, 0)),
                  pl.BlockSpec((1, d), lambda i: (0, 0))],
        out_specs=pl.BlockSpec((tile, d), lambda i: (i, 0)),
        compiler_params=_compiler_params(1),
    )(x2, p['lin1_w_t'], p['lin1_b'], p['lin2_w_t'], p['lin2_b'],
      p['norm3_g'], p['norm3_b'])
    return out.reshape(shp)


def l2norm_pallas(x):
    shp = x.shape
    d = shp[-1]
    x2 = x.reshape(-1, d)
    y = pl.pallas_call(
        _l2norm_kernel, out_shape=jax.ShapeDtypeStruct(x2.shape, jnp.float32),
    )(x2)
    return y.reshape(shp)


# ----------------------------- model glue (batch-major internally) -----------------------------

def decoder_layer_fwd(p, tgt, qpos, mem_pos, memory, nhead):
    # Standard post-norm DETR decoder layer (dropouts = identity in eval).
    tgt2 = mha_self_pallas(tgt, qpos, p['self_attn'], nhead)
    tgt = add_layernorm_pallas(tgt, tgt2, p['norm1_g'], p['norm1_b'])
    tgt2 = mha_cross_pallas(tgt, qpos, mem_pos, memory, p['cross_attn'], nhead)
    tgt = add_layernorm_pallas(tgt, tgt2, p['norm2_g'], p['norm2_b'])
    tgt = ffn_add_layernorm_pallas(tgt, p)
    return tgt


def out_layer_fwd(p, tgt, qpos, mem_pos, memory, pm, nhead):
    # TransformerDecoderOutLayerLinear.forward_post (need_weights=False path)
    tgt2 = mha_self_pallas(tgt, qpos, p['self_attn'], nhead)
    tgt = add_layernorm_pallas(tgt, tgt2, p['norm1_g'], p['norm1_b'])
    attn_out, attn_w = outlayer_attn_pallas(tgt, qpos, mem_pos, memory, pm, p, nhead)
    tgt = l2norm_pallas(attn_out)
    return tgt, attn_w


@functools.partial(jax.jit, static_argnames=("nhead",))
def transformer_decoder_forward(params, tgt, memory, pos, query_pos, proposal_mask, nhead=8):
    t, b, d = tgt.shape
    # one-time layout change to batch-major; all per-layer kernels stay in (B, L, D)
    tgt_b = jnp.transpose(tgt, (1, 0, 2))
    mem_b = jnp.transpose(memory, (1, 0, 2))
    qpos_b = jnp.transpose(query_pos, (1, 0, 2))
    mem_pos_b = mem_b + jnp.transpose(pos, (1, 0, 2))   # loop-invariant cross-attn key source
    pm = proposal_mask.reshape(b, t, -1).astype(jnp.float32)

    out = tgt_b
    for lp in params['layers']:
        out = decoder_layer_fwd(lp, out, qpos_b, mem_pos_b, mem_b, nhead)
    out_tgt, attn_w = out_layer_fwd(params['outlayer'], out, qpos_b, mem_pos_b, mem_b, pm, nhead)

    out_tbd = jnp.transpose(out_tgt, (1, 0, 2))          # back to (T, B, D)
    # matches PyTorch: return (outputl.unsqueeze(0), attn_output_weights.unsqueeze(0))
    return out_tbd[None], attn_w[None]


# ----------------------------- deterministic parameter init -----------------------------

def _xavier(key, shape):
    fan_out, fan_in = shape
    limit = (6.0 / (fan_in + fan_out)) ** 0.5
    return jax.random.uniform(key, shape, jnp.float32, -limit, limit)


def init_mha_params(key, d):
    k1, k2 = jax.random.split(key)
    in_w = _xavier(k1, (3 * d, d))     # PyTorch layout (3D, D) = [Wq; Wk; Wv]
    out_w = _xavier(k2, (d, d))
    return {'in_w_t': in_w.T,                              # (D, 3D), columns [q | k | v]
            'in_b': jnp.zeros((1, 3 * d), jnp.float32),
            'out_w_t': out_w.T,                            # (D, D)
            'out_b': jnp.zeros((1, d), jnp.float32)}


def init_decoder_layer_params(key, d, dff):
    ks = jax.random.split(key, 4)
    return {
        'self_attn': init_mha_params(ks[0], d),
        'cross_attn': init_mha_params(ks[1], d),
        'lin1_w_t': _xavier(ks[2], (dff, d)).T, 'lin1_b': jnp.zeros((1, dff), jnp.float32),
        'lin2_w_t': _xavier(ks[3], (d, dff)).T, 'lin2_b': jnp.zeros((1, d), jnp.float32),
        'norm1_g': jnp.ones((1, d), jnp.float32), 'norm1_b': jnp.zeros((1, d), jnp.float32),
        'norm2_g': jnp.ones((1, d), jnp.float32), 'norm2_b': jnp.zeros((1, d), jnp.float32),
        'norm3_g': jnp.ones((1, d), jnp.float32), 'norm3_b': jnp.zeros((1, d), jnp.float32),
    }


def init_outlayer_params(key, d):
    k1, k2 = jax.random.split(key)
    in_w = _xavier(k2, (3 * d, d))     # only Wq/Wk rows used (outDecoderLayer=True: raw value)
    return {
        'self_attn': init_mha_params(k1, d),
        'cross_qk_w_t': in_w[:2 * d].T,                    # (D, 2D)
        'cross_qk_b': jnp.zeros((1, 2 * d), jnp.float32),
        'norm1_g': jnp.ones((1, d), jnp.float32), 'norm1_b': jnp.zeros((1, d), jnp.float32),
    }


# ----------------------------- demo -----------------------------

if __name__ == "__main__":
    D, H, DFF = 32, 8, 64          # d_model, nhead (hardcoded 8 in the module), dim_feedforward
    T, B = 8, 2                    # num queries, batch
    HM = WM = 4                    # memory spatial
    S = HM * WM
    NUM_LAYERS = 2

    root = jax.random.PRNGKey(0)
    k_params, k_tgt, k_mem, k_qpos, k_pos, k_mask = jax.random.split(root, 6)
    kp = jax.random.split(k_params, NUM_LAYERS + 1)
    params = {
        'layers': [init_decoder_layer_params(kp[i], D, DFF) for i in range(NUM_LAYERS)],
        'outlayer': init_outlayer_params(kp[-1], D),
    }

    tgt = jax.random.normal(k_tgt, (T, B, D), jnp.float32)
    memory = jax.random.normal(k_mem, (S, B, D), jnp.float32)
    query_pos = jax.random.normal(k_qpos, (T, B, D), jnp.float32)
    pos = jax.random.normal(k_pos, (S, B, D), jnp.float32)
    proposal_mask = (jax.random.uniform(k_mask, (B, T, HM, WM)) > 0.3).astype(jnp.float32)

    out, attn_w = transformer_decoder_forward(
        params, tgt, memory, pos, query_pos, proposal_mask, nhead=H)
    jax.block_until_ready((out, attn_w))

    assert out.shape == (1, T, B, D)
    assert attn_w.shape == (1, B, H, T, S)
    assert bool(jnp.isfinite(out).all()) and bool(jnp.isfinite(attn_w).all())
    print("KERNEL_OK")
</pallas_src>

<mosaic_0001>
module attributes {stable_mosaic.version = 11 : i64} {
  func.func @_add_ln_kernel(%arg0: i32, %arg1: memref<16x32xf32, #tpu.memory_space<vmem>>, %arg2: memref<16x32xf32, #tpu.memory_space<vmem>>, %arg3: memref<1x32xf32, #tpu.memory_space<vmem>>, %arg4: memref<1x32xf32, #tpu.memory_space<vmem>>, %arg5: memref<16x32xf32, #tpu.memory_space<vmem>>) attributes {dimension_semantics = [#tpu.dimension_semantics<parallel>], iteration_bounds = array<i64: 1>, scalar_prefetch = 0 : i64, scratch_operands = 0 : i64, tpu.core_type = #tpu.core_type<tc>, window_params = [{transform_indices = @transform_0, window_bounds = array<i64: 16, 32>}, {transform_indices = @transform_1, window_bounds = array<i64: 16, 32>}, {pipeline_mode = #tpu.pipeline_mode<synchronous>, transform_indices = @transform_2, window_bounds = array<i64: 1, 32>}, {pipeline_mode = #tpu.pipeline_mode<synchronous>, transform_indices = @transform_3, window_bounds = array<i64: 1, 32>}, {transform_indices = @transform_4, window_bounds = array<i64: 16, 32>}]} {
    %c0 = arith.constant 0 : index
    %c0_0 = arith.constant 0 : index
    %0 = vector.load %arg1[%c0, %c0_0] : memref<16x32xf32, #tpu.memory_space<vmem>>, vector<16x32xf32>
    %c0_1 = arith.constant 0 : index
    %c0_2 = arith.constant 0 : index
    %1 = vector.load %arg2[%c0_1, %c0_2] : memref<16x32xf32, #tpu.memory_space<vmem>>, vector<16x32xf32>
    %2 = arith.addf %0, %1 : vector<16x32xf32>
    %cst = arith.constant dense<0.000000e+00> : vector<16xf32>
    %3 = vector.multi_reduction <add>, %2, %cst [1] : vector<16x32xf32> to vector<16xf32>
    %4 = vector.shape_cast %3 : vector<16xf32> to vector<16x1xf32>
    %cst_3 = arith.constant 3.200000e+01 : f32
    %5 = vector.broadcast %cst_3 : f32 to vector<16x1xf32>
    %6 = arith.divf %4, %5 : vector<16x1xf32>
    %7 = vector.broadcast %6 : vector<16x1xf32> to vector<16x32xf32>
    %8 = arith.subf %2, %7 : vector<16x32xf32>
    %9 = arith.mulf %8, %8 : vector<16x32xf32>
    %cst_4 = arith.constant dense<0.000000e+00> : vector<16xf32>
    %10 = vector.multi_reduction <add>, %9, %cst_4 [1] : vector<16x32xf32> to vector<16xf32>
    %11 = vector.shape_cast %10 : vector<16xf32> to vector<16x1xf32>
    %cst_5 = arith.constant 3.200000e+01 : f32
    %12 = vector.broadcast %cst_5 : f32 to vector<16x1xf32>
    %13 = arith.divf %11, %12 : vector<16x1xf32>
    %cst_6 = arith.constant 9.99999974E-6 : f32
    %14 = vector.broadcast %cst_6 : f32 to vector<16x1xf32>
    %15 = arith.addf %13, %14 : vector<16x1xf32>
    %16 = math.rsqrt %15 : vector<16x1xf32>
    %17 = vector.broadcast %16 : vector<16x1xf32> to vector<16x32xf32>
    %18 = arith.mulf %8, %17 : vector<16x32xf32>
    %c0_7 = arith.constant 0 : index
    %c0_8 = arith.constant 0 : index
    %19 = vector.load %arg3[%c0_7, %c0_8] : memref<1x32xf32, #tpu.memory_space<vmem>>, vector<1x32xf32>
    %20 = vector.broadcast %19 : vector<1x32xf32> to vector<16x32xf32>
    %21 = arith.mulf %18, %20 : vector<16x32xf32>
    %c0_9 = arith.constant 0 : index
    %c0_10 = arith.constant 0 : index
    %22 = vector.load %arg4[%c0_9, %c0_10] : memref<1x32xf32, #tpu.memory_space<vmem>>, vector<1x32xf32>
    %23 = vector.broadcast %22 : vector<1x32xf32> to vector<16x32xf32>
    %24 = arith.addf %21, %23 : vector<16x32xf32>
    %c0_11 = arith.constant 0 : index
    %c0_12 = arith.constant 0 : index
    %25 = vector.load %arg5[%c0_11, %c0_12] : memref<16x32xf32, #tpu.memory_space<vmem>>, vector<16x32xf32>
    tpu.vector_store %arg5[%c0_11, %c0_12], %24 {strides = array<i32>} : memref<16x32xf32, #tpu.memory_space<vmem>>, vector<16x32xf32>,
    return
  }
  func.func @transform_0(%arg0: i32) -> (i32, i32) {
    %c0_i32 = arith.constant 0 : i32
    %c0_i32_0 = arith.constant 0 : i32
    return %arg0, %c0_i32 : i32, i32
  }
  func.func @transform_1(%arg0: i32) -> (i32, i32) {
    %c0_i32 = arith.constant 0 : i32
    %c0_i32_0 = arith.constant 0 : i32
    return %arg0, %c0_i32 : i32, i32
  }
  func.func @transform_2(%arg0: i32) -> (i32, i32) {
    %c0_i32 = arith.constant 0 : i32
    %c0_i32_0 = arith.constant 0 : i32
    %c0_i32_1 = arith.constant 0 : i32
    return %c0_i32, %c0_i32_0 : i32, i32
  }
  func.func @transform_3(%arg0: i32) -> (i32, i32) {
    %c0_i32 = arith.constant 0 : i32
    %c0_i32_0 = arith.constant 0 : i32
    %c0_i32_1 = arith.constant 0 : i32
    return %c0_i32, %c0_i32_0 : i32, i32
  }
  func.func @transform_4(%arg0: i32) -> (i32, i32) {
    %c0_i32 = arith.constant 0 : i32
    %c0_i32_0 = arith.constant 0 : i32
    return %arg0, %c0_i32 : i32, i32
  }
}

module attributes {stable_mosaic.version = 11 : i64} {
  func.func @_self_attn_kernel(%arg0: i32, %arg1: memref<1x8x32xf32, #tpu.memory_space<vmem>>, %arg2: memref<1x8x32xf32, #tpu.memory_space<vmem>>, %arg3: memref<32x96xf32, #tpu.memory_space<vmem>>, %arg4: memref<1x96xf32, #tpu.memory_space<vmem>>, %arg5: memref<32x32xf32, #tpu.memory_space<vmem>>, %arg6: memref<1x32xf32, #tpu.memory_space<vmem>>, %arg7: memref<1x8x32xf32, #tpu.memory_space<vmem>>) attributes {dimension_semantics = [#tpu.dimension_semantics<parallel>], iteration_bounds = array<i64: 2>, scalar_prefetch = 0 : i64, scratch_operands = 0 : i64, tpu.core_type = #tpu.core_type<tc>, window_params = [{transform_indices = @transform_0, window_bounds = array<i64: 1, 8, 32>}, {transform_indices = @transform_1, window_bounds = array<i64: 1, 8, 32>}, {pipeline_mode = #tpu.pipeline_mode<synchronous>, transform_indices = @transform_2, window_bounds = array<i64: 32, 96>}, {pipeline_mode = #tpu.pipeline_mode<synchronous>, transform_indices = @transform_3, window_bounds = array<i64: 1, 96>}, {pipeline_mode = #tpu.pipeline_mode<synchronous>, transform_indices = @transform_4, window_bounds = array<i64: 32, 32>}, {pipeline_mode = #tpu.pipeline_mode<synchronous>, transform_indices = @transform_5, window_bounds = array<i64: 1, 32>}, {transform_indices = @transform_6, window_bounds = array<i64: 1, 8, 32>}]} {
    %c0 = arith.constant 0 : index
    %c0_0 = arith.constant 0 : index
    %c0_1 = arith.constant 0 : index
    %0 = vector.load %arg1[%c0, %c0_0, %c0_1] : memref<1x8x32xf32, #tpu.memory_space<vmem>>, vector<1x8x32xf32>
    %1 = vector.shape_cast %0 : vector<1x8x32xf32> to vector<8x32xf32>
    %c0_2 = arith.constant 0 : index
    %c0_3 = arith.constant 0 : index
    %c0_4 = arith.constant 0 : index
    %2 = vector.load %arg2[%c0_2, %c0_3, %c0_4] : memref<1x8x32xf32, #tpu.memory_space<vmem>>, vector<1x8x32xf32>
    %3 = vector.shape_cast %2 : vector<1x8x32xf32> to vector<8x32xf32>
    %4 = arith.addf %1, %3 : vector<8x32xf32>
    %c0_5 = arith.constant 0 : index
    %c0_6 = arith.constant 0 : index
    %5 = vector.load %arg3[%c0_5, %c0_6] : memref<32x96xf32, #tpu.memory_space<vmem>>, vector<32x96xf32>
    %c0_7 = arith.constant 0 : index
    %c0_8 = arith.constant 0 : index
    %6 = vector.load %arg4[%c0_7, %c0_8] : memref<1x96xf32, #tpu.memory_space<vmem>>, vector<1x96xf32>
    %7 = vector.extract_strided_slice %5 {offsets = [0, 0], sizes = [32, 64], strides = [1, 1]} : vector<32x96xf32> to vector<32x64xf32>
    %cst = arith.constant dense<0.000000e+00> : vector<8x64xf32>
    %8 = tpu.matmul %4, %7, %cst {dimension_numbers = #tpu.dot_dimension_numbers<[1], [0], [0], [1], [0, 0, 1, 1], [], []>} : vector<8x32xf32>, vector<32x64xf32>, vector<8x64xf32> -> vector<8x64xf32>
    %9 = vector.extract_strided_slice %6 {offsets = [0, 0], sizes = [1, 64], strides = [1, 1]} : vector<1x96xf32> to vector<1x64xf32>
    %10 = vector.broadcast %9 : vector<1x64xf32> to vector<8x64xf32>
    %11 = arith.addf %8, %10 : vector<8x64xf32>
    %12 = vector.extract_strided_slice %5 {offsets = [0, 64], sizes = [32, 32], strides = [1, 1]} : vector<32x96xf32> to vector<32x32xf32>
    %cst_9 = arith.constant dense<0.000000e+00> : vector<8x32xf32>
    %13 = tpu.matmul %1, %12, %cst_9 {dimension_numbers = #tpu.dot_dimension_numbers<[1], [0], [0], [1], [0, 0, 1, 1], [], []>} : vector<8x32xf32>, vector<32x32xf32>, vector<8x32xf32> -> vector<8x32xf32>
    %14 = vector.extract_strided_slice %6 {offsets = [0, 64], sizes = [1, 32], strides = [1, 1]} : vector<1x96xf32> to vector<1x32xf32>
    %15 = vector.broadcast %14 : vector<1x32xf32> to vector<8x32xf32>
    %16 = arith.addf %13, %15 : vector<8x32xf32>
    %17 = vector.extract_strided_slice %11 {offsets = [0, 0], sizes = [8, 32], strides = [1, 1]} : vector<8x64xf32> to vector<8x32xf32>
    %18 = vector.extract_strided_slice %11 {offsets = [0, 32], sizes = [8, 32], strides = [1, 1]} : vector<8x64xf32> to vector<8x32xf32>
    %19 = vector.extract_strided_slice %17 {offsets = [0, 0], sizes = [8, 4], strides = [1, 1]} : vector<8x32xf32> to vector<8x4xf32>
    %cst_10 = arith.constant 5.000000e-01 : f32
    %20 = vector.broadcast %cst_10 : f32 to vector<8x4xf32>
    %21 = arith.mulf %19, %20 : vector<8x4xf32>
    %22 = vector.extract_strided_slice %18 {offsets = [0, 0], sizes = [8, 4], strides = [1, 1]} : vector<8x32xf32> to vector<8x4xf32>
    %cst_11 = arith.constant dense<0.000000e+00> : vector<8x8xf32>
    %23 = tpu.matmul %21, %22, %cst_11 {dimension_numbers = #tpu.dot_dimension_numbers<[1], [1], [0], [0], [0, 0, 1, 0], [], []>} : vector<8x4xf32>, vector<8x4xf32>, vector<8x8xf32> -> vector<8x8xf32>
    %cst_12 = arith.constant dense<0xFF800000> : vector<8xf32>
    %24 = vector.multi_reduction <maximumf>, %23, %cst_12 [1] : vector<8x8xf32> to vector<8xf32>
    %25 = vector.shape_cast %24 : vector<8xf32> to vector<8x1xf32>
    %26 = vector.broadcast %25 : vector<8x1xf32> to vector<8x8xf32>
    %27 = arith.subf %23, %26 : vector<8x8xf32>
    %28 = math.exp %27 : vector<8x8xf32>
    %cst_13 = arith.constant dense<0.000000e+00> : vector<8xf32>
    %29 = vector.multi_reduction <add>, %28, %cst_13 [1] : vector<8x8xf32> to vector<8xf32>
    %30 = vector.shape_cast %29 : vector<8xf32> to vector<8x1xf32>
    %31 = vector.broadcast %30 : vector<8x1xf32> to vector<8x8xf32>
    %32 = arith.divf %28, %31 : vector<8x8xf32>
    %33 = vector.extract_strided_slice %16 {offsets = [0, 0], sizes = [8, 4], strides = [1, 1]} : vector<8x32xf32> to vector<8x4xf32>
    %cst_14 = arith.constant dense<0.000000e+00> : vector<8x4xf32>
    %34 = tpu.matmul %32, %33, %cst_14 {dimension_numbers = #tpu.dot_dimension_numbers<[1], [0], [0], [1], [0, 0, 1, 1], [], []>} : vector<8x8xf32>, vector<8x4xf32>, vector<8x4xf32> -> vector<8x4xf32>
    %35 = vector.extract_strided_slice %17 {offsets = [0, 4], sizes = [8, 4], strides = [1, 1]} : vector<8x32xf32> to vector<8x4xf32>
    %cst_15 = arith.constant 5.000000e-01 : f32
    %36 = vector.broadcast %cst_15 : f32 to vector<8x4xf32>
    %37 = arith.mulf %35, %36 : vector<8x4xf32>
    %38 = vector.extract_strided_slice %18 {offsets = [0, 4], sizes = [8, 4], strides = [1, 1]} : vector<8x32xf32> to vector<8x4xf32>
    %cst_16 = arith.constant dense<0.000000e+00> : vector<8x8xf32>
    %39 = tpu.matmul %37, %38, %cst_16 {dimension_numbers = #tpu.dot_dimension_numbers<[1], [1], [0], [0], [0, 0, 1, 0], [], []>} : vector<8x4xf32>, vector<8x4xf32>, vector<8x8xf32> -> vector<8x8xf32>
    %cst_17 = arith.constant dense<0xFF800000> : vector<8xf32>
    %40 = vector.multi_reduction <maximumf>, %39, %cst_17 [1] : vector<8x8xf32> to vector<8xf32>
    %41 = vector.shape_cast %40 : vector<8xf32> to vector<8x1xf32>
    %42 = vector.broadcast %41 : vector<8x1xf32> to vector<8x8xf32>
    %43 = arith.subf %39, %42 : vector<8x8xf32>
    %44 = math.exp %43 : vector<8x8xf32>
    %cst_18 = arith.constant dense<0.000000e+00> : vector<8xf32>
    %45 = vector.multi_reduction <add>, %44, %cst_18 [1] : vector<8x8xf32> to vector<8xf32>
    %46 = vector.shape_cast %45 : vector<8xf32> to vector<8x1xf32>
    %47 = vector.broadcast %46 : vector<8x1xf32> to vector<8x8xf32>
    %48 = arith.divf %44, %47 : vector<8x8xf32>
    %49 = vector.extract_strided_slice %16 {offsets = [0, 4], sizes = [8, 4], strides = [1, 1]} : vector<8x32xf32> to vector<8x4xf32>
    %cst_19 = arith.constant dense<0.000000e+00> : vector<8x4xf32>
    %50 = tpu.matmul %48, %49, %cst_19 {dimension_numbers = #tpu.dot_dimension_numbers<[1], [0], [0], [1], [0, 0, 1, 1], [], []>} : vector<8x8xf32>, vector<8x4xf32>, vector<8x4xf32> -> vector<8x4xf32>
    %51 = vector.extract_strided_slice %17 {offsets = [0, 8], sizes = [8, 4], strides = [1, 1]} : vector<8x32xf32> to vector<8x4xf32>
    %cst_20 = arith.constant 5.000000e-01 : f32
    %52 = vector.broadcast %cst_20 : f32 to vector<8x4xf32>
    %53 = arith.mulf %51, %52 : vector<8x4xf32>
    %54 = vector.extract_strided_slice %18 {offsets = [0, 8], sizes = [8, 4], strides = [1, 1]} : vector<8x32xf32> to vector<8x4xf32>
    %cst_21 = arith.constant dense<0.000000e+00> : vector<8x8xf32>
    %55 = tpu.matmul %53, %54, %cst_21 {dimension_numbers = #tpu.dot_dimension_numbers<[1], [1], [0], [0], [0, 0, 1, 0], [], []>} : vector<8x4xf32>, vector<8x4xf32>, vector<8x8xf32> -> vector<8x8xf32>
    %cst_22 = arith.constant dense<0xFF800000> : vector<8xf32>
    %56 = vector.multi_reduction <maximumf>, %55, %cst_22 [1] : vector<8x8xf32> to vector<8xf32>
    %57 = vector.shape_cast %56 : vector<8xf32> to vector<8x1xf32>
    %58 = vector.broadcast %57 : vector<8x1xf32> to vector<8x8xf32>
    %59 = arith.subf %55, %58 : vector<8x8xf32>
    %60 = math.exp %59 : vector<8x8xf32>
    %cst_23 = arith.constant dense<0.000000e+00> : vector<8xf32>
    %61 = vector.multi_reduction <add>, %60, %cst_23 [1] : vector<8x8xf32> to vector<8xf32>
    %62 = vector.shape_cast %61 : vector<8xf32> to vector<8x1xf32>
    %63 = vector.broadcast %62 : vector<8x1xf32> to vector<8x8xf32>
    %64 = arith.divf %60, %63 : vector<8x8xf32>
    %65 = vector.extract_strided_slice %16 {offsets = [0, 8], sizes = [8, 4], strides = [1, 1]} : vector<8x32xf32> to vector<8x4xf32>
    %cst_24 = arith.constant dense<0.000000e+00> : vector<8x4xf32>
    %66 = tpu.matmul %64, %65, %cst_24 {dimension_numbers = #tpu.dot_dimension_numbers<[1], [0], [0], [1], [0, 0, 1, 1], [], []>} : vector<8x8xf32>, vector<8x4xf32>, vector<8x4xf32> -> vector<8x4xf32>
    %67 = vector.extract_strided_slice %17 {offsets = [0, 12], sizes = [8, 4], strides = [1, 1]} : vector<8x32xf32> to vector<8x4xf32>
    %cst_25 = arith.constant 5.000000e-01 : f32
    %68 = vector.broadcast %cst_25 : f32 to vector<8x4xf32>
    %69 = arith.mulf %67, %68 : vector<8x4xf32>
    %70 = vector.extract_strided_slice %18 {offsets = [0, 12], sizes = [8, 4], strides = [1, 1]} : vector<8x32xf32> to vector<8x4xf32>
    %cst_26 = arith.constant dense<0.000000e+00> : vector<8x8xf32>
    %71 = tpu.matmul %69, %70, %cst_26 {dimension_numbers = #tpu.dot_dimension_numbers<[1], [1], [0], [0], [0, 0, 1, 0], [], []>} : vector<8x4xf32>, vector<8x4xf32>, vector<8x8xf32> -> vector<8x8xf32>
    %cst_27 = arith.constant dense<0xFF800000> : vector<8xf32>
    %72 = vector.multi_reduction <maximumf>, %71, %cst_27 [1] : vector<8x8xf32> to vector<8xf32>
    %73 = vector.shape_cast %72 : vector<8xf32> to vector<8x1xf32>
    %74 = vector.broadcast %73 : vector<8x1xf32> to vector<8x8xf32>
    %75 = arith.subf %71, %74 : vector<8x8xf32>
    %76 = math.exp %75 : vector<8x8xf32>
    %cst_28 = arith.constant dense<0.000000e+00> : vector<8xf32>
    %77 = vector.multi_reduction <add>, %76, %cst_28 [1] : vector<8x8xf32> to vector<8xf32>
    %78 = vector.shape_cast %77 : vector<8xf32> to vector<8x1xf32>
    %79 = vector.broadcast %78 : vector<8x1xf32> to vector<8x8xf32>
    %80 = arith.divf %76, %79 : vector<8x8xf32>
    %81 = vector.extract_strided_slice %16 {offsets = [0, 12], sizes = [8, 4], strides = [1, 1]} : vector<8x32xf32> to vector<8x4xf32>
    %cst_29 = arith.constant dense<0.000000e+00> : vector<8x4xf32>
    %82 = tpu.matmul %80, %81, %cst_29 {dimension_numbers = #tpu.dot_dimension_numbers<[1], [0], [0], [1], [0, 0, 1, 1], [], []>} : vector<8x8xf32>, vector<8x4xf32>, vector<8x4xf32> -> vector<8x4xf32>
    %83 = vector.extract_strided_slice %17 {offsets = [0, 16], sizes = [8, 4], strides = [1, 1]} : vector<8x32xf32> to vector<8x4xf32>
    %cst_30 = arith.constant 5.000000e-01 : f32
    %84 = vector.broadcast %cst_30 : f32 to vector<8x4xf32>
    %85 = arith.mulf %83, %84 : vector<8x4xf32>
    %86 = vector.extract_strided_slice %18 {offsets = [0, 16], sizes = [8, 4], strides = [1, 1]} : vector<8x32xf32> to vector<8x4xf32>
    %cst_31 = arith.constant dense<0.000000e+00> : vector<8x8xf32>
    %87 = tpu.matmul %85, %86, %cst_31 {dimension_numbers = #tpu.dot_dimension_numbers<[1], [1], [0], [0], [0, 0, 1, 0], [], []>} : vector<8x4xf32>, vector<8x4xf32>, vector<8x8xf32> -> vector<8x8xf32>
    %cst_32 = arith.constant dense<0xFF800000> : vector<8xf32>
    %88 = vector.multi_reduction <maximumf>, %87, %cst_32 [1] : vector<8x8xf32> to vector<8xf32>
    %89 = vector.shape_cast %88 : vector<8xf32> to vector<8x1xf32>
    %90 = vector.broadcast %89 : vector<8x1xf32> to vector<8x8xf32>
    %91 = arith.subf %87, %90 : vector<8x8xf32>
    %92 = math.exp %91 : vector<8x8xf32>
    %cst_33 = arith.constant dense<0.000000e+00> : vector<8xf32>
    %93 = vector.multi_reduction <add>, %92, %cst_33 [1] : vector<8x8xf32> to vector<8xf32>
    %94 = vector.shape_cast %93 : vector<8xf32> to vector<8x1xf32>
    %95 = vector.broadcast %94 : vector<8x1xf32> to vector<8x8xf32>
    %96 = arith.divf %92, %95 : vector<8x8xf32>
    %97 = vector.extract_strided_slice %16 {offsets = [0, 16], sizes = [8, 4], strides = [1, 1]} : vector<8x32xf32> to vector<8x4xf32>
    %cst_34 = arith.constant dense<0.000000e+00> : vector<8x4xf32>
    %98 = tpu.matmul %96, %97, %cst_34 {dimension_numbers = #tpu.dot_dimension_numbers<[1], [0], [0], [1], [0, 0, 1, 1], [], []>} : vector<8x8xf32>, vector<8x4xf32>, vector<8x4xf32> -> vector<8x4xf32>
    %99 = vector.extract_strided_slice %17 {offsets = [0, 20], sizes = [8, 4], strides = [1, 1]} : vector<8x32xf32> to vector<8x4xf32>
    %cst_35 = arith.constant 5.000000e-01 : f32
    %100 = vector.broadcast %cst_35 : f32 to vector<8x4xf32>
    %101 = arith.mulf %99, %100 : vector<8x4xf32>
    %102 = vector.extract_strided_slice %18 {offsets = [0, 20], sizes = [8, 4], strides = [1, 1]} : vector<8x32xf32> to vector<8x4xf32>
    %cst_36 = arith.constant dense<0.000000e+00> : vector<8x8xf32>
    %103 = tpu.matmul %101, %102, %cst_36 {dimension_numbers = #tpu.dot_dimension_numbers<[1], [1], [0], [0], [0, 0, 1, 0], [], []>} : vector<8x4xf32>, vector<8x4xf32>, vector<8x8xf32> -> vector<8x8xf32>
    %cst_37 = arith.constant dense<0xFF800000> : vector<8xf32>
    %104 = vector.multi_reduction <maximumf>, %103, %cst_37 [1] : vector<8x8xf32> to vector<8xf32>
    %105 = vector.shape_cast %104 : vector<8xf32> to vector<8x1xf32>
    %106 = vector.broadcast %105 : vector<8x1xf32> to vector<8x8xf32>
    %107 = arith.subf %103, %106 : vector<8x8xf32>
    %108 = math.exp %107 : vector<8x8xf32>
    %cst_38 = arith.constant dense<0.000000e+00> : vector<8xf32>
    %109 = vector.multi_reduction <add>, %108, %cst_38 [1] : vector<8x8xf32> to vector<8xf32>
    %110 = vector.shape_cast %109 : vector<8xf32> to vector<8x1xf32>
    %111 = vector.broadcast %110 : vector<8x1xf32> to vector<8x8xf32>
    %112 = arith.divf %108, %111 : vector<8x8xf32>
    %113 = vector.extract_strided_slice %16 {offsets = [0, 20], sizes = [8, 4], strides = [1, 1]} : vector<8x32xf32> to vector<8x4xf32>
    %cst_39 = arith.constant dense<0.000000e+00> : vector<8x4xf32>
    %114 = tpu.matmul %112, %113, %cst_39 {dimension_numbers = #tpu.dot_dimension_numbers<[1], [0], [0], [1], [0, 0, 1, 1], [], []>} : vector<8x8xf32>, vector<8x4xf32>, vector<8x4xf32> -> vector<8x4xf32>
    %115 = vector.extract_strided_slice %17 {offsets = [0, 24], sizes = [8, 4], strides = [1, 1]} : vector<8x32xf32> to vector<8x4xf32>
    %cst_40 = arith.constant 5.000000e-01 : f32
    %116 = vector.broadcast %cst_40 : f32 to vector<8x4xf32>
    %117 = arith.mulf %115, %116 : vector<8x4xf32>
    %118 = vector.extract_strided_slice %18 {offsets = [0, 24], sizes = [8, 4], strides = [1, 1]} : vector<8x32xf32> to vector<8x4xf32>
    %cst_41 = arith.constant dense<0.000000e+00> : vector<8x8xf32>
    %119 = tpu.matmul %117, %118, %cst_41 {dimension_numbers = #tpu.dot_dimension_numbers<[1], [1], [0], [0], [0, 0, 1, 0], [], []>} : vector<8x4xf32>, vector<8x4xf32>, vector<8x8xf32> -> vector<8x8xf32>
    %cst_42 = arith.constant dense<0xFF800000> : vector<8xf32>
    %120 = vector.multi_reduction <maximumf>, %119, %cst_42 [1] : vector<8x8xf32> to vector<8xf32>
    %121 = vector.shape_cast %120 : vector<8xf32> to vector<8x1xf32>
    %122 = vector.broadcast %121 : vector<8x1xf32> to vector<8x8xf32>
    %123 = arith.subf %119, %122 : vector<8x8xf32>
    %124 = math.exp %123 : vector<8x8xf32>
    %cst_43 = arith.constant dense<0.000000e+00> : vector<8xf32>
    %125 = vector.multi_reduction <add>, %124, %cst_43 [1] : vector<8x8xf32> to vector<8xf32>
    %126 = vector.shape_cast %125 : vector<8xf32> to vector<8x1xf32>
    %127 = vector.broadcast %126 : vector<8x1xf32> to vector<8x8xf32>
    %128 = arith.divf %124, %127 : vector<8x8xf32>
    %129 = vector.extract_strided_slice %16 {offsets = [0, 24], sizes = [8, 4], strides = [1, 1]} : vector<8x32xf32> to vector<8x4xf32>
    %cst_44 = arith.constant dense<0.000000e+00> : vector<8x4xf32>
    %130 = tpu.matmul %128, %129, %cst_44 {dimension_numbers = #tpu.dot_dimension_numbers<[1], [0], [0], [1], [0, 0, 1, 1], [], []>} : vector<8x8xf32>, vector<8x4xf32>, vector<8x4xf32> -> vector<8x4xf32>
    %131 = vector.extract_strided_slice %17 {offsets = [0, 28], sizes = [8, 4], strides = [1, 1]} : vector<8x32xf32> to vector<8x4xf32>
    %cst_45 = arith.constant 5.000000e-01 : f32
    %132 = vector.broadcast %cst_45 : f32 to vector<8x4xf32>
    %133 = arith.mulf %131, %132 : vector<8x4xf32>
    %134 = vector.extract_strided_slice %18 {offsets = [0, 28], sizes = [8, 4], strides = [1, 1]} : vector<8x32xf32> to vector<8x4xf32>
    %cst_46 = arith.constant dense<0.000000e+00> : vector<8x8xf32>
    %135 = tpu.matmul %133, %134, %cst_46 {dimension_numbers = #tpu.dot_dimension_numbers<[1], [1], [0], [0], [0, 0, 1, 0], [], []>} : vector<8x4xf32>, vector<8x4xf32>, vector<8x8xf32> -> vector<8x8xf32>
    %cst_47 = arith.constant dense<0xFF800000> : vector<8xf32>
    %136 = vector.multi_reduction <maximumf>, %135, %cst_47 [1] : vector<8x8xf32> to vector<8xf32>
    %137 = vector.shape_cast %136 : vector<8xf32> to vector<8x1xf32>
    %138 = vector.broadcast %137 : vector<8x1xf32> to vector<8x8xf32>
    %139 = arith.subf %135, %138 : vector<8x8xf32>
    %140 = math.exp %139 : vector<8x8xf32>
    %cst_48 = arith.constant dense<0.000000e+00> : vector<8xf32>
    %141 = vector.multi_reduction <add>, %140, %cst_48 [1] : vector<8x8xf32> to vector<8xf32>
    %142 = vector.shape_cast %141 : vector<8xf32> to vector<8x1xf32>
    %143 = vector.broadcast %142 : vector<8x1xf32> to vector<8x8xf32>
    %144 = arith.divf %140, %143 : vector<8x8xf32>
    %145 = vector.extract_strided_slice %16 {offsets = [0, 28], sizes = [8, 4], strides = [1, 1]} : vector<8x32xf32> to vector<8x4xf32>
    %cst_49 = arith.constant dense<0.000000e+00> : vector<8x4xf32>
    %146 = tpu.matmul %144, %145, %cst_49 {dimension_numbers = #tpu.dot_dimension_numbers<[1], [0], [0], [1], [0, 0, 1, 1], [], []>} : vector<8x8xf32>, vector<8x4xf32>, vector<8x4xf32> -> vector<8x4xf32>
    %147 = tpu.concatenate %34, %50, %66, %82, %98, %114, %130, %146 in 1 : vector<8x4xf32>, vector<8x4xf32>, vector<8x4xf32>, vector<8x4xf32>, vector<8x4xf32>, vector<8x4xf32>, vector<8x4xf32>, vector<8x4xf32> -> vector<8x32xf32>
    %c0_50 = arith.constant 0 : index
    %c0_51 = arith.constant 0 : index
    %148 = vector.load %arg5[%c0_50, %c0_51] : memref<32x32xf32, #tpu.memory_space<vmem>>, vector<32x32xf32>
    %cst_52 = arith.constant dense<0.000000e+00> : vector<8x32xf32>
    %149 = tpu.matmul %147, %148, %cst_52 {dimension_numbers = #tpu.dot_dimension_numbers<[1], [0], [0], [1], [0, 0, 1, 1], [], []>} : vector<8x32xf32>, vector<32x32xf32>, vector<8x32xf32> -> vector<8x32xf32>
    %c0_53 = arith.constant 0 : index
    %c0_54 = arith.constant 0 : index
    %150 = vector.load %arg6[%c0_53, %c0_54] : memref<1x32xf32, #tpu.memory_space<vmem>>, vector<1x32xf32>
    %151 = vector.broadcast %150 : vector<1x32xf32> to vector<8x32xf32>
    %152 = arith.addf %149, %151 : vector<8x32xf32>
    %c0_55 = arith.constant 0 : index
    %c0_56 = arith.constant 0 : index
    %c0_57 = arith.constant 0 : index
    %153 = vector.load %arg7[%c0_55, %c0_56, %c0_57] : memref<1x8x32xf32, #tpu.memory_space<vmem>>, vector<1x8x32xf32>
    %154 = vector.shape_cast %153 : vector<1x8x32xf32> to vector<8x32xf32>
    %155 = vector.shape_cast %152 : vector<8x32xf32> to vector<1x8x32xf32>
    tpu.vector_store %arg7[%c0_55, %c0_56, %c0_57], %155 {strides = array<i32>} : memref<1x8x32xf32, #tpu.memory_space<vmem>>, vector<1x8x32xf32>,
    return
  }
  func.func @transform_0(%arg0: i32) -> (i32, i32, i32) {
    %c0_i32 = arith.constant 0 : i32
    %c0_i32_0 = arith.constant 0 : i32
    %c0_i32_1 = arith.constant 0 : i32
    return %arg0, %c0_i32, %c0_i32_0 : i32, i32, i32
  }
  func.func @transform_1(%arg0: i32) -> (i32, i32, i32) {
    %c0_i32 = arith.constant 0 : i32
    %c0_i32_0 = arith.constant 0 : i32
    %c0_i32_1 = arith.constant 0 : i32
    return %arg0, %c0_i32, %c0_i32_0 : i32, i32, i32
  }
  func.func @transform_2(%arg0: i32) -> (i32, i32) {
    %c0_i32 = arith.constant 0 : i32
    %c0_i32_0 = arith.constant 0 : i32
    %c0_i32_1 = arith.constant 0 : i32
    return %c0_i32, %c0_i32_0 : i32, i32
  }
  func.func @transform_3(%arg0: i32) -> (i32, i32) {
    %c0_i32 = arith.constant 0 : i32
    %c0_i32_0 = arith.constant 0 : i32
    %c0_i32_1 = arith.constant 0 : i32
    return %c0_i32, %c0_i32_0 : i32, i32
  }
  func.func @transform_4(%arg0: i32) -> (i32, i32) {
    %c0_i32 = arith.constant 0 : i32
    %c0_i32_0 = arith.constant 0 : i32
    %c0_i32_1 = arith.constant 0 : i32
    return %c0_i32, %c0_i32_0 : i32, i32
  }
  func.func @transform_5(%arg0: i32) -> (i32, i32) {
    %c0_i32 = arith.constant 0 : i32
    %c0_i32_0 = arith.constant 0 : i32
    %c0_i32_1 = arith.constant 0 : i32
    return %c0_i32, %c0_i32_0 : i32, i32
  }
  func.func @transform_6(%arg0: i32) -> (i32, i32, i32) {
    %c0_i32 = arith.constant 0 : i32
    %c0_i32_0 = arith.constant 0 : i32
    %c0_i32_1 = arith.constant 0 : i32
    return %arg0, %c0_i32, %c0_i32_0 : i32, i32, i32
  }
}

module attributes {stable_mosaic.version = 11 : i64} {
  func.func @_cross_attn_kernel(%arg0: i32, %arg1: memref<1x8x32xf32, #tpu.memory_space<vmem>>, %arg2: memref<1x8x32xf32, #tpu.memory_space<vmem>>, %arg3: memref<1x16x32xf32, #tpu.memory_space<vmem>>, %arg4: memref<1x16x32xf32, #tpu.memory_space<vmem>>, %arg5: memref<32x96xf32, #tpu.memory_space<vmem>>, %arg6: memref<1x96xf32, #tpu.memory_space<vmem>>, %arg7: memref<32x32xf32, #tpu.memory_space<vmem>>, %arg8: memref<1x32xf32, #tpu.memory_space<vmem>>, %arg9: memref<1x8x32xf32, #tpu.memory_space<vmem>>) attributes {dimension_semantics = [#tpu.dimension_semantics<parallel>], iteration_bounds = array<i64: 2>, scalar_prefetch = 0 : i64, scratch_operands = 0 : i64, tpu.core_type = #tpu.core_type<tc>, window_params = [{transform_indices = @transform_0, window_bounds = array<i64: 1, 8, 32>}, {transform_indices = @transform_1, window_bounds = array<i64: 1, 8, 32>}, {transform_indices = @transform_2, window_bounds = array<i64: 1, 16, 32>}, {transform_indices = @transform_3, window_bounds = array<i64: 1, 16, 32>}, {pipeline_mode = #tpu.pipeline_mode<synchronous>, transform_indices = @transform_4, window_bounds = array<i64: 32, 96>}, {pipeline_mode = #tpu.pipeline_mode<synchronous>, transform_indices = @transform_5, window_bounds = array<i64: 1, 96>}, {pipeline_mode = #tpu.pipeline_mode<synchronous>, transform_indices = @transform_6, window_bounds = array<i64: 32, 32>}, {pipeline_mode = #tpu.pipeline_mode<synchronous>, transform_indices = @transform_7, window_bounds = array<i64: 1, 32>}, {transform_indices = @transform_8, window_bounds = array<i64: 1, 8, 32>}]} {
    %c0 = arith.constant 0 : index
    %c0_0 = arith.constant 0 : index
    %0 = vector.load %arg5[%c0, %c0_0] : memref<32x96xf32, #tpu.memory_space<vmem>>, vector<32x96xf32>
    %c0_1 = arith.constant 0 : index
    %c0_2 = arith.constant 0 : index
    %1 = vector.load %arg6[%c0_1, %c0_2] : memref<1x96xf32, #tpu.memory_space<vmem>>, vector<1x96xf32>
    %c0_3 = arith.constant 0 : index
    %c0_4 = arith.constant 0 : index
    %c0_5 = arith.constant 0 : index
    %2 = vector.load %arg1[%c0_3, %c0_4, %c0_5] : memref<1x8x32xf32, #tpu.memory_space<vmem>>, vector<1x8x32xf32>
    %3 = vector.shape_cast %2 : vector<1x8x32xf32> to vector<8x32xf32>
    %c0_6 = arith.constant 0 : index
    %c0_7 = arith.constant 0 : index
    %c0_8 = arith.constant 0 : index
    %4 = vector.load %arg2[%c0_6, %c0_7, %c0_8] : memref<1x8x32xf32, #tpu.memory_space<vmem>>, vector<1x8x32xf32>
    %5 = vector.shape_cast %4 : vector<1x8x32xf32> to vector<8x32xf32>
    %6 = arith.addf %3, %5 : vector<8x32xf32>
    %7 = vector.extract_strided_slice %0 {offsets = [0, 0], sizes = [32, 32], strides = [1, 1]} : vector<32x96xf32> to vector<32x32xf32>
    %cst = arith.constant dense<0.000000e+00> : vector<8x32xf32>
    %8 = tpu.matmul %6, %7, %cst {dimension_numbers = #tpu.dot_dimension_numbers<[1], [0], [0], [1], [0, 0, 1, 1], [], []>} : vector<8x32xf32>, vector<32x32xf32>, vector<8x32xf32> -> vector<8x32xf32>
    %9 = vector.extract_strided_slice %1 {offsets = [0, 0], sizes = [1, 32], strides = [1, 1]} : vector<1x96xf32> to vector<1x32xf32>
    %10 = vector.broadcast %9 : vector<1x32xf32> to vector<8x32xf32>
    %11 = arith.addf %8, %10 : vector<8x32xf32>
    %c0_9 = arith.constant 0 : index
    %c0_10 = arith.constant 0 : index
    %c0_11 = arith.constant 0 : index
    %12 = vector.load %arg3[%c0_9, %c0_10, %c0_11] : memref<1x16x32xf32, #tpu.memory_space<vmem>>, vector<1x16x32xf32>
    %13 = vector.shape_cast %12 : vector<1x16x32xf32> to vector<16x32xf32>
    %14 = vector.extract_strided_slice %0 {offsets = [0, 32], sizes = [32, 32], strides = [1, 1]} : vector<32x96xf32> to vector<32x32xf32>
    %cst_12 = arith.constant dense<0.000000e+00> : vector<16x32xf32>
    %15 = tpu.matmul %13, %14, %cst_12 {dimension_numbers = #tpu.dot_dimension_numbers<[1], [0], [0], [1], [0, 0, 1, 1], [], []>} : vector<16x32xf32>, vector<32x32xf32>, vector<16x32xf32> -> vector<16x32xf32>
    %16 = vector.extract_strided_slice %1 {offsets = [0, 32], sizes = [1, 32], strides = [1, 1]} : vector<1x96xf32> to vector<1x32xf32>
    %17 = vector.broadcast %16 : vector<1x32xf32> to vector<16x32xf32>
    %18 = arith.addf %15, %17 : vector<16x32xf32>
    %c0_13 = arith.constant 0 : index
    %c0_14 = arith.constant 0 : index
    %c0_15 = arith.constant 0 : index
    %19 = vector.load %arg4[%c0_13, %c0_14, %c0_15] : memref<1x16x32xf32, #tpu.memory_space<vmem>>, vector<1x16x32xf32>
    %20 = vector.shape_cast %19 : vector<1x16x32xf32> to vector<16x32xf32>
    %21 = vector.extract_strided_slice %0 {offsets = [0, 64], sizes = [32, 32], strides = [1, 1]} : vector<32x96xf32> to vector<32x32xf32>
    %cst_16 = arith.constant dense<0.000000e+00> : vector<16x32xf32>
    %22 = tpu.matmul %20, %21, %cst_16 {dimension_numbers = #tpu.dot_dimension_numbers<[1], [0], [0], [1], [0, 0, 1, 1], [], []>} : vector<16x32xf32>, vector<32x32xf32>, vector<16x32xf32> -> vector<16x32xf32>
    %23 = vector.extract_strided_slice %1 {offsets = [0, 64], sizes = [1, 32], strides = [1, 1]} : vector<1x96xf32> to vector<1x32xf32>
    %24 = vector.broadcast %23 : vector<1x32xf32> to vector<16x32xf32>
    %25 = arith.addf %22, %24 : vector<16x32xf32>
    %26 = vector.extract_strided_slice %11 {offsets = [0, 0], sizes = [8, 4], strides = [1, 1]} : vector<8x32xf32> to vector<8x4xf32>
    %cst_17 = arith.constant 5.000000e-01 : f32
    %27 = vector.broadcast %cst_17 : f32 to vector<8x4xf32>
    %28 = arith.mulf %26, %27 : vector<8x4xf32>
    %29 = vector.extract_strided_slice %18 {offsets = [0, 0], sizes = [16, 4], strides = [1, 1]} : vector<16x32xf32> to vector<16x4xf32>
    %cst_18 = arith.constant dense<0.000000e+00> : vector<8x16xf32>
    %30 = tpu.matmul %28, %29, %cst_18 {dimension_numbers = #tpu.dot_dimension_numbers<[1], [1], [0], [0], [0, 0, 1, 0], [], []>} : vector<8x4xf32>, vector<16x4xf32>, vector<8x16xf32> -> vector<8x16xf32>
    %cst_19 = arith.constant dense<0xFF800000> : vector<8xf32>
    %31 = vector.multi_reduction <maximumf>, %30, %cst_19 [1] : vector<8x16xf32> to vector<8xf32>
    %32 = vector.shape_cast %31 : vector<8xf32> to vector<8x1xf32>
    %33 = vector.broadcast %32 : vector<8x1xf32> to vector<8x16xf32>
    %34 = arith.subf %30, %33 : vector<8x16xf32>
    %35 = math.exp %34 : vector<8x16xf32>
    %cst_20 = arith.constant dense<0.000000e+00> : vector<8xf32>
    %36 = vector.multi_reduction <add>, %35, %cst_20 [1] : vector<8x16xf32> to vector<8xf32>
    %37 = vector.shape_cast %36 : vector<8xf32> to vector<8x1xf32>
    %38 = vector.broadcast %37 : vector<8x1xf32> to vector<8x16xf32>
    %39 = arith.divf %35, %38 : vector<8x16xf32>
    %40 = vector.extract_strided_slice %25 {offsets = [0, 0], sizes = [16, 4], strides = [1, 1]} : vector<16x32xf32> to vector<16x4xf32>
    %cst_21 = arith.constant dense<0.000000e+00> : vector<8x4xf32>
    %41 = tpu.matmul %39, %40, %cst_21 {dimension_numbers = #tpu.dot_dimension_numbers<[1], [0], [0], [1], [0, 0, 1, 1], [], []>} : vector<8x16xf32>, vector<16x4xf32>, vector<8x4xf32> -> vector<8x4xf32>
    %42 = vector.extract_strided_slice %11 {offsets = [0, 4], sizes = [8, 4], strides = [1, 1]} : vector<8x32xf32> to vector<8x4xf32>
    %cst_22 = arith.constant 5.000000e-01 : f32
    %43 = vector.broadcast %cst_22 : f32 to vector<8x4xf32>
    %44 = arith.mulf %42, %43 : vector<8x4xf32>
    %45 = vector.extract_strided_slice %18 {offsets = [0, 4], sizes = [16, 4], strides = [1, 1]} : vector<16x32xf32> to vector<16x4xf32>
    %cst_23 = arith.constant dense<0.000000e+00> : vector<8x16xf32>
    %46 = tpu.matmul %44, %45, %cst_23 {dimension_numbers = #tpu.dot_dimension_numbers<[1], [1], [0], [0], [0, 0, 1, 0], [], []>} : vector<8x4xf32>, vector<16x4xf32>, vector<8x16xf32> -> vector<8x16xf32>
    %cst_24 = arith.constant dense<0xFF800000> : vector<8xf32>
    %47 = vector.multi_reduction <maximumf>, %46, %cst_24 [1] : vector<8x16xf32> to vector<8xf32>
    %48 = vector.shape_cast %47 : vector<8xf32> to vector<8x1xf32>
    %49 = vector.broadcast %48 : vector<8x1xf32> to vector<8x16xf32>
    %50 = arith.subf %46, %49 : vector<8x16xf32>
    %51 = math.exp %50 : vector<8x16xf32>
    %cst_25 = arith.constant dense<0.000000e+00> : vector<8xf32>
    %52 = vector.multi_reduction <add>, %51, %cst_25 [1] : vector<8x16xf32> to vector<8xf32>
    %53 = vector.shape_cast %52 : vector<8xf32> to vector<8x1xf32>
    %54 = vector.broadcast %53 : vector<8x1xf32> to vector<8x16xf32>
    %55 = arith.divf %51, %54 : vector<8x16xf32>
    %56 = vector.extract_strided_slice %25 {offsets = [0, 4], sizes = [16, 4], strides = [1, 1]} : vector<16x32xf32> to vector<16x4xf32>
    %cst_26 = arith.constant dense<0.000000e+00> : vector<8x4xf32>
    %57 = tpu.matmul %55, %56, %cst_26 {dimension_numbers = #tpu.dot_dimension_numbers<[1], [0], [0], [1], [0, 0, 1, 1], [], []>} : vector<8x16xf32>, vector<16x4xf32>, vector<8x4xf32> -> vector<8x4xf32>
    %58 = vector.extract_strided_slice %11 {offsets = [0, 8], sizes = [8, 4], strides = [1, 1]} : vector<8x32xf32> to vector<8x4xf32>
    %cst_27 = arith.constant 5.000000e-01 : f32
    %59 = vector.broadcast %cst_27 : f32 to vector<8x4xf32>
    %60 = arith.mulf %58, %59 : vector<8x4xf32>
    %61 = vector.extract_strided_slice %18 {offsets = [0, 8], sizes = [16, 4], strides = [1, 1]} : vector<16x32xf32> to vector<16x4xf32>
    %cst_28 = arith.constant dense<0.000000e+00> : vector<8x16xf32>
    %62 = tpu.matmul %60, %61, %cst_28 {dimension_numbers = #tpu.dot_dimension_numbers<[1], [1], [0], [0], [0, 0, 1, 0], [], []>} : vector<8x4xf32>, vector<16x4xf32>, vector<8x16xf32> -> vector<8x16xf32>
    %cst_29 = arith.constant dense<0xFF800000> : vector<8xf32>
    %63 = vector.multi_reduction <maximumf>, %62, %cst_29 [1] : vector<8x16xf32> to vector<8xf32>
    %64 = vector.shape_cast %63 : vector<8xf32> to vector<8x1xf32>
    %65 = vector.broadcast %64 : vector<8x1xf32> to vector<8x16xf32>
    %66 = arith.subf %62, %65 : vector<8x16xf32>
    %67 = math.exp %66 : vector<8x16xf32>
    %cst_30 = arith.constant dense<0.000000e+00> : vector<8xf32>
    %68 = vector.multi_reduction <add>, %67, %cst_30 [1] : vector<8x16xf32> to vector<8xf32>
    %69 = vector.shape_cast %68 : vector<8xf32> to vector<8x1xf32>
    %70 = vector.broadcast %69 : vector<8x1xf32> to vector<8x16xf32>
    %71 = arith.divf %67, %70 : vector<8x16xf32>
    %72 = vector.extract_strided_slice %25 {offsets = [0, 8], sizes = [16, 4], strides = [1, 1]} : vector<16x32xf32> to vector<16x4xf32>
    %cst_31 = arith.constant dense<0.000000e+00> : vector<8x4xf32>
    %73 = tpu.matmul %71, %72, %cst_31 {dimension_numbers = #tpu.dot_dimension_numbers<[1], [0], [0], [1], [0, 0, 1, 1], [], []>} : vector<8x16xf32>, vector<16x4xf32>, vector<8x4xf32> -> vector<8x4xf32>
    %74 = vector.extract_strided_slice %11 {offsets = [0, 12], sizes = [8, 4], strides = [1, 1]} : vector<8x32xf32> to vector<8x4xf32>
    %cst_32 = arith.constant 5.000000e-01 : f32
    %75 = vector.broadcast %cst_32 : f32 to vector<8x4xf32>
    %76 = arith.mulf %74, %75 : vector<8x4xf32>
    %77 = vector.extract_strided_slice %18 {offsets = [0, 12], sizes = [16, 4], strides = [1, 1]} : vector<16x32xf32> to vector<16x4xf32>
    %cst_33 = arith.constant dense<0.000000e+00> : vector<8x16xf32>
    %78 = tpu.matmul %76, %77, %cst_33 {dimension_numbers = #tpu.dot_dimension_numbers<[1], [1], [0], [0], [0, 0, 1, 0], [], []>} : vector<8x4xf32>, vector<16x4xf32>, vector<8x16xf32> -> vector<8x16xf32>
    %cst_34 = arith.constant dense<0xFF800000> : vector<8xf32>
    %79 = vector.multi_reduction <maximumf>, %78, %cst_34 [1] : vector<8x16xf32> to vector<8xf32>
    %80 = vector.shape_cast %79 : vector<8xf32> to vector<8x1xf32>
    %81 = vector.broadcast %80 : vector<8x1xf32> to vector<8x16xf32>
    %82 = arith.subf %78, %81 : vector<8x16xf32>
    %83 = math.exp %82 : vector<8x16xf32>
    %cst_35 = arith.constant dense<0.000000e+00> : vector<8xf32>
    %84 = vector.multi_reduction <add>, %83, %cst_35 [1] : vector<8x16xf32> to vector<8xf32>
    %85 = vector.shape_cast %84 : vector<8xf32> to vector<8x1xf32>
    %86 = vector.broadcast %85 : vector<8x1xf32> to vector<8x16xf32>
    %87 = arith.divf %83, %86 : vector<8x16xf32>
    %88 = vector.extract_strided_slice %25 {offsets = [0, 12], sizes = [16, 4], strides = [1, 1]} : vector<16x32xf32> to vector<16x4xf32>
    %cst_36 = arith.constant dense<0.000000e+00> : vector<8x4xf32>
    %89 = tpu.matmul %87, %88, %cst_36 {dimension_numbers = #tpu.dot_dimension_numbers<[1], [0], [0], [1], [0, 0, 1, 1], [], []>} : vector<8x16xf32>, vector<16x4xf32>, vector<8x4xf32> -> vector<8x4xf32>
    %90 = vector.extract_strided_slice %11 {offsets = [0, 16], sizes = [8, 4], strides = [1, 1]} : vector<8x32xf32> to vector<8x4xf32>
    %cst_37 = arith.constant 5.000000e-01 : f32
    %91 = vector.broadcast %cst_37 : f32 to vector<8x4xf32>
    %92 = arith.mulf %90, %91 : vector<8x4xf32>
    %93 = vector.extract_strided_slice %18 {offsets = [0, 16], sizes = [16, 4], strides = [1, 1]} : vector<16x32xf32> to vector<16x4xf32>
    %cst_38 = arith.constant dense<0.000000e+00> : vector<8x16xf32>
    %94 = tpu.matmul %92, %93, %cst_38 {dimension_numbers = #tpu.dot_dimension_numbers<[1], [1], [0], [0], [0, 0, 1, 0], [], []>} : vector<8x4xf32>, vector<16x4xf32>, vector<8x16xf32> -> vector<8x16xf32>
    %cst_39 = arith.constant dense<0xFF800000> : vector<8xf32>
    %95 = vector.multi_reduction <maximumf>, %94, %cst_39 [1] : vector<8x16xf32> to vector<8xf32>
    %96 = vector.shape_cast %95 : vector<8xf32> to vector<8x1xf32>
    %97 = vector.broadcast %96 : vector<8x1xf32> to vector<8x16xf32>
    %98 = arith.subf %94, %97 : vector<8x16xf32>
    %99 = math.exp %98 : vector<8x16xf32>
    %cst_40 = arith.constant dense<0.000000e+00> : vector<8xf32>
    %100 = vector.multi_reduction <add>, %99, %cst_40 [1] : vector<8x16xf32> to vector<8xf32>
    %101 = vector.shape_cast %100 : vector<8xf32> to vector<8x1xf32>
    %102 = vector.broadcast %101 : vector<8x1xf32> to vector<8x16xf32>
    %103 = arith.divf %99, %102 : vector<8x16xf32>
    %104 = vector.extract_strided_slice %25 {offsets = [0, 16], sizes = [16, 4], strides = [1, 1]} : vector<16x32xf32> to vector<16x4xf32>
    %cst_41 = arith.constant dense<0.000000e+00> : vector<8x4xf32>
    %105 = tpu.matmul %103, %104, %cst_41 {dimension_numbers = #tpu.dot_dimension_numbers<[1], [0], [0], [1], [0, 0, 1, 1], [], []>} : vector<8x16xf32>, vector<16x4xf32>, vector<8x4xf32> -> vector<8x4xf32>
    %106 = vector.extract_strided_slice %11 {offsets = [0, 20], sizes = [8, 4], strides = [1, 1]} : vector<8x32xf32> to vector<8x4xf32>
    %cst_42 = arith.constant 5.000000e-01 : f32
    %107 = vector.broadcast %cst_42 : f32 to vector<8x4xf32>
    %108 = arith.mulf %106, %107 : vector<8x4xf32>
    %109 = vector.extract_strided_slice %18 {offsets = [0, 20], sizes = [16, 4], strides = [1, 1]} : vector<16x32xf32> to vector<16x4xf32>
    %cst_43 = arith.constant dense<0.000000e+00> : vector<8x16xf32>
    %110 = tpu.matmul %108, %109, %cst_43 {dimension_numbers = #tpu.dot_dimension_numbers<[1], [1], [0], [0], [0, 0, 1, 0], [], []>} : vector<8x4xf32>, vector<16x4xf32>, vector<8x16xf32> -> vector<8x16xf32>
    %cst_44 = arith.constant dense<0xFF800000> : vector<8xf32>
    %111 = vector.multi_reduction <maximumf>, %110, %cst_44 [1] : vector<8x16xf32> to vector<8xf32>
    %112 = vector.shape_cast %111 : vector<8xf32> to vector<8x1xf32>
    %113 = vector.broadcast %112 : vector<8x1xf32> to vector<8x16xf32>
    %114 = arith.subf %110, %113 : vector<8x16xf32>
    %115 = math.exp %114 : vector<8x16xf32>
    %cst_45 = arith.constant dense<0.000000e+00> : vector<8xf32>
    %116 = vector.multi_reduction <add>, %115, %cst_45 [1] : vector<8x16xf32> to vector<8xf32>
    %117 = vector.shape_cast %116 : vector<8xf32> to vector<8x1xf32>
    %118 = vector.broadcast %117 : vector<8x1xf32> to vector<8x16xf32>
    %119 = arith.divf %115, %118 : vector<8x16xf32>
    %120 = vector.extract_strided_slice %25 {offsets = [0, 20], sizes = [16, 4], strides = [1, 1]} : vector<16x32xf32> to vector<16x4xf32>
    %cst_46 = arith.constant dense<0.000000e+00> : vector<8x4xf32>
    %121 = tpu.matmul %119, %120, %cst_46 {dimension_numbers = #tpu.dot_dimension_numbers<[1], [0], [0], [1], [0, 0, 1, 1], [], []>} : vector<8x16xf32>, vector<16x4xf32>, vector<8x4xf32> -> vector<8x4xf32>
    %122 = vector.extract_strided_slice %11 {offsets = [0, 24], sizes = [8, 4], strides = [1, 1]} : vector<8x32xf32> to vector<8x4xf32>
    %cst_47 = arith.constant 5.000000e-01 : f32
    %123 = vector.broadcast %cst_47 : f32 to vector<8x4xf32>
    %124 = arith.mulf %122, %123 : vector<8x4xf32>
    %125 = vector.extract_strided_slice %18 {offsets = [0, 24], sizes = [16, 4], strides = [1, 1]} : vector<16x32xf32> to vector<16x4xf32>
    %cst_48 = arith.constant dense<0.000000e+00> : vector<8x16xf32>
    %126 = tpu.matmul %124, %125, %cst_48 {dimension_numbers = #tpu.dot_dimension_numbers<[1], [1], [0], [0], [0, 0, 1, 0], [], []>} : vector<8x4xf32>, vector<16x4xf32>, vector<8x16xf32> -> vector<8x16xf32>
    %cst_49 = arith.constant dense<0xFF800000> : vector<8xf32>
    %127 = vector.multi_reduction <maximumf>, %126, %cst_49 [1] : vector<8x16xf32> to vector<8xf32>
    %128 = vector.shape_cast %127 : vector<8xf32> to vector<8x1xf32>
    %129 = vector.broadcast %128 : vector<8x1xf32> to vector<8x16xf32>
    %130 = arith.subf %126, %129 : vector<8x16xf32>
    %131 = math.exp %130 : vector<8x16xf32>
    %cst_50 = arith.constant dense<0.000000e+00> : vector<8xf32>
    %132 = vector.multi_reduction <add>, %131, %cst_50 [1] : vector<8x16xf32> to vector<8xf32>
    %133 = vector.shape_cast %132 : vector<8xf32> to vector<8x1xf32>
    %134 = vector.broadcast %133 : vector<8x1xf32> to vector<8x16xf32>
    %135 = arith.divf %131, %134 : vector<8x16xf32>
    %136 = vector.extract_strided_slice %25 {offsets = [0, 24], sizes = [16, 4], strides = [1, 1]} : vector<16x32xf32> to vector<16x4xf32>
    %cst_51 = arith.constant dense<0.000000e+00> : vector<8x4xf32>
    %137 = tpu.matmul %135, %136, %cst_51 {dimension_numbers = #tpu.dot_dimension_numbers<[1], [0], [0], [1], [0, 0, 1, 1], [], []>} : vector<8x16xf32>, vector<16x4xf32>, vector<8x4xf32> -> vector<8x4xf32>
    %138 = vector.extract_strided_slice %11 {offsets = [0, 28], sizes = [8, 4], strides = [1, 1]} : vector<8x32xf32> to vector<8x4xf32>
    %cst_52 = arith.constant 5.000000e-01 : f32
    %139 = vector.broadcast %cst_52 : f32 to vector<8x4xf32>
    %140 = arith.mulf %138, %139 : vector<8x4xf32>
    %141 = vector.extract_strided_slice %18 {offsets = [0, 28], sizes = [16, 4], strides = [1, 1]} : vector<16x32xf32> to vector<16x4xf32>
    %cst_53 = arith.constant dense<0.000000e+00> : vector<8x16xf32>
    %142 = tpu.matmul %140, %141, %cst_53 {dimension_numbers = #tpu.dot_dimension_numbers<[1], [1], [0], [0], [0, 0, 1, 0], [], []>} : vector<8x4xf32>, vector<16x4xf32>, vector<8x16xf32> -> vector<8x16xf32>
    %cst_54 = arith.constant dense<0xFF800000> : vector<8xf32>
    %143 = vector.multi_reduction <maximumf>, %142, %cst_54 [1] : vector<8x16xf32> to vector<8xf32>
    %144 = vector.shape_cast %143 : vector<8xf32> to vector<8x1xf32>
    %145 = vector.broadcast %144 : vector<8x1xf32> to vector<8x16xf32>
    %146 = arith.subf %142, %145 : vector<8x16xf32>
    %147 = math.exp %146 : vector<8x16xf32>
    %cst_55 = arith.constant dense<0.000000e+00> : vector<8xf32>
    %148 = vector.multi_reduction <add>, %147, %cst_55 [1] : vector<8x16xf32> to vector<8xf32>
    %149 = vector.shape_cast %148 : vector<8xf32> to vector<8x1xf32>
    %150 = vector.broadcast %149 : vector<8x1xf32> to vector<8x16xf32>
    %151 = arith.divf %147, %150 : vector<8x16xf32>
    %152 = vector.extract_strided_slice %25 {offsets = [0, 28], sizes = [16, 4], strides = [1, 1]} : vector<16x32xf32> to vector<16x4xf32>
    %cst_56 = arith.constant dense<0.000000e+00> : vector<8x4xf32>
    %153 = tpu.matmul %151, %152, %cst_56 {dimension_numbers = #tpu.dot_dimension_numbers<[1], [0], [0], [1], [0, 0, 1, 1], [], []>} : vector<8x16xf32>, vector<16x4xf32>, vector<8x4xf32> -> vector<8x4xf32>
    %154 = tpu.concatenate %41, %57, %73, %89, %105, %121, %137, %153 in 1 : vector<8x4xf32>, vector<8x4xf32>, vector<8x4xf32>, vector<8x4xf32>, vector<8x4xf32>, vector<8x4xf32>, vector<8x4xf32>, vector<8x4xf32> -> vector<8x32xf32>
    %c0_57 = arith.constant 0 : index
    %c0_58 = arith.constant 0 : index
    %155 = vector.load %arg7[%c0_57, %c0_58] : memref<32x32xf32, #tpu.memory_space<vmem>>, vector<32x32xf32>
    %cst_59 = arith.constant dense<0.000000e+00> : vector<8x32xf32>
    %156 = tpu.matmul %154, %155, %cst_59 {dimension_numbers = #tpu.dot_dimension_numbers<[1], [0], [0], [1], [0, 0, 1, 1], [], []>} : vector<8x32xf32>, vector<32x32xf32>, vector<8x32xf32> -> vector<8x32xf32>
    %c0_60 = arith.constant 0 : index
    %c0_61 = arith.constant 0 : index
    %157 = vector.load %arg8[%c0_60, %c0_61] : memref<1x32xf32, #tpu.memory_space<vmem>>, vector<1x32xf32>
    %158 = vector.broadcast %157 : vector<1x32xf32> to vector<8x32xf32>
    %159 = arith.addf %156, %158 : vector<8x32xf32>
    %c0_62 = arith.constant 0 : index
    %c0_63 = arith.constant 0 : index
    %c0_64 = arith.constant 0 : index
    %160 = vector.load %arg9[%c0_62, %c0_63, %c0_64] : memref<1x8x32xf32, #tpu.memory_space<vmem>>, vector<1x8x32xf32>
    %161 = vector.shape_cast %160 : vector<1x8x32xf32> to vector<8x32xf32>
    %162 = vector.shape_cast %159 : vector<8x32xf32> to vector<1x8x32xf32>
    tpu.vector_store %arg9[%c0_62, %c0_63, %c0_64], %162 {strides = array<i32>} : memref<1x8x32xf32, #tpu.memory_space<vmem>>, vector<1x8x32xf32>,
    return
  }
  func.func @transform_0(%arg0: i32) -> (i32, i32, i32) {
    %c0_i32 = arith.constant 0 : i32
    %c0_i32_0 = arith.constant 0 : i32
    %c0_i32_1 = arith.constant 0 : i32
    return %arg0, %c0_i32, %c0_i32_0 : i32, i32, i32
  }
  func.func @transform_1(%arg0: i32) -> (i32, i32, i32) {
    %c0_i32 = arith.constant 0 : i32
    %c0_i32_0 = arith.constant 0 : i32
    %c0_i32_1 = arith.constant 0 : i32
    return %arg0, %c0_i32, %c0_i32_0 : i32, i32, i32
  }
  func.func @transform_2(%arg0: i32) -> (i32, i32, i32) {
    %c0_i32 = arith.constant 0 : i32
    %c0_i32_0 = arith.constant 0 : i32
    %c0_i32_1 = arith.constant 0 : i32
    return %arg0, %c0_i32, %c0_i32_0 : i32, i32, i32
  }
  func.func @transform_3(%arg0: i32) -> (i32, i32, i32) {
    %c0_i32 = arith.constant 0 : i32
    %c0_i32_0 = arith.constant 0 : i32
    %c0_i32_1 = arith.constant 0 : i32
    return %arg0, %c0_i32, %c0_i32_0 : i32, i32, i32
  }
  func.func @transform_4(%arg0: i32) -> (i32, i32) {
    %c0_i32 = arith.constant 0 : i32
    %c0_i32_0 = arith.constant 0 : i32
    %c0_i32_1 = arith.constant 0 : i32
    return %c0_i32, %c0_i32_0 : i32, i32
  }
  func.func @transform_5(%arg0: i32) -> (i32, i32) {
    %c0_i32 = arith.constant 0 : i32
    %c0_i32_0 = arith.constant 0 : i32
    %c0_i32_1 = arith.constant 0 : i32
    return %c0_i32, %c0_i32_0 : i32, i32
  }
  func.func @transform_6(%arg0: i32) -> (i32, i32) {
    %c0_i32 = arith.constant 0 : i32
    %c0_i32_0 = arith.constant 0 : i32
    %c0_i32_1 = arith.constant 0 : i32
    return %c0_i32, %c0_i32_0 : i32, i32
  }
  func.func @transform_7(%arg0: i32) -> (i32, i32) {
    %c0_i32 = arith.constant 0 : i32
    %c0_i32_0 = arith.constant 0 : i32
    %c0_i32_1 = arith.constant 0 : i32
    return %c0_i32, %c0_i32_0 : i32, i32
  }
  func.func @transform_8(%arg0: i32) -> (i32, i32, i32) {
    %c0_i32 = arith.constant 0 : i32
    %c0_i32_0 = arith.constant 0 : i32
    %c0_i32_1 = arith.constant 0 : i32
    return %arg0, %c0_i32, %c0_i32_0 : i32, i32, i32
  }
}

module attributes {stable_mosaic.version = 11 : i64} {
  func.func @_ffn_add_ln_kernel(%arg0: i32, %arg1: memref<16x32xf32, #tpu.memory_space<vmem>>, %arg2: memref<32x64xf32, #tpu.memory_space<vmem>>, %arg3: memref<1x64xf32, #tpu.memory_space<vmem>>, %arg4: memref<64x32xf32, #tpu.memory_space<vmem>>, %arg5: memref<1x32xf32, #tpu.memory_space<vmem>>, %arg6: memref<1x32xf32, #tpu.memory_space<vmem>>, %arg7: memref<1x32xf32, #tpu.memory_space<vmem>>, %arg8: memref<16x32xf32, #tpu.memory_space<vmem>>) attributes {dimension_semantics = [#tpu.dimension_semantics<parallel>], iteration_bounds = array<i64: 1>, scalar_prefetch = 0 : i64, scratch_operands = 0 : i64, tpu.core_type = #tpu.core_type<tc>, window_params = [{transform_indices = @transform_0, window_bounds = array<i64: 16, 32>}, {pipeline_mode = #tpu.pipeline_mode<synchronous>, transform_indices = @transform_1, window_bounds = array<i64: 32, 64>}, {pipeline_mode = #tpu.pipeline_mode<synchronous>, transform_indices = @transform_2, window_bounds = array<i64: 1, 64>}, {pipeline_mode = #tpu.pipeline_mode<synchronous>, transform_indices = @transform_3, window_bounds = array<i64: 64, 32>}, {pipeline_mode = #tpu.pipeline_mode<synchronous>, transform_indices = @transform_4, window_bounds = array<i64: 1, 32>}, {pipeline_mode = #tpu.pipeline_mode<synchronous>, transform_indices = @transform_5, window_bounds = array<i64: 1, 32>}, {pipeline_mode = #tpu.pipeline_mode<synchronous>, transform_indices = @transform_6, window_bounds = array<i64: 1, 32>}, {transform_indices = @transform_7, window_bounds = array<i64: 16, 32>}]} {
    %c0 = arith.constant 0 : index
    %c0_0 = arith.constant 0 : index
    %0 = vector.load %arg1[%c0, %c0_0] : memref<16x32xf32, #tpu.memory_space<vmem>>, vector<16x32xf32>
    %c0_1 = arith.constant 0 : index
    %c0_2 = arith.constant 0 : index
    %1 = vector.load %arg2[%c0_1, %c0_2] : memref<32x64xf32, #tpu.memory_space<vmem>>, vector<32x64xf32>
    %cst = arith.constant dense<0.000000e+00> : vector<16x64xf32>
    %2 = tpu.matmul %0, %1, %cst {dimension_numbers = #tpu.dot_dimension_numbers<[1], [0], [0], [1], [0, 0, 1, 1], [], []>} : vector<16x32xf32>, vector<32x64xf32>, vector<16x64xf32> -> vector<16x64xf32>
    %c0_3 = arith.constant 0 : index
    %c0_4 = arith.constant 0 : index
    %3 = vector.load %arg3[%c0_3, %c0_4] : memref<1x64xf32, #tpu.memory_space<vmem>>, vector<1x64xf32>
    %4 = vector.broadcast %3 : vector<1x64xf32> to vector<16x64xf32>
    %5 = arith.addf %2, %4 : vector<16x64xf32>
    %cst_5 = arith.constant 0.000000e+00 : f32
    %6 = vector.broadcast %cst_5 : f32 to vector<16x64xf32>
    %7 = arith.maximumf %5, %6 : vector<16x64xf32>
    %c0_6 = arith.constant 0 : index
    %c0_7 = arith.constant 0 : index
    %8 = vector.load %arg4[%c0_6, %c0_7] : memref<64x32xf32, #tpu.memory_space<vmem>>, vector<64x32xf32>
    %cst_8 = arith.constant dense<0.000000e+00> : vector<16x32xf32>
    %9 = tpu.matmul %7, %8, %cst_8 {dimension_numbers = #tpu.dot_dimension_numbers<[1], [0], [0], [1], [0, 0, 1, 1], [], []>} : vector<16x64xf32>, vector<64x32xf32>, vector<16x32xf32> -> vector<16x32xf32>
    %c0_9 = arith.constant 0 : index
    %c0_10 = arith.constant 0 : index
    %10 = vector.load %arg5[%c0_9, %c0_10] : memref<1x32xf32, #tpu.memory_space<vmem>>, vector<1x32xf32>
    %11 = vector.broadcast %10 : vector<1x32xf32> to vector<16x32xf32>
    %12 = arith.addf %9, %11 : vector<16x32xf32>
    %13 = arith.addf %0, %12 : vector<16x32xf32>
    %cst_11 = arith.constant dense<0.000000e+00> : vector<16xf32>
    %14 = vector.multi_reduction <add>, %13, %cst_11 [1] : vector<16x32xf32> to vector<16xf32>
    %15 = vector.shape_cast %14 : vector<16xf32> to vector<16x1xf32>
    %cst_12 = arith.constant 3.200000e+01 : f32
    %16 = vector.broadcast %cst_12 : f32 to vector<16x1xf32>
    %17 = arith.divf %15, %16 : vector<16x1xf32>
    %18 = vector.broadcast %17 : vector<16x1xf32> to vector<16x32xf32>
    %19 = arith.subf %13, %18 : vector<16x32xf32>
    %20 = arith.mulf %19, %19 : vector<16x32xf32>
    %cst_13 = arith.constant dense<0.000000e+00> : vector<16xf32>
    %21 = vector.multi_reduction <add>, %20, %cst_13 [1] : vector<16x32xf32> to vector<16xf32>
    %22 = vector.shape_cast %21 : vector<16xf32> to vector<16x1xf32>
    %cst_14 = arith.constant 3.200000e+01 : f32
    %23 = vector.broadcast %cst_14 : f32 to vector<16x1xf32>
    %24 = arith.divf %22, %23 : vector<16x1xf32>
    %cst_15 = arith.constant 9.99999974E-6 : f32
    %25 = vector.broadcast %cst_15 : f32 to vector<16x1xf32>
    %26 = arith.addf %24, %25 : vector<16x1xf32>
    %27 = math.rsqrt %26 : vector<16x1xf32>
    %28 = vector.broadcast %27 : vector<16x1xf32> to vector<16x32xf32>
    %29 = arith.mulf %19, %28 : vector<16x32xf32>
    %c0_16 = arith.constant 0 : index
    %c0_17 = arith.constant 0 : index
    %30 = vector.load %arg6[%c0_16, %c0_17] : memref<1x32xf32, #tpu.memory_space<vmem>>, vector<1x32xf32>
    %31 = vector.broadcast %30 : vector<1x32xf32> to vector<16x32xf32>
    %32 = arith.mulf %29, %31 : vector<16x32xf32>
    %c0_18 = arith.constant 0 : index
    %c0_19 = arith.constant 0 : index
    %33 = vector.load %arg7[%c0_18, %c0_19] : memref<1x32xf32, #tpu.memory_space<vmem>>, vector<1x32xf32>
    %34 = vector.broadcast %33 : vector<1x32xf32> to vector<16x32xf32>
    %35 = arith.addf %32, %34 : vector<16x32xf32>
    %c0_20 = arith.constant 0 : index
    %c0_21 = arith.constant 0 : index
    %36 = vector.load %arg8[%c0_20, %c0_21] : memref<16x32xf32, #tpu.memory_space<vmem>>, vector<16x32xf32>
    tpu.vector_store %arg8[%c0_20, %c0_21], %35 {strides = array<i32>} : memref<16x32xf32, #tpu.memory_space<vmem>>, vector<16x32xf32>,
    return
  }
  func.func @transform_0(%arg0: i32) -> (i32, i32) {
    %c0_i32 = arith.constant 0 : i32
    %c0_i32_0 = arith.constant 0 : i32
    return %arg0, %c0_i32 : i32, i32
  }
  func.func @transform_1(%arg0: i32) -> (i32, i32) {
    %c0_i32 = arith.constant 0 : i32
    %c0_i32_0 = arith.constant 0 : i32
    %c0_i32_1 = arith.constant 0 : i32
    return %c0_i32, %c0_i32_0 : i32, i32
  }
  func.func @transform_2(%arg0: i32) -> (i32, i32) {
    %c0_i32 = arith.constant 0 : i32
    %c0_i32_0 = arith.constant 0 : i32
    %c0_i32_1 = arith.constant 0 : i32
    return %c0_i32, %c0_i32_0 : i32, i32
  }
  func.func @transform_3(%arg0: i32) -> (i32, i32) {
    %c0_i32 = arith.constant 0 : i32
    %c0_i32_0 = arith.constant 0 : i32
    %c0_i32_1 = arith.constant 0 : i32
    return %c0_i32, %c0_i32_0 : i32, i32
  }
  func.func @transform_4(%arg0: i32) -> (i32, i32) {
    %c0_i32 = arith.constant 0 : i32
    %c0_i32_0 = arith.constant 0 : i32
    %c0_i32_1 = arith.constant 0 : i32
    return %c0_i32, %c0_i32_0 : i32, i32
  }
  func.func @transform_5(%arg0: i32) -> (i32, i32) {
    %c0_i32 = arith.constant 0 : i32
    %c0_i32_0 = arith.constant 0 : i32
    %c0_i32_1 = arith.constant 0 : i32
    return %c0_i32, %c0_i32_0 : i32, i32
  }
  func.func @transform_6(%arg0: i32) -> (i32, i32) {
    %c0_i32 = arith.constant 0 : i32
    %c0_i32_0 = arith.constant 0 : i32
    %c0_i32_1 = arith.constant 0 : i32
    return %c0_i32, %c0_i32_0 : i32, i32
  }
  func.func @transform_7(%arg0: i32) -> (i32, i32) {
    %c0_i32 = arith.constant 0 : i32
    %c0_i32_0 = arith.constant 0 : i32
    return %arg0, %c0_i32 : i32, i32
  }
}

module attributes {stable_mosaic.version = 11 : i64} {
  func.func @_l2norm_kernel(%arg0: memref<16x32xf32, #tpu.memory_space<vmem>>, %arg1: memref<16x32xf32, #tpu.memory_space<vmem>>) attributes {dimension_semantics = [], scalar_prefetch = 0 : i64, scratch_operands = 0 : i64, tpu.core_type = #tpu.core_type<tc>} {
    %c0 = arith.constant 0 : index
    %c0_0 = arith.constant 0 : index
    %0 = vector.load %arg0[%c0, %c0_0] : memref<16x32xf32, #tpu.memory_space<vmem>>, vector<16x32xf32>
    %1 = arith.mulf %0, %0 : vector<16x32xf32>
    %cst = arith.constant dense<0.000000e+00> : vector<16xf32>
    %2 = vector.multi_reduction <add>, %1, %cst [1] : vector<16x32xf32> to vector<16xf32>
    %3 = vector.shape_cast %2 : vector<16xf32> to vector<16x1xf32>
    %4 = math.sqrt %3 : vector<16x1xf32>
    %cst_1 = arith.constant 0.000000e+00 : f32
    %5 = vector.broadcast %cst_1 : f32 to vector<16x1xf32>
    %6 = arith.cmpf oeq, %4, %5 : vector<16x1xf32>
    %cst_2 = arith.constant 1.000000e+00 : f32
    %cst_3 = arith.constant 0.000000e+00 : f32
    %7 = vector.broadcast %cst_2 : f32 to vector<16x1xf32>
    %8 = vector.broadcast %cst_3 : f32 to vector<16x1xf32>
    %9 = arith.select %6, %7, %8 : vector<16x1xi1>, vector<16x1xf32>
    %cst_4 = arith.constant dense<0xFF800000> : vector<1xf32>
    %10 = vector.multi_reduction <maximumf>, %9, %cst_4 [0] : vector<16x1xf32> to vector<1xf32>
    %11 = vector.shape_cast %10 : vector<1xf32> to vector<1x1xf32>
    %cst_5 = arith.constant 1.000000e-10 : f32
    %12 = vector.broadcast %cst_5 : f32 to vector<1x1xf32>
    %13 = arith.mulf %12, %11 : vector<1x1xf32>
    %14 = vector.broadcast %13 : vector<1x1xf32> to vector<16x1xf32>
    %15 = arith.addf %4, %14 : vector<16x1xf32>
    %16 = vector.broadcast %15 : vector<16x1xf32> to vector<16x32xf32>
    %17 = arith.divf %0, %16 : vector<16x32xf32>
    %c0_6 = arith.constant 0 : index
    %c0_7 = arith.constant 0 : index
    %18 = vector.load %arg1[%c0_6, %c0_7] : memref<16x32xf32, #tpu.memory_space<vmem>>, vector<16x32xf32>
    tpu.vector_store %arg1[%c0_6, %c0_7], %17 {strides = array<i32>} : memref<16x32xf32, #tpu.memory_space<vmem>>, vector<16x32xf32>,
    return
  }
}

module attributes {stable_mosaic.version = 11 : i64} {
  func.func @_outlayer_attn_kernel(%arg0: i32, %arg1: memref<1x8x32xf32, #tpu.memory_space<vmem>>, %arg2: memref<1x8x32xf32, #tpu.memory_space<vmem>>, %arg3: memref<1x16x32xf32, #tpu.memory_space<vmem>>, %arg4: memref<1x16x32xf32, #tpu.memory_space<vmem>>, %arg5: memref<1x8x16xf32, #tpu.memory_space<vmem>>, %arg6: memref<32x64xf32, #tpu.memory_space<vmem>>, %arg7: memref<1x64xf32, #tpu.memory_space<vmem>>, %arg8: memref<1x8x32xf32, #tpu.memory_space<vmem>>, %arg9: memref<1x8x8x16xf32, #tpu.memory_space<vmem>>) attributes {dimension_semantics = [#tpu.dimension_semantics<parallel>], iteration_bounds = array<i64: 2>, scalar_prefetch = 0 : i64, scratch_operands = 0 : i64, tpu.core_type = #tpu.core_type<tc>, window_params = [{transform_indices = @transform_0, window_bounds = array<i64: 1, 8, 32>}, {transform_indices = @transform_1, window_bounds = array<i64: 1, 8, 32>}, {transform_indices = @transform_2, window_bounds = array<i64: 1, 16, 32>}, {transform_indices = @transform_3, window_bounds = array<i64: 1, 16, 32>}, {transform_indices = @transform_4, window_bounds = array<i64: 1, 8, 16>}, {pipeline_mode = #tpu.pipeline_mode<synchronous>, transform_indices = @transform_5, window_bounds = array<i64: 32, 64>}, {pipeline_mode = #tpu.pipeline_mode<synchronous>, transform_indices = @transform_6, window_bounds = array<i64: 1, 64>}, {transform_indices = @transform_7, window_bounds = array<i64: 1, 8, 32>}, {transform_indices = @transform_8, window_bounds = array<i64: 1, 8, 8, 16>}]} {
    %c0 = arith.constant 0 : index
    %c0_0 = arith.constant 0 : index
    %0 = vector.load %arg6[%c0, %c0_0] : memref<32x64xf32, #tpu.memory_space<vmem>>, vector<32x64xf32>
    %c0_1 = arith.constant 0 : index
    %c0_2 = arith.constant 0 : index
    %1 = vector.load %arg7[%c0_1, %c0_2] : memref<1x64xf32, #tpu.memory_space<vmem>>, vector<1x64xf32>
    %c0_3 = arith.constant 0 : index
    %c0_4 = arith.constant 0 : index
    %c0_5 = arith.constant 0 : index
    %2 = vector.load %arg1[%c0_3, %c0_4, %c0_5] : memref<1x8x32xf32, #tpu.memory_space<vmem>>, vector<1x8x32xf32>
    %3 = vector.shape_cast %2 : vector<1x8x32xf32> to vector<8x32xf32>
    %c0_6 = arith.constant 0 : index
    %c0_7 = arith.constant 0 : index
    %c0_8 = arith.constant 0 : index
    %4 = vector.load %arg2[%c0_6, %c0_7, %c0_8] : memref<1x8x32xf32, #tpu.memory_space<vmem>>, vector<1x8x32xf32>
    %5 = vector.shape_cast %4 : vector<1x8x32xf32> to vector<8x32xf32>
    %6 = arith.addf %3, %5 : vector<8x32xf32>
    %7 = vector.extract_strided_slice %0 {offsets = [0, 0], sizes = [32, 32], strides = [1, 1]} : vector<32x64xf32> to vector<32x32xf32>
    %cst = arith.constant dense<0.000000e+00> : vector<8x32xf32>
    %8 = tpu.matmul %6, %7, %cst {dimension_numbers = #tpu.dot_dimension_numbers<[1], [0], [0], [1], [0, 0, 1, 1], [], []>} : vector<8x32xf32>, vector<32x32xf32>, vector<8x32xf32> -> vector<8x32xf32>
    %9 = vector.extract_strided_slice %1 {offsets = [0, 0], sizes = [1, 32], strides = [1, 1]} : vector<1x64xf32> to vector<1x32xf32>
    %10 = vector.broadcast %9 : vector<1x32xf32> to vector<8x32xf32>
    %11 = arith.addf %8, %10 : vector<8x32xf32>
    %c0_9 = arith.constant 0 : index
    %c0_10 = arith.constant 0 : index
    %c0_11 = arith.constant 0 : index
    %12 = vector.load %arg3[%c0_9, %c0_10, %c0_11] : memref<1x16x32xf32, #tpu.memory_space<vmem>>, vector<1x16x32xf32>
    %13 = vector.shape_cast %12 : vector<1x16x32xf32> to vector<16x32xf32>
    %14 = vector.extract_strided_slice %0 {offsets = [0, 32], sizes = [32, 32], strides = [1, 1]} : vector<32x64xf32> to vector<32x32xf32>
    %cst_12 = arith.constant dense<0.000000e+00> : vector<16x32xf32>
    %15 = tpu.matmul %13, %14, %cst_12 {dimension_numbers = #tpu.dot_dimension_numbers<[1], [0], [0], [1], [0, 0, 1, 1], [], []>} : vector<16x32xf32>, vector<32x32xf32>, vector<16x32xf32> -> vector<16x32xf32>
    %16 = vector.extract_strided_slice %1 {offsets = [0, 32], sizes = [1, 32], strides = [1, 1]} : vector<1x64xf32> to vector<1x32xf32>
    %17 = vector.broadcast %16 : vector<1x32xf32> to vector<16x32xf32>
    %18 = arith.addf %15, %17 : vector<16x32xf32>
    %c0_13 = arith.constant 0 : index
    %c0_14 = arith.constant 0 : index
    %c0_15 = arith.constant 0 : index
    %19 = vector.load %arg4[%c0_13, %c0_14, %c0_15] : memref<1x16x32xf32, #tpu.memory_space<vmem>>, vector<1x16x32xf32>
    %20 = vector.shape_cast %19 : vector<1x16x32xf32> to vector<16x32xf32>
    %c0_16 = arith.constant 0 : index
    %c0_17 = arith.constant 0 : index
    %c0_18 = arith.constant 0 : index
    %21 = vector.load %arg5[%c0_16, %c0_17, %c0_18] : memref<1x8x16xf32, #tpu.memory_space<vmem>>, vector<1x8x16xf32>
    %22 = vector.shape_cast %21 : vector<1x8x16xf32> to vector<8x16xf32>
    %23 = vector.extract_strided_slice %11 {offsets = [0, 0], sizes = [8, 4], strides = [1, 1]} : vector<8x32xf32> to vector<8x4xf32>
    %cst_19 = arith.constant 5.000000e-01 : f32
    %24 = vector.broadcast %cst_19 : f32 to vector<8x4xf32>
    %25 = arith.mulf %23, %24 : vector<8x4xf32>
    %26 = vector.extract_strided_slice %18 {offsets = [0, 0], sizes = [16, 4], strides = [1, 1]} : vector<16x32xf32> to vector<16x4xf32>
    %cst_20 = arith.constant dense<0.000000e+00> : vector<8x16xf32>
    %27 = tpu.matmul %25, %26, %cst_20 {dimension_numbers = #tpu.dot_dimension_numbers<[1], [1], [0], [0], [0, 0, 1, 0], [], []>} : vector<8x4xf32>, vector<16x4xf32>, vector<8x16xf32> -> vector<8x16xf32>
    %cst_21 = arith.constant dense<0xFF800000> : vector<8xf32>
    %28 = vector.multi_reduction <maximumf>, %27, %cst_21 [1] : vector<8x16xf32> to vector<8xf32>
    %29 = vector.shape_cast %28 : vector<8xf32> to vector<8x1xf32>
    %30 = vector.broadcast %29 : vector<8x1xf32> to vector<8x16xf32>
    %31 = arith.subf %27, %30 : vector<8x16xf32>
    %32 = math.exp %31 : vector<8x16xf32>
    %cst_22 = arith.constant dense<0.000000e+00> : vector<8xf32>
    %33 = vector.multi_reduction <add>, %32, %cst_22 [1] : vector<8x16xf32> to vector<8xf32>
    %34 = vector.shape_cast %33 : vector<8xf32> to vector<8x1xf32>
    %35 = vector.broadcast %34 : vector<8x1xf32> to vector<8x16xf32>
    %36 = arith.divf %32, %35 : vector<8x16xf32>
    %37 = arith.mulf %36, %22 : vector<8x16xf32>
    %38 = vector.extract_strided_slice %20 {offsets = [0, 0], sizes = [16, 4], strides = [1, 1]} : vector<16x32xf32> to vector<16x4xf32>
    %cst_23 = arith.constant dense<0.000000e+00> : vector<8x4xf32>
    %39 = tpu.matmul %37, %38, %cst_23 {dimension_numbers = #tpu.dot_dimension_numbers<[1], [0], [0], [1], [0, 0, 1, 1], [], []>} : vector<8x16xf32>, vector<16x4xf32>, vector<8x4xf32> -> vector<8x4xf32>
    %40 = vector.extract_strided_slice %11 {offsets = [0, 4], sizes = [8, 4], strides = [1, 1]} : vector<8x32xf32> to vector<8x4xf32>
    %cst_24 = arith.constant 5.000000e-01 : f32
    %41 = vector.broadcast %cst_24 : f32 to vector<8x4xf32>
    %42 = arith.mulf %40, %41 : vector<8x4xf32>
    %43 = vector.extract_strided_slice %18 {offsets = [0, 4], sizes = [16, 4], strides = [1, 1]} : vector<16x32xf32> to vector<16x4xf32>
    %cst_25 = arith.constant dense<0.000000e+00> : vector<8x16xf32>
    %44 = tpu.matmul %42, %43, %cst_25 {dimension_numbers = #tpu.dot_dimension_numbers<[1], [1], [0], [0], [0, 0, 1, 0], [], []>} : vector<8x4xf32>, vector<16x4xf32>, vector<8x16xf32> -> vector<8x16xf32>
    %cst_26 = arith.constant dense<0xFF800000> : vector<8xf32>
    %45 = vector.multi_reduction <maximumf>, %44, %cst_26 [1] : vector<8x16xf32> to vector<8xf32>
    %46 = vector.shape_cast %45 : vector<8xf32> to vector<8x1xf32>
    %47 = vector.broadcast %46 : vector<8x1xf32> to vector<8x16xf32>
    %48 = arith.subf %44, %47 : vector<8x16xf32>
    %49 = math.exp %48 : vector<8x16xf32>
    %cst_27 = arith.constant dense<0.000000e+00> : vector<8xf32>
    %50 = vector.multi_reduction <add>, %49, %cst_27 [1] : vector<8x16xf32> to vector<8xf32>
    %51 = vector.shape_cast %50 : vector<8xf32> to vector<8x1xf32>
    %52 = vector.broadcast %51 : vector<8x1xf32> to vector<8x16xf32>
    %53 = arith.divf %49, %52 : vector<8x16xf32>
    %54 = arith.mulf %53, %22 : vector<8x16xf32>
    %55 = vector.extract_strided_slice %20 {offsets = [0, 4], sizes = [16, 4], strides = [1, 1]} : vector<16x32xf32> to vector<16x4xf32>
    %cst_28 = arith.constant dense<0.000000e+00> : vector<8x4xf32>
    %56 = tpu.matmul %54, %55, %cst_28 {dimension_numbers = #tpu.dot_dimension_numbers<[1], [0], [0], [1], [0, 0, 1, 1], [], []>} : vector<8x16xf32>, vector<16x4xf32>, vector<8x4xf32> -> vector<8x4xf32>
    %57 = vector.extract_strided_slice %11 {offsets = [0, 8], sizes = [8, 4], strides = [1, 1]} : vector<8x32xf32> to vector<8x4xf32>
    %cst_29 = arith.constant 5.000000e-01 : f32
    %58 = vector.broadcast %cst_29 : f32 to vector<8x4xf32>
    %59 = arith.mulf %57, %58 : vector<8x4xf32>
    %60 = vector.extract_strided_slice %18 {offsets = [0, 8], sizes = [16, 4], strides = [1, 1]} : vector<16x32xf32> to vector<16x4xf32>
    %cst_30 = arith.constant dense<0.000000e+00> : vector<8x16xf32>
    %61 = tpu.matmul %59, %60, %cst_30 {dimension_numbers = #tpu.dot_dimension_numbers<[1], [1], [0], [0], [0, 0, 1, 0], [], []>} : vector<8x4xf32>, vector<16x4xf32>, vector<8x16xf32> -> vector<8x16xf32>
    %cst_31 = arith.constant dense<0xFF800000> : vector<8xf32>
    %62 = vector.multi_reduction <maximumf>, %61, %cst_31 [1] : vector<8x16xf32> to vector<8xf32>
    %63 = vector.shape_cast %62 : vector<8xf32> to vector<8x1xf32>
    %64 = vector.broadcast %63 : vector<8x1xf32> to vector<8x16xf32>
    %65 = arith.subf %61, %64 : vector<8x16xf32>
    %66 = math.exp %65 : vector<8x16xf32>
    %cst_32 = arith.constant dense<0.000000e+00> : vector<8xf32>
    %67 = vector.multi_reduction <add>, %66, %cst_32 [1] : vector<8x16xf32> to vector<8xf32>
    %68 = vector.shape_cast %67 : vector<8xf32> to vector<8x1xf32>
    %69 = vector.broadcast %68 : vector<8x1xf32> to vector<8x16xf32>
    %70 = arith.divf %66, %69 : vector<8x16xf32>
    %71 = arith.mulf %70, %22 : vector<8x16xf32>
    %72 = vector.extract_strided_slice %20 {offsets = [0, 8], sizes = [16, 4], strides = [1, 1]} : vector<16x32xf32> to vector<16x4xf32>
    %cst_33 = arith.constant dense<0.000000e+00> : vector<8x4xf32>
    %73 = tpu.matmul %71, %72, %cst_33 {dimension_numbers = #tpu.dot_dimension_numbers<[1], [0], [0], [1], [0, 0, 1, 1], [], []>} : vector<8x16xf32>, vector<16x4xf32>, vector<8x4xf32> -> vector<8x4xf32>
    %74 = vector.extract_strided_slice %11 {offsets = [0, 12], sizes = [8, 4], strides = [1, 1]} : vector<8x32xf32> to vector<8x4xf32>
    %cst_34 = arith.constant 5.000000e-01 : f32
    %75 = vector.broadcast %cst_34 : f32 to vector<8x4xf32>
    %76 = arith.mulf %74, %75 : vector<8x4xf32>
    %77 = vector.extract_strided_slice %18 {offsets = [0, 12], sizes = [16, 4], strides = [1, 1]} : vector<16x32xf32> to vector<16x4xf32>
    %cst_35 = arith.constant dense<0.000000e+00> : vector<8x16xf32>
    %78 = tpu.matmul %76, %77, %cst_35 {dimension_numbers = #tpu.dot_dimension_numbers<[1], [1], [0], [0], [0, 0, 1, 0], [], []>} : vector<8x4xf32>, vector<16x4xf32>, vector<8x16xf32> -> vector<8x16xf32>
    %cst_36 = arith.constant dense<0xFF800000> : vector<8xf32>
    %79 = vector.multi_reduction <maximumf>, %78, %cst_36 [1] : vector<8x16xf32> to vector<8xf32>
    %80 = vector.shape_cast %79 : vector<8xf32> to vector<8x1xf32>
    %81 = vector.broadcast %80 : vector<8x1xf32> to vector<8x16xf32>
    %82 = arith.subf %78, %81 : vector<8x16xf32>
    %83 = math.exp %82 : vector<8x16xf32>
    %cst_37 = arith.constant dense<0.000000e+00> : vector<8xf32>
    %84 = vector.multi_reduction <add>, %83, %cst_37 [1] : vector<8x16xf32> to vector<8xf32>
    %85 = vector.shape_cast %84 : vector<8xf32> to vector<8x1xf32>
    %86 = vector.broadcast %85 : vector<8x1xf32> to vector<8x16xf32>
    %87 = arith.divf %83, %86 : vector<8x16xf32>
    %88 = arith.mulf %87, %22 : vector<8x16xf32>
    %89 = vector.extract_strided_slice %20 {offsets = [0, 12], sizes = [16, 4], strides = [1, 1]} : vector<16x32xf32> to vector<16x4xf32>
    %cst_38 = arith.constant dense<0.000000e+00> : vector<8x4xf32>
    %90 = tpu.matmul %88, %89, %cst_38 {dimension_numbers = #tpu.dot_dimension_numbers<[1], [0], [0], [1], [0, 0, 1, 1], [], []>} : vector<8x16xf32>, vector<16x4xf32>, vector<8x4xf32> -> vector<8x4xf32>
    %91 = vector.extract_strided_slice %11 {offsets = [0, 16], sizes = [8, 4], strides = [1, 1]} : vector<8x32xf32> to vector<8x4xf32>
    %cst_39 = arith.constant 5.000000e-01 : f32
    %92 = vector.broadcast %cst_39 : f32 to vector<8x4xf32>
    %93 = arith.mulf %91, %92 : vector<8x4xf32>
    %94 = vector.extract_strided_slice %18 {offsets = [0, 16], sizes = [16, 4], strides = [1, 1]} : vector<16x32xf32> to vector<16x4xf32>
    %cst_40 = arith.constant dense<0.000000e+00> : vector<8x16xf32>
    %95 = tpu.matmul %93, %94, %cst_40 {dimension_numbers = #tpu.dot_dimension_numbers<[1], [1], [0], [0], [0, 0, 1, 0], [], []>} : vector<8x4xf32>, vector<16x4xf32>, vector<8x16xf32> -> vector<8x16xf32>
    %cst_41 = arith.constant dense<0xFF800000> : vector<8xf32>
    %96 = vector.multi_reduction <maximumf>, %95, %cst_41 [1] : vector<8x16xf32> to vector<8xf32>
    %97 = vector.shape_cast %96 : vector<8xf32> to vector<8x1xf32>
    %98 = vector.broadcast %97 : vector<8x1xf32> to vector<8x16xf32>
    %99 = arith.subf %95, %98 : vector<8x16xf32>
    %100 = math.exp %99 : vector<8x16xf32>
    %cst_42 = arith.constant dense<0.000000e+00> : vector<8xf32>
    %101 = vector.multi_reduction <add>, %100, %cst_42 [1] : vector<8x16xf32> to vector<8xf32>
    %102 = vector.shape_cast %101 : vector<8xf32> to vector<8x1xf32>
    %103 = vector.broadcast %102 : vector<8x1xf32> to vector<8x16xf32>
    %104 = arith.divf %100, %103 : vector<8x16xf32>
    %105 = arith.mulf %104, %22 : vector<8x16xf32>
    %106 = vector.extract_strided_slice %20 {offsets = [0, 16], sizes = [16, 4], strides = [1, 1]} : vector<16x32xf32> to vector<16x4xf32>
    %cst_43 = arith.constant dense<0.000000e+00> : vector<8x4xf32>
    %107 = tpu.matmul %105, %106, %cst_43 {dimension_numbers = #tpu.dot_dimension_numbers<[1], [0], [0], [1], [0, 0, 1, 1], [], []>} : vector<8x16xf32>, vector<16x4xf32>, vector<8x4xf32> -> vector<8x4xf32>
    %108 = vector.extract_strided_slice %11 {offsets = [0, 20], sizes = [8, 4], strides = [1, 1]} : vector<8x32xf32> to vector<8x4xf32>
    %cst_44 = arith.constant 5.000000e-01 : f32
    %109 = vector.broadcast %cst_44 : f32 to vector<8x4xf32>
    %110 = arith.mulf %108, %109 : vector<8x4xf32>
    %111 = vector.extract_strided_slice %18 {offsets = [0, 20], sizes = [16, 4], strides = [1, 1]} : vector<16x32xf32> to vector<16x4xf32>
    %cst_45 = arith.constant dense<0.000000e+00> : vector<8x16xf32>
    %112 = tpu.matmul %110, %111, %cst_45 {dimension_numbers = #tpu.dot_dimension_numbers<[1], [1], [0], [0], [0, 0, 1, 0], [], []>} : vector<8x4xf32>, vector<16x4xf32>, vector<8x16xf32> -> vector<8x16xf32>
    %cst_46 = arith.constant dense<0xFF800000> : vector<8xf32>
    %113 = vector.multi_reduction <maximumf>, %112, %cst_46 [1] : vector<8x16xf32> to vector<8xf32>
    %114 = vector.shape_cast %113 : vector<8xf32> to vector<8x1xf32>
    %115 = vector.broadcast %114 : vector<8x1xf32> to vector<8x16xf32>
    %116 = arith.subf %112, %115 : vector<8x16xf32>
    %117 = math.exp %116 : vector<8x16xf32>
    %cst_47 = arith.constant dense<0.000000e+00> : vector<8xf32>
    %118 = vector.multi_reduction <add>, %117, %cst_47 [1] : vector<8x16xf32> to vector<8xf32>
    %119 = vector.shape_cast %118 : vector<8xf32> to vector<8x1xf32>
    %120 = vector.broadcast %119 : vector<8x1xf32> to vector<8x16xf32>
    %121 = arith.divf %117, %120 : vector<8x16xf32>
    %122 = arith.mulf %121, %22 : vector<8x16xf32>
    %123 = vector.extract_strided_slice %20 {offsets = [0, 20], sizes = [16, 4], strides = [1, 1]} : vector<16x32xf32> to vector<16x4xf32>
    %cst_48 = arith.constant dense<0.000000e+00> : vector<8x4xf32>
    %124 = tpu.matmul %122, %123, %cst_48 {dimension_numbers = #tpu.dot_dimension_numbers<[1], [0], [0], [1], [0, 0, 1, 1], [], []>} : vector<8x16xf32>, vector<16x4xf32>, vector<8x4xf32> -> vector<8x4xf32>
    %125 = vector.extract_strided_slice %11 {offsets = [0, 24], sizes = [8, 4], strides = [1, 1]} : vector<8x32xf32> to vector<8x4xf32>
    %cst_49 = arith.constant 5.000000e-01 : f32
    %126 = vector.broadcast %cst_49 : f32 to vector<8x4xf32>
    %127 = arith.mulf %125, %126 : vector<8x4xf32>
    %128 = vector.extract_strided_slice %18 {offsets = [0, 24], sizes = [16, 4], strides = [1, 1]} : vector<16x32xf32> to vector<16x4xf32>
    %cst_50 = arith.constant dense<0.000000e+00> : vector<8x16xf32>
    %129 = tpu.matmul %127, %128, %cst_50 {dimension_numbers = #tpu.dot_dimension_numbers<[1], [1], [0], [0], [0, 0, 1, 0], [], []>} : vector<8x4xf32>, vector<16x4xf32>, vector<8x16xf32> -> vector<8x16xf32>
    %cst_51 = arith.constant dense<0xFF800000> : vector<8xf32>
    %130 = vector.multi_reduction <maximumf>, %129, %cst_51 [1] : vector<8x16xf32> to vector<8xf32>
    %131 = vector.shape_cast %130 : vector<8xf32> to vector<8x1xf32>
    %132 = vector.broadcast %131 : vector<8x1xf32> to vector<8x16xf32>
    %133 = arith.subf %129, %132 : vector<8x16xf32>
    %134 = math.exp %133 : vector<8x16xf32>
    %cst_52 = arith.constant dense<0.000000e+00> : vector<8xf32>
    %135 = vector.multi_reduction <add>, %134, %cst_52 [1] : vector<8x16xf32> to vector<8xf32>
    %136 = vector.shape_cast %135 : vector<8xf32> to vector<8x1xf32>
    %137 = vector.broadcast %136 : vector<8x1xf32> to vector<8x16xf32>
    %138 = arith.divf %134, %137 : vector<8x16xf32>
    %139 = arith.mulf %138, %22 : vector<8x16xf32>
    %140 = vector.extract_strided_slice %20 {offsets = [0, 24], sizes = [16, 4], strides = [1, 1]} : vector<16x32xf32> to vector<16x4xf32>
    %cst_53 = arith.constant dense<0.000000e+00> : vector<8x4xf32>
    %141 = tpu.matmul %139, %140, %cst_53 {dimension_numbers = #tpu.dot_dimension_numbers<[1], [0], [0], [1], [0, 0, 1, 1], [], []>} : vector<8x16xf32>, vector<16x4xf32>, vector<8x4xf32> -> vector<8x4xf32>
    %142 = vector.extract_strided_slice %11 {offsets = [0, 28], sizes = [8, 4], strides = [1, 1]} : vector<8x32xf32> to vector<8x4xf32>
    %cst_54 = arith.constant 5.000000e-01 : f32
    %143 = vector.broadcast %cst_54 : f32 to vector<8x4xf32>
    %144 = arith.mulf %142, %143 : vector<8x4xf32>
    %145 = vector.extract_strided_slice %18 {offsets = [0, 28], sizes = [16, 4], strides = [1, 1]} : vector<16x32xf32> to vector<16x4xf32>
    %cst_55 = arith.constant dense<0.000000e+00> : vector<8x16xf32>
    %146 = tpu.matmul %144, %145, %cst_55 {dimension_numbers = #tpu.dot_dimension_numbers<[1], [1], [0], [0], [0, 0, 1, 0], [], []>} : vector<8x4xf32>, vector<16x4xf32>, vector<8x16xf32> -> vector<8x16xf32>
    %cst_56 = arith.constant dense<0xFF800000> : vector<8xf32>
    %147 = vector.multi_reduction <maximumf>, %146, %cst_56 [1] : vector<8x16xf32> to vector<8xf32>
    %148 = vector.shape_cast %147 : vector<8xf32> to vector<8x1xf32>
    %149 = vector.broadcast %148 : vector<8x1xf32> to vector<8x16xf32>
    %150 = arith.subf %146, %149 : vector<8x16xf32>
    %151 = math.exp %150 : vector<8x16xf32>
    %cst_57 = arith.constant dense<0.000000e+00> : vector<8xf32>
    %152 = vector.multi_reduction <add>, %151, %cst_57 [1] : vector<8x16xf32> to vector<8xf32>
    %153 = vector.shape_cast %152 : vector<8xf32> to vector<8x1xf32>
    %154 = vector.broadcast %153 : vector<8x1xf32> to vector<8x16xf32>
    %155 = arith.divf %151, %154 : vector<8x16xf32>
    %156 = arith.mulf %155, %22 : vector<8x16xf32>
    %157 = vector.extract_strided_slice %20 {offsets = [0, 28], sizes = [16, 4], strides = [1, 1]} : vector<16x32xf32> to vector<16x4xf32>
    %cst_58 = arith.constant dense<0.000000e+00> : vector<8x4xf32>
    %158 = tpu.matmul %156, %157, %cst_58 {dimension_numbers = #tpu.dot_dimension_numbers<[1], [0], [0], [1], [0, 0, 1, 1], [], []>} : vector<8x16xf32>, vector<16x4xf32>, vector<8x4xf32> -> vector<8x4xf32>
    %159 = tpu.concatenate %39, %56, %73, %90, %107, %124, %141, %158 in 1 : vector<8x4xf32>, vector<8x4xf32>, vector<8x4xf32>, vector<8x4xf32>, vector<8x4xf32>, vector<8x4xf32>, vector<8x4xf32>, vector<8x4xf32> -> vector<8x32xf32>
    %c0_59 = arith.constant 0 : index
    %c0_60 = arith.constant 0 : index
    %c0_61 = arith.constant 0 : index
    %160 = vector.load %arg8[%c0_59, %c0_60, %c0_61] : memref<1x8x32xf32, #tpu.memory_space<vmem>>, vector<1x8x32xf32>
    %161 = vector.shape_cast %160 : vector<1x8x32xf32> to vector<8x32xf32>
    %162 = vector.shape_cast %159 : vector<8x32xf32> to vector<1x8x32xf32>
    tpu.vector_store %arg8[%c0_59, %c0_60, %c0_61], %162 {strides = array<i32>} : memref<1x8x32xf32, #tpu.memory_space<vmem>>, vector<1x8x32xf32>,
    %c0_62 = arith.constant 0 : index
    %c0_63 = arith.constant 0 : index
    %c0_64 = arith.constant 0 : index
    %c0_65 = arith.constant 0 : index
    %163 = vector.load %arg9[%c0_62, %c0_63, %c0_64, %c0_65] : memref<1x8x8x16xf32, #tpu.memory_space<vmem>>, vector<1x1x8x16xf32>
    %164 = vector.shape_cast %163 : vector<1x1x8x16xf32> to vector<8x16xf32>
    %165 = vector.shape_cast %37 : vector<8x16xf32> to vector<1x1x8x16xf32>
    tpu.vector_store %arg9[%c0_62, %c0_63, %c0_64, %c0_65], %165 {strides = array<i32>} : memref<1x8x8x16xf32, #tpu.memory_space<vmem>>, vector<1x1x8x16xf32>,
    %c0_66 = arith.constant 0 : index
    %c1 = arith.constant 1 : index
    %c0_67 = arith.constant 0 : index
    %c0_68 = arith.constant 0 : index
    %166 = vector.load %arg9[%c0_66, %c1, %c0_67, %c0_68] : memref<1x8x8x16xf32, #tpu.memory_space<vmem>>, vector<1x1x8x16xf32>
    %167 = vector.shape_cast %166 : vector<1x1x8x16xf32> to vector<8x16xf32>
    %168 = vector.shape_cast %54 : vector<8x16xf32> to vector<1x1x8x16xf32>
    tpu.vector_store %arg9[%c0_66, %c1, %c0_67, %c0_68], %168 {strides = array<i32>} : memref<1x8x8x16xf32, #tpu.memory_space<vmem>>, vector<1x1x8x16xf32>,
    %c0_69 = arith.constant 0 : index
    %c2 = arith.constant 2 : index
    %c0_70 = arith.constant 0 : index
    %c0_71 = arith.constant 0 : index
    %169 = vector.load %arg9[%c0_69, %c2, %c0_70, %c0_71] : memref<1x8x8x16xf32, #tpu.memory_space<vmem>>, vector<1x1x8x16xf32>
    %170 = vector.shape_cast %169 : vector<1x1x8x16xf32> to vector<8x16xf32>
    %171 = vector.shape_cast %71 : vector<8x16xf32> to vector<1x1x8x16xf32>
    tpu.vector_store %arg9[%c0_69, %c2, %c0_70, %c0_71], %171 {strides = array<i32>} : memref<1x8x8x16xf32, #tpu.memory_space<vmem>>, vector<1x1x8x16xf32>,
    %c0_72 = arith.constant 0 : index
    %c3 = arith.constant 3 : index
    %c0_73 = arith.constant 0 : index
    %c0_74 = arith.constant 0 : index
    %172 = vector.load %arg9[%c0_72, %c3, %c0_73, %c0_74] : memref<1x8x8x16xf32, #tpu.memory_space<vmem>>, vector<1x1x8x16xf32>
    %173 = vector.shape_cast %172 : vector<1x1x8x16xf32> to vector<8x16xf32>
    %174 = vector.shape_cast %88 : vector<8x16xf32> to vector<1x1x8x16xf32>
    tpu.vector_store %arg9[%c0_72, %c3, %c0_73, %c0_74], %174 {strides = array<i32>} : memref<1x8x8x16xf32, #tpu.memory_space<vmem>>, vector<1x1x8x16xf32>,
    %c0_75 = arith.constant 0 : index
    %c4 = arith.constant 4 : index
    %c0_76 = arith.constant 0 : index
    %c0_77 = arith.constant 0 : index
    %175 = vector.load %arg9[%c0_75, %c4, %c0_76, %c0_77] : memref<1x8x8x16xf32, #tpu.memory_space<vmem>>, vector<1x1x8x16xf32>
    %176 = vector.shape_cast %175 : vector<1x1x8x16xf32> to vector<8x16xf32>
    %177 = vector.shape_cast %105 : vector<8x16xf32> to vector<1x1x8x16xf32>
    tpu.vector_store %arg9[%c0_75, %c4, %c0_76, %c0_77], %177 {strides = array<i32>} : memref<1x8x8x16xf32, #tpu.memory_space<vmem>>, vector<1x1x8x16xf32>,
    %c0_78 = arith.constant 0 : index
    %c5 = arith.constant 5 : index
    %c0_79 = arith.constant 0 : index
    %c0_80 = arith.constant 0 : index
    %178 = vector.load %arg9[%c0_78, %c5, %c0_79, %c0_80] : memref<1x8x8x16xf32, #tpu.memory_space<vmem>>, vector<1x1x8x16xf32>
    %179 = vector.shape_cast %178 : vector<1x1x8x16xf32> to vector<8x16xf32>
    %180 = vector.shape_cast %122 : vector<8x16xf32> to vector<1x1x8x16xf32>
    tpu.vector_store %arg9[%c0_78, %c5, %c0_79, %c0_80], %180 {strides = array<i32>} : memref<1x8x8x16xf32, #tpu.memory_space<vmem>>, vector<1x1x8x16xf32>,
    %c0_81 = arith.constant 0 : index
    %c6 = arith.constant 6 : index
    %c0_82 = arith.constant 0 : index
    %c0_83 = arith.constant 0 : index
    %181 = vector.load %arg9[%c0_81, %c6, %c0_82, %c0_83] : memref<1x8x8x16xf32, #tpu.memory_space<vmem>>, vector<1x1x8x16xf32>
    %182 = vector.shape_cast %181 : vector<1x1x8x16xf32> to vector<8x16xf32>
    %183 = vector.shape_cast %139 : vector<8x16xf32> to vector<1x1x8x16xf32>
    tpu.vector_store %arg9[%c0_81, %c6, %c0_82, %c0_83], %183 {strides = array<i32>} : memref<1x8x8x16xf32, #tpu.memory_space<vmem>>, vector<1x1x8x16xf32>,
    %c0_84 = arith.constant 0 : index
    %c7 = arith.constant 7 : index
    %c0_85 = arith.constant 0 : index
    %c0_86 = arith.constant 0 : index
    %184 = vector.load %arg9[%c0_84, %c7, %c0_85, %c0_86] : memref<1x8x8x16xf32, #tpu.memory_space<vmem>>, vector<1x1x8x16xf32>
    %185 = vector.shape_cast %184 : vector<1x1x8x16xf32> to vector<8x16xf32>
    %186 = vector.shape_cast %156 : vector<8x16xf32> to vector<1x1x8x16xf32>
    tpu.vector_store %arg9[%c0_84, %c7, %c0_85, %c0_86], %186 {strides = array<i32>} : memref<1x8x8x16xf32, #tpu.memory_space<vmem>>, vector<1x1x8x16xf32>,
    return
  }
  func.func @transform_0(%arg0: i32) -> (i32, i32, i32) {
    %c0_i32 = arith.constant 0 : i32
    %c0_i32_0 = arith.constant 0 : i32
    %c0_i32_1 = arith.constant 0 : i32
    return %arg0, %c0_i32, %c0_i32_0 : i32, i32, i32
  }
  func.func @transform_1(%arg0: i32) -> (i32, i32, i32) {
    %c0_i32 = arith.constant 0 : i32
    %c0_i32_0 = arith.constant 0 : i32
    %c0_i32_1 = arith.constant 0 : i32
    return %arg0, %c0_i32, %c0_i32_0 : i32, i32, i32
  }
  func.func @transform_2(%arg0: i32) -> (i32, i32, i32) {
    %c0_i32 = arith.constant 0 : i32
    %c0_i32_0 = arith.constant 0 : i32
    %c0_i32_1 = arith.constant 0 : i32
    return %arg0, %c0_i32, %c0_i32_0 : i32, i32, i32
  }
  func.func @transform_3(%arg0: i32) -> (i32, i32, i32) {
    %c0_i32 = arith.constant 0 : i32
    %c0_i32_0 = arith.constant 0 : i32
    %c0_i32_1 = arith.constant 0 : i32
    return %arg0, %c0_i32, %c0_i32_0 : i32, i32, i32
  }
  func.func @transform_4(%arg0: i32) -> (i32, i32, i32) {
    %c0_i32 = arith.constant 0 : i32
    %c0_i32_0 = arith.constant 0 : i32
    %c0_i32_1 = arith.constant 0 : i32
    return %arg0, %c0_i32, %c0_i32_0 : i32, i32, i32
  }
  func.func @transform_5(%arg0: i32) -> (i32, i32) {
    %c0_i32 = arith.constant 0 : i32
    %c0_i32_0 = arith.constant 0 : i32
    %c0_i32_1 = arith.constant 0 : i32
    return %c0_i32, %c0_i32_0 : i32, i32
  }
  func.func @transform_6(%arg0: i32) -> (i32, i32) {
    %c0_i32 = arith.constant 0 : i32
    %c0_i32_0 = arith.constant 0 : i32
    %c0_i32_1 = arith.constant 0 : i32
    return %c0_i32, %c0_i32_0 : i32, i32
  }
  func.func @transform_7(%arg0: i32) -> (i32, i32, i32) {
    %c0_i32 = arith.constant 0 : i32
    %c0_i32_0 = arith.constant 0 : i32
    %c0_i32_1 = arith.constant 0 : i32
    return %arg0, %c0_i32, %c0_i32_0 : i32, i32, i32
  }
  func.func @transform_8(%arg0: i32) -> (i32, i32, i32, i32) {
    %c0_i32 = arith.constant 0 : i32
    %c0_i32_0 = arith.constant 0 : i32
    %c0_i32_1 = arith.constant 0 : i32
    %c0_i32_2 = arith.constant 0 : i32
    return %arg0, %c0_i32, %c0_i32_0, %c0_i32_1 : i32, i32, i32, i32
  }
}

</mosaic_0001>

<bundles_post_ra>
// kernel: transformer_decoder_forward.15
= control target key start
LH: loop header
LB: loop body
LE: loop exit
PB: predicated region body
PF: predicated region fallthrough
CT: control target
= control target key end

     0   :  { %vm23_vm0 = vcmask 261120   ;;  %s136_s0 = inlined_call_operand.vmem [shape: f32[16,32], index: 0, kind: input, shape index: {}]   ;;  %s137_s1 = inlined_call_operand.vmem [shape: f32[16,32], index: 1, kind: input, shape index: {}]   ;;  %s138_s2 = inlined_call_operand.vmem [shape: f32[1,32], index: 2, kind: input, shape index: {}]   ;;  %s139_s3 = inlined_call_operand.vmem [shape: f32[1,32], index: 3, kind: input, shape index: {}]   ;;  %s140_s4 = inlined_call_operand.vmem [shape: f32[16,32], index: 4, kind: output, shape index: {}]  }
   0x1   :  { %v17_v0 = vld [vmem:[%s136_s0] sm:$0xff]  ;;  %v18_v2 = vld [vmem:[%s136_s0 + $0x8] sm:$0xff] }
   0x2   :  { %v19_v1 = vld [vmem:[%s137_s1] sm:$0xff]  ;;  %v20_v4 = vld [vmem:[%s137_s1 + $0x8] sm:$0xff] }
   0x3   :  { %v21_v3 = vadd.f32 %v19_v1, %v17_v0  ;;  %v22_v5 = vadd.f32 %v20_v4, %v18_v2  ;;  %v75_v25 = vld [vmem:[%s138_s2] ss:$0 sm:$0xff] }
   0x4   :  { %v76_v27 = vld [vmem:[%s139_s3] ss:$0 sm:$0xff] }
   0x5   :  { %v24_v6 = vsel %vm23_vm0, %v21_v3, 0.0  ;;  %v27_v7 = vsel %vm23_vm0, %v22_v5, 0.0 }
   0x6   :  { %25 = vadd.xlane.f32.xlu0 %v24_v6 }
   0xa   :  { %28 = vadd.xlane.f32.xlu0 %v27_v7 }
  0x93   :  { %v26_v8 = vpop.xlane.xlu0 %25 }
  0x94   :  { %v31_v9 = vmul.f32 0.03125, %v26_v8 }
  0x96   :  { %v33_v10 = vsub.f32 %v21_v3, %v31_v9 }
  0x97   :  { %v29_v11 = vpop.xlane.xlu0 %28 }
  0x98   :  { %v32_v12 = vmul.f32 0.03125, %v29_v11  ;;  %v35_v13 = vmul.f32 %v33_v10, %v33_v10 }
  0x9a   :  { %v34_v14 = vsub.f32 %v22_v5, %v32_v12  ;;  %v37_v15 = vsel %vm23_vm0, %v35_v13, 0.0 }
  0x9b   :  { %38 = vadd.xlane.f32.xlu1 %v37_v15 }
  0x9c   :  { %v36_v16 = vmul.f32 %v34_v14, %v34_v14 }
  0x9e   :  { %v40_v17 = vsel %vm23_vm0, %v36_v16, 0.0 }
  0x9f   :  { %41 = vadd.xlane.f32.xlu1 %v40_v17 }
 0x128   :  { %v39_v18 = vpop.xlane.xlu1 %38 }
 0x129   :  { %v43_v19 = vmul.f32 0.03125, %v39_v18 }
 0x12b   :  { %v45_v20 = vadd.f32 1e-05, %v43_v19 }
 0x12c   :  { %v42_v21 = vpop.xlane.xlu1 %41 }
 0x12d   :  { %77 = vrsqrt.f32 %v45_v20  ;;  %v44_v22 = vmul.f32 0.03125, %v42_v21 }
 0x12f   :  { %v46_v23 = vadd.f32 1e-05, %v44_v22 }
 0x131   :  { %79 = vrsqrt.f32 %v46_v23 }
 0x137   :  { %v78_v24 = vpop.eup %77 }
 0x138   :  { %v49_v26 = vmul.f32 %v78_v24, %v33_v10 }
 0x13a   :  { %v58_v28 = vmul.f32 %v75_v25, %v49_v26 }
 0x13b   :  { %v80_v29 = vpop.eup %79 }
 0x13c   :  { %v67_v30 = vadd.f32 %v76_v27, %v58_v28  ;;  %v50_v31 = vmul.f32 %v80_v29, %v34_v14 }
 0x13e   :  { %69 = vst.msk [vmem:[%s140_s4] sm:$0xff] %vm23_vm0, %v67_v30  ;;  %v59_v32 = vmul.f32 %v75_v25, %v50_v31 }
 0x140   :  { %v68_v33 = vadd.f32 %v76_v27, %v59_v32 }
 0x142   :  { %70 = vst.msk [vmem:[%s140_s4 + $0x8] sm:$0xff] %vm23_vm0, %v68_v33 }

// kernel: transformer_decoder_forward.18
= control target key start
LH: loop header
LB: loop body
LE: loop exit
PB: predicated region body
PF: predicated region fallthrough
CT: control target
= control target key end

     0   :  { %vm39_vm0 = vcmask 261120   ;;  %vm138_vm1 = vcmask 523264   ;;  %s463_s1 = inlined_call_operand.vmem [shape: f32[32,64], index: 1, kind: input, shape index: {}]   ;;  %s464_s0 = inlined_call_operand.vmem [shape: f32[16,32], index: 0, kind: input, shape index: {}]   ;;  %s465_s3 = inlined_call_operand.vmem [shape: f32[64,32], index: 3, kind: input, shape index: {}]   ;;  %s466_s2 = inlined_call_operand.vmem [shape: f32[1,64], index: 2, kind: input, shape index: {}]   ;;  %s467_s4 = inlined_call_operand.vmem [shape: f32[1,32], index: 4, kind: input, shape index: {}]   ;;  %s468_s5 = inlined_call_operand.vmem [shape: f32[1,32], index: 5, kind: input, shape index: {}]   ;;  %s469_s6 = inlined_call_operand.vmem [shape: f32[1,32], index: 6, kind: input, shape index: {}]   ;;  %s470_s7 = inlined_call_operand.vmem [shape: f32[16,32], index: 7, kind: output, shape index: {}]  }
   0x1   :  { %v28_v0 = vld [vmem:[%s463_s1] sm:$0xff]  ;;  %v29_v1 = vld [vmem:[%s463_s1 + $0x8] sm:$0xff]  ;;  %v30_v2 = vld [vmem:[%s463_s1 + $0x10] sm:$0xff] }
   0x2   :  { %v327_v3 = vpack.c.bf16 %v29_v1, %v28_v0  ;;  %v31_v4 = vld [vmem:[%s463_s1 + $0x18] sm:$0xff]  ;;  %v26_v5 = vld [vmem:[%s464_s0] sm:$0xff]  ;;  %v124_v8 = vld [vmem:[%s465_s3 + $0x8] sm:$0xff] }
   0x3   :  { %v331_v6 = vpack.c.bf16 %v31_v4, %v30_v2  ;;  %305 = vmatprep.mubr.msk.f32.mxu0 %vm39_vm0, %v26_v5  ;;  %v123_v7 = vld [vmem:[%s465_s3] sm:$0xff]  ;;  %v125_v9 = vld [vmem:[%s465_s3 + $0x10] sm:$0xff]  ;;  %v126_v11 = vld [vmem:[%s465_s3 + $0x18] sm:$0xff] }
   0x4   :  { %328 = vmatprep.subr.bf16.mxu0 %v327_v3  ;;  %v335_v10 = vpack.c.bf16 %v124_v8, %v123_v7  ;;  %v339_v12 = vpack.c.bf16 %v126_v11, %v125_v9  ;;  %v127_v13 = vld [vmem:[%s465_s3 + $0x20] sm:$0xff]  ;;  %v128_v14 = vld [vmem:[%s465_s3 + $0x28] sm:$0xff]  ;;  %v129_v17 = vld [vmem:[%s465_s3 + $0x30] sm:$0xff] }
   0x5   :  { %330 = vmatpush3.bf16.msra.mxu0 %v327_v3  ;;  %v343_v15 = vpack.c.bf16 %v128_v14, %v127_v13  ;;  %v27_v16 = vld [vmem:[%s464_s0 + $0x8] sm:$0xff]  ;;  %v130_v18 = vld [vmem:[%s465_s3 + $0x38] sm:$0xff]  ;;  %v273_v20 = vld [vmem:[%s466_s2] ss:$0 sm:$0xff] }
   0x6   :  { %332 = vmatprep.subr.bf16.mxu0 %v331_v6  ;;  %336 = vmatprep.subr.bf16.mxu1 %v335_v10  ;;  %v347_v19 = vpack.c.bf16 %v130_v18, %v129_v17  ;;  %v276_v27 = vld [vmem:[%s467_s4] ss:$0 sm:$0xff] }
   0x7   :  { %338 = vmatpush3.bf16.msra.mxu1 %v335_v10  ;;  %v279_v53 = vld [vmem:[%s468_s5] ss:$0 sm:$0xff] }
   0x8   :  { %340 = vmatprep.subr.bf16.mxu1 %v339_v12  ;;  %v280_v55 = vld [vmem:[%s469_s6] ss:$0 sm:$0xff] }
   0x9   :  { %334 = vmatpush3.bf16.msra.mxu0 %v331_v6 }
   0xb   :  { %342 = vmatpush3.bf16.msra.mxu1 %v339_v12 }
   0xc   :  { %306 = vmatmul.mubr.msk.f32.vlgmr.msra.gmra.mrb[0].mxu0 %vm39_vm0, %v27_v16  ;;  %344 = vmatprep.subr.bf16.mxu1 %v343_v15 }
   0xf   :  { %346 = vmatpush3.bf16.msra.mxu1 %v343_v15 }
  0x10   :  { %348 = vmatprep.subr.bf16.mxu1 %v347_v19 }
  0x13   :  { %350 = vmatpush3.bf16.msra.mxu1 %v347_v19 }
  0xdf   :  { %v307_v21 = vpop.f32.mrb[0].mxu0 }
  0xe0   :  { %v118_v22 = vadd.f32 %v307_v21, %v273_v20  ;;  %v112_v23 = vpop.f32.mrb[1].mxu0 }
  0xe1   :  { %v113_v24 = vadd.f32 %v273_v20, %v112_v23 }
  0xe2   :  { %v122_v26 = vmax.f32 %v118_v22, 0.0 }
  0xe3   :  { %v121_v25 = vmax.f32 %v113_v24, 0.0 }
  0xe5   :  { %324 = vmatprep.mubr.msk.f32.mxu1 %vm138_vm1, %v121_v25 }
  0xe6   :  { %325 = vmatmul.mubr.msk.f32.vlgmr.msra.gmra.mrb[0].mxu1 %vm138_vm1, %v122_v26 }
 0x1b9   :  { %v326_v28 = vpop.f32.mrb[0].mxu1 }
 0x1ba   :  { %v211_v29 = vpop.f32.mrb[1].mxu1  ;;  %v217_v30 = vadd.f32 %v326_v28, %v276_v27 }
 0x1bb   :  { %v212_v31 = vadd.f32 %v276_v27, %v211_v29 }
 0x1bc   :  { %v221_v34 = vadd.f32 %v217_v30, %v27_v16 }
 0x1bd   :  { %v220_v32 = vadd.f32 %v212_v31, %v26_v5 }
 0x1be   :  { %v225_v35 = vsel %vm39_vm0, %v221_v34, 0.0 }
 0x1bf   :  { %v222_v33 = vsel %vm39_vm0, %v220_v32, 0.0 }
 0x1c0   :  { %223 = vadd.xlane.f32.xlu0 %v222_v33 }
 0x1c4   :  { %226 = vadd.xlane.f32.xlu0 %v225_v35 }
 0x24d   :  { %v224_v36 = vpop.xlane.xlu0 %223 }
 0x24e   :  { %v229_v37 = vmul.f32 0.03125, %v224_v36 }
 0x250   :  { %v231_v38 = vsub.f32 %v220_v32, %v229_v37 }
 0x251   :  { %v227_v39 = vpop.xlane.xlu0 %226 }
 0x252   :  { %v230_v40 = vmul.f32 0.03125, %v227_v39  ;;  %v233_v41 = vmul.f32 %v231_v38, %v231_v38 }
 0x254   :  { %v232_v42 = vsub.f32 %v221_v34, %v230_v40  ;;  %v235_v43 = vsel %vm39_vm0, %v233_v41, 0.0 }
 0x255   :  { %236 = vadd.xlane.f32.xlu1 %v235_v43 }
 0x256   :  { %v234_v44 = vmul.f32 %v232_v42, %v232_v42 }
 0x258   :  { %v238_v45 = vsel %vm39_vm0, %v234_v44, 0.0 }
 0x259   :  { %239 = vadd.xlane.f32.xlu1 %v238_v45 }
 0x2e2   :  { %v237_v46 = vpop.xlane.xlu1 %236 }
 0x2e3   :  { %v241_v47 = vmul.f32 0.03125, %v237_v46 }
 0x2e5   :  { %v243_v48 = vadd.f32 1e-05, %v241_v47 }
 0x2e6   :  { %v240_v49 = vpop.xlane.xlu1 %239 }
 0x2e7   :  { %351 = vrsqrt.f32 %v243_v48  ;;  %v242_v50 = vmul.f32 0.03125, %v240_v49 }
 0x2e9   :  { %v244_v51 = vadd.f32 1e-05, %v242_v50 }
 0x2eb   :  { %353 = vrsqrt.f32 %v244_v51 }
 0x2f1   :  { %v352_v52 = vpop.eup %351 }
 0x2f2   :  { %v247_v54 = vmul.f32 %v352_v52, %v231_v38 }
 0x2f4   :  { %v256_v56 = vmul.f32 %v279_v53, %v247_v54 }
 0x2f5   :  { %v354_v57 = vpop.eup %353 }
 0x2f6   :  { %v265_v58 = vadd.f32 %v280_v55, %v256_v56  ;;  %v248_v59 = vmul.f32 %v354_v57, %v232_v42 }
 0x2f8   :  { %267 = vst.msk [vmem:[%s470_s7] sm:$0xff] %vm39_vm0, %v265_v58  ;;  %v257_v60 = vmul.f32 %v279_v53, %v248_v59 }
 0x2fa   :  { %v266_v61 = vadd.f32 %v280_v55, %v257_v60 }
 0x2fc   :  { %268 = vst.msk [vmem:[%s470_s7 + $0x8] sm:$0xff] %vm39_vm0, %v266_v61 }

// kernel: transformer_decoder_forward.14
= control target key start
LH: loop header
LB: loop body
LE: loop exit
PB: predicated region body
PF: predicated region fallthrough
CT: control target
= control target key end

     0   :  { %s2317_s21 = smov 0   ;;  %s2520_s0 = inlined_call_operand.vmem [shape: f32[2,8,32], index: 0, kind: input, shape index: {}]   ;;  %s2521_s1 = inlined_call_operand.vmem [shape: f32[2,8,32], index: 1, kind: input, shape index: {}]   ;;  %s2522_s2 = inlined_call_operand.vmem [shape: f32[32,96], index: 2, kind: input, shape index: {}]   ;;  %s2523_s3 = inlined_call_operand.vmem [shape: f32[1,96], index: 3, kind: input, shape index: {}]   ;;  %s2524_s4 = inlined_call_operand.vmem [shape: f32[32,32], index: 4, kind: input, shape index: {}]   ;;  %s2525_s5 = inlined_call_operand.vmem [shape: f32[1,32], index: 5, kind: input, shape index: {}]   ;;  %s2526_s6 = inlined_call_operand.vmem [shape: f32[2,8,32], index: 6, kind: output, shape index: {}]  }
   0x1 LB: > { %s1955_s22 = sadd.s32 4294967295, %s2254_s21   ;;  %p1959_p0 = scmp.ge.s32.totalorder %s2254_s21, 1  ;;  %s2254_s21 = sphi %s2317_s21, %s16_s21  }
   0x2   : > { %p220_p1 = scmp.lt.s32.totalorder %s2254_s21, 3 }
   0x4   : > { %p221_p2 = pnand %p1959_p0, %p220_p1 }
   0x5   : > { %v267_v0 = vld [vmem:[%s2522_s2] sm:$0xff] (!%p221_p2)  ;;  %v268_v1 = vld [vmem:[%s2522_s2 + $0x8] sm:$0xff] (!%p221_p2)  ;;  %v269_v2 = vld [vmem:[%s2522_s2 + $0x10] sm:$0xff] (!%p221_p2)  ;;  %v2256_v3 = vmov (!%p221_p2), 0.0|0.0   ;;  %vm2257_vm0 = vmmov (!%p221_p2), 0   ;;  %v2258_v6 = vmov (!%p221_p2), 0.0  }
   0x6   : > { %224 = sbr.rel (%p221_p2) target bundleno = 1637 (0x665), region = 44  ;;  %2154 = vmatprep.subr.bf16.mxu0 (!%p221_p2), %v2256_v3  ;;  %v2155_v4 = vpack.c.bf16 (!%p221_p2), %v268_v1, %v267_v0  ;;  %v270_v5 = vld [vmem:[%s2522_s2 + $0x18] sm:$0xff] (!%p221_p2)  ;;  %2049 = vmatprep.mubr.msk.f32.mxu0 (!%p221_p2), %vm2257_vm0, %v2258_v6  ;;  %p252_p3 = scmp.lt.s32.totalorder (!%p221_p2), %s1955_s22, 1  ;;  %v2206_v7 = vpack.i.bf16 (!%p221_p2), %v268_v1, %v267_v0  ;;  %vm278_vm1 = vcmask (!%p221_p2), 261120   ;;  %v2368_v21 = vld [vmem:[%s2523_s3] ss:$0 sm:$0xff] (!%p221_p2) }
   0x7   : > { %2160 = vmatprep.subr.bf16.mxu1 (!%p221_p2), %v2256_v3  ;;  %2060 = vmatprep.mubr.msk.f32.mxu1 (!%p221_p2), %vm2257_vm0, %v2258_v6  ;;  %v2158_v8 = vpack.c.bf16 (!%p221_p2), %v270_v5, %v269_v2  ;;  %s2259_s7 = smov (!%p221_p2), 64   ;;  %v2211_v9 = vpack.i.bf16 (!%p221_p2), %v270_v5, %v269_v2  ;;  %s2260_s17 = smov (!%p221_p2), 96   ;;  %vm448_vm2 = vcmask (!%p221_p2), 31744   ;;  %vm524_vm3 = vcmask (!%p221_p2), 64512  }
   0x8   : > { %2156 = vmatpush3.bf16.msra.mxu0 (!%p221_p2), %v2155_v4  ;;  %2207 = vrot.lane.b32.xlu0 (!%p221_p2), %v2206_v7, %s2259_s7  ;;  %s2261_s18 = smov (!%p221_p2), 124   ;;  %s2262_s19 = smov (!%p221_p2), 92   ;;  %vm1795_vm4 = vcmask (!%p221_p2), 97280   ;;  %vm1797_vm5 = vcmask (!%p221_p2), 130048   ;;  %vm1799_vm6 = vcmask (!%p221_p2), 162816   ;;  %vm1801_vm7 = vcmask (!%p221_p2), 195584  }
   0x9   : > { %2157 = vmatprep.subr.bf16.mxu0 (!%p221_p2), %v2256_v3  ;;  %s2263_s20 = smov (!%p221_p2), 120   ;;  %s2265_s23 = smov (!%p221_p2), 116   ;;  %vm1803_vm8 = vcmask (!%p221_p2), 228352  }
   0xa   : > { %s2266_s24 = smov (!%p221_p2), 84   ;;  %s2267_s25 = smov (!%p221_p2), 112  }
   0xb   : > { %s2268_s26 = smov (!%p221_p2), 80   ;;  %s2269_s27 = smov (!%p221_p2), 108  }
   0xc   : > { %2159 = vmatpush3.bf16.msra.mxu0 (!%p221_p2), %v2158_v8  ;;  %2212 = vrot.lane.b32.xlu0 (!%p221_p2), %v2211_v9, %s2259_s7  ;;  %s2270_s28 = smov (!%p221_p2), 76   ;;  %s2271_s29 = smov (!%p221_p2), 104  }
   0xd   : > { %s2528_s22 = smov (!%p252_p3, %s1955_s22), 1  ;;  %2073 = vmatprep.subr.mxu0 %v2258_v6  ;;  %s2272_s30 = smov 72  }
   0xe   : > { %s2345_s8 = sshll.u32 %s2528_s22, 3  ;;  %s2264_s22 = smov 88  }
   0xf   : > { %s255_s11 = scalar_lea.vmem %s2520_s0, %s2345_s8  ;;  %s259_s14 = scalar_lea.vmem %s2521_s1, %s2345_s8 }
  0x10   : > { %v264_v10 = vld [vmem:[%s255_s11] sm:$0xff]  ;;  %s2273_s9 = smov 100   ;;  %s2274_s10 = smov 68  }
  0x11   : > { %v265_v11 = vld [vmem:[%s259_s14] sm:$0xff]  ;;  %s2276_s11 = smov 8   ;;  %s2277_s12 = smov 12  }
  0x12   : > { %v266_v12 = vadd.f32 %v265_v11, %v264_v10  ;;  %s2278_s13 = smov 16   ;;  %s2279_s14 = smov 20  }
  0x13   : > { %s2280_s15 = smov 24  }
  0x14   : > { %2050 = vmatmul.mubr.msk.f32.vlgmr.msra.gmra.mrb[0].mxu0 %vm278_vm1, %v266_v12 }
  0x15   : > { %2075 = vmatprep.mubr.msk.f32.mxu0 %vm2257_vm0, %v2258_v6 }
  0x7a   : > { %v2208_v13 = vpop.permute.xlu0 %2207 }
  0x7b   : > { %v2210_v14 = vunpack.i.h.bf16 %v2208_v13  ;;  %v2209_v15 = vunpack.i.l.bf16 %v2208_v13 }
  0x7d   : > { %v2161_v16 = vpack.c.bf16 %v2210_v14, %v2209_v15 }
  0x7e   : > { %v2213_v17 = vpop.permute.xlu0 %2212 }
  0x7f   : > { %v2215_v18 = vunpack.i.h.bf16 %v2213_v17  ;;  %v2214_v19 = vunpack.i.l.bf16 %v2213_v17  ;;  %2162 = vmatpush3.bf16.msra.mxu1 %v2161_v16 }
  0x80   : > { %2163 = vmatprep.subr.bf16.mxu1 %v2256_v3 }
  0x81   : > { %v2164_v20 = vpack.c.bf16 %v2215_v18, %v2214_v19 }
  0x83   : > { %2165 = vmatpush3.bf16.msra.mxu1 %v2164_v20 }
  0x84   : > { %2063 = vmatprep.subr.mxu1 %v2258_v6 }
  0x86   : > { %2061 = vmatmul.mubr.msk.f32.vlgmr.msra.gmra.mrb[0].mxu1 %vm278_vm1, %v264_v10 }
  0x87   : > { %2065 = vmatprep.mubr.msk.f32.mxu1 %vm2257_vm0, %v2258_v6 }
  0xe7   : > { %v348_v22 = vpop.f32.mrb[0].mxu0 }
  0xe8   : > { %v349_v23 = vadd.f32 %v2368_v21, %v348_v22  ;;  %v2051_v24 = vpop.f32.mrb[1].mxu0 }
  0xea   : > { %446 = vrot.lane.b32.xlu1 %v349_v23, %s2260_s17  ;;  %v444_v25 = vmul.f32 0.5, %v349_v23 }
  0xec   : > { %609 = vrot.lane.b32.xlu0 %v444_v25, %s2261_s18 }
  0xee   : > { %611 = vrot.lane.b32.xlu1 %v349_v23, %s2262_s19 }
  0xf0   : > { %775 = vrot.lane.b32.xlu0 %v444_v25, %s2263_s20 }
  0xf2   : > { %777 = vrot.lane.b32.xlu1 %v349_v23, %s2264_s22 }
  0xf4   : > { %940 = vrot.lane.b32.xlu0 %v444_v25, %s2265_s23 }
  0xf6   : > { %942 = vrot.lane.b32.xlu1 %v349_v23, %s2266_s24 }
  0xf8   : > { %1105 = vrot.lane.b32.xlu0 %v444_v25, %s2267_s25 }
  0xfa   : > { %1107 = vrot.lane.b32.xlu1 %v349_v23, %s2268_s26 }
  0xfc   : > { %1270 = vrot.lane.b32.xlu0 %v444_v25, %s2269_s27 }
  0xfe   : > { %1272 = vrot.lane.b32.xlu1 %v349_v23, %s2270_s28 }
 0x100   : > { %1435 = vrot.lane.b32.xlu0 %v444_v25, %s2271_s29 }
 0x102   : > { %1437 = vrot.lane.b32.xlu1 %v349_v23, %s2272_s30  ;;  %s263_s30 = scalar_lea.vmem %s2526_s6, %s2345_s8 }
 0x104   : > { %1600 = vrot.lane.b32.xlu0 %v444_v25, %s2273_s9 }
 0x106   : > { %1602 = vrot.lane.b32.xlu1 %v349_v23, %s2274_s10 }
 0x159   : > { %v2389_v31 = vpop.f32.mrb[0].mxu1 }
 0x15a   : > { %v2062_v33 = vpop.f32.mrb[1].mxu1 }
 0x15c   : > { %v447_v26 = vpop.permute.xlu1 %446 }
 0x15d   : > { %2064 = vmatpush3.xpose.msk.msra.mxu1 %vm448_vm2, %v447_v26 }
 0x15e   : > { %v610_v27 = vpop.permute.xlu0 %609  ;;  %2068 = vmatprep.subr.mxu1 %v2258_v6 }
 0x160   : > { %v612_v28 = vpop.permute.xlu1 %611  ;;  %2066 = vmatmul.mubr.msk.f32.vlgmr.msra.gmra.mrb[2].mxu1 %vm448_vm2, %v444_v25 }
 0x161   : > { %2074 = vmatpush3.xpose.msk.msra.mxu0 %vm448_vm2, %v612_v28  ;;  %2070 = vmatprep.mubr.msk.f32.mxu1 %vm2257_vm0, %v2258_v6 }
 0x162   : > { %v776_v29 = vpop.permute.xlu0 %775  ;;  %2083 = vmatprep.subr.mxu0 %v2258_v6 }
 0x164   : > { %v778_v30 = vpop.permute.xlu1 %777  ;;  %2076 = vmatmul.mubr.msk.f32.vlgmr.msra.gmra.mrb[2].mxu0 %vm448_vm2, %v610_v27 }
 0x165   : > { %2084 = vmatpush3.xpose.msk.msra.mxu0 %vm448_vm2, %v778_v30  ;;  %2085 = vmatprep.mubr.msk.f32.mxu0 %vm2257_vm0, %v2258_v6 }
 0x166   : > { %v941_v32 = vpop.permute.xlu0 %940  ;;  %2093 = vmatprep.subr.mxu0 %v2258_v6 }
 0x168   : > { %v943_v34 = vpop.permute.xlu1 %942  ;;  %2086 = vmatmul.mubr.msk.f32.vlgmr.msra.gmra.mrb[4].mxu0 %vm448_vm2, %v776_v29 }
 0x169   : > { %2094 = vmatpush3.xpose.msk.msra.mxu0 %vm448_vm2, %v943_v34  ;;  %2095 = vmatprep.mubr.msk.f32.mxu0 %vm2257_vm0, %v2258_v6 }
 0x16a   : > { %v1106_v35 = vpop.permute.xlu0 %1105  ;;  %2103 = vmatprep.subr.mxu0 %v2258_v6 }
 0x16c   : > { %v1108_v36 = vpop.permute.xlu1 %1107  ;;  %2096 = vmatmul.mubr.msk.f32.vlgmr.msra.gmra.mrb[6].mxu0 %vm448_vm2, %v941_v32 }
 0x16d   : > { %2104 = vmatpush3.xpose.msk.msra.mxu0 %vm448_vm2, %v1108_v36  ;;  %2105 = vmatprep.mubr.msk.f32.mxu0 %vm2257_vm0, %v2258_v6 }
 0x16e   : > { %2113 = vmatprep.subr.mxu0 %v2258_v6  ;;  %v1271_v37 = vpop.permute.xlu0 %1270 }
 0x170   : > { %v1273_v38 = vpop.permute.xlu1 %1272  ;;  %2106 = vmatmul.mubr.msk.f32.vlgmr.msra.gmra.mrb[8].mxu0 %vm448_vm2, %v1106_v35 }
 0x171   : > { %2114 = vmatpush3.xpose.msk.msra.mxu0 %vm448_vm2, %v1273_v38  ;;  %2115 = vmatprep.mubr.msk.f32.mxu0 %vm2257_vm0, %v2258_v6 }
 0x172   : > { %2123 = vmatprep.subr.mxu0 %v2258_v6  ;;  %v1436_v40 = vpop.permute.xlu0 %1435 }
 0x174   : > { %v1438_v39 = vpop.permute.xlu1 %1437  ;;  %2116 = vmatmul.mubr.msk.f32.vlgmr.msra.gmra.mrb[10].mxu0 %vm448_vm2, %v1271_v37 }
 0x175   : > { %2124 = vmatpush3.xpose.msk.msra.mxu0 %vm448_vm2, %v1438_v39  ;;  %2125 = vmatprep.mubr.msk.f32.mxu0 %vm2257_vm0, %v2258_v6 }
 0x176   : > { %2133 = vmatprep.subr.mxu0 %v2258_v6  ;;  %v1601_v42 = vpop.permute.xlu0 %1600 }
 0x178   : > { %v1603_v41 = vpop.permute.xlu1 %1602  ;;  %2126 = vmatmul.mubr.msk.f32.vlgmr.msra.gmra.mrb[12].mxu0 %vm448_vm2, %v1436_v40 }
 0x179   : > { %2134 = vmatpush3.xpose.msk.msra.mxu0 %vm448_vm2, %v1603_v41  ;;  %2135 = vmatprep.mubr.msk.f32.mxu0 %vm2257_vm0, %v2258_v6 }
 0x17a   : > { %2166 = vmatprep.subr.bf16.mxu0 %v2256_v3 }
 0x17c   : > { %2136 = vmatmul.mubr.msk.f32.vlgmr.msra.gmra.mrb[14].mxu0 %vm448_vm2, %v1601_v42 }
 0x17d   : > { %2151 = vmatprep.mubr.msk.f32.mxu0 %vm2257_vm0, %v2258_v6 }
 0x233   : > { %v520_v43 = vpop.f32.mrb[2].mxu1 }
 0x234   : > { %v2067_v44 = vpop.f32.mrb[3].mxu1  ;;  %v525_v45 = vsel %vm524_vm3, %v520_v43, -inf }
 0x235   : > { %526 = vmax.xlane.f32.xlu1 %v525_v45 }
 0x237   : > { %v683_v46 = vpop.f32.mrb[2].mxu0 }
 0x238   : > { %v2077_v47 = vpop.f32.mrb[3].mxu0  ;;  %v687_v48 = vsel %vm524_vm3, %v683_v46, -inf }
 0x239   : > { %688 = vmax.xlane.f32.xlu0 %v687_v48 }
 0x23b   : > { %v849_v49 = vpop.f32.mrb[4].mxu0 }
 0x23c   : > { %v2087_v50 = vpop.f32.mrb[5].mxu0  ;;  %v853_v51 = vsel %vm524_vm3, %v849_v49, -inf }
 0x23d   : > { %854 = vmax.xlane.f32.xlu0 %v853_v51 }
 0x23f   : > { %v1014_v52 = vpop.f32.mrb[6].mxu0 }
 0x240   : > { %v2097_v53 = vpop.f32.mrb[7].mxu0  ;;  %v1018_v54 = vsel %vm524_vm3, %v1014_v52, -inf }
 0x241   : > { %1019 = vmax.xlane.f32.xlu1 %v1018_v54 }
 0x243   : > { %v1179_v55 = vpop.f32.mrb[8].mxu0 }
 0x244   : > { %v2107_v56 = vpop.f32.mrb[9].mxu0  ;;  %v1183_v57 = vsel %vm524_vm3, %v1179_v55, -inf }
 0x245   : > { %1184 = vmax.xlane.f32.xlu0 %v1183_v57 }
 0x247   : > { %v1344_v58 = vpop.f32.mrb[10].mxu0 }
 0x248   : > { %v2117_v59 = vpop.f32.mrb[11].mxu0  ;;  %v1348_v60 = vsel %vm524_vm3, %v1344_v58, -inf }
 0x249   : > { %1349 = vmax.xlane.f32.xlu1 %v1348_v60 }
 0x24b   : > { %v1509_v61 = vpop.f32.mrb[12].mxu0 }
 0x24c   : > { %v2127_v62 = vpop.f32.mrb[13].mxu0  ;;  %v1513_v63 = vsel %vm524_vm3, %v1509_v61, -inf }
 0x24d   : > { %1514 = vmax.xlane.f32.xlu0 %v1513_v63 }
 0x24f   : > { %v2427_v0 = vpop.f32.mrb[14].mxu0 }
 0x250   : > { %v2137_v1 = vpop.f32.mrb[15].mxu0  ;;  %v1678_v26 = vsel %vm524_vm3, %v2427_v0, -inf }
 0x263   : > { %368 = vrot.lane.b32.xlu0 %v2368_v21, %s2259_s7  ;;  %s2275_s7 = smov 4  }
 0x2c2   : > { %v527_v14 = vpop.xlane.xlu1 %526 }
 0x2c3   : > { %v528_v15 = vsub.f32 %v520_v43, %v527_v14 }
 0x2c5   : > { %v529_v16 = vmul.f32 1.442695, %v528_v15 }
 0x2c6   : > { %v689_v2 = vpop.xlane.xlu0 %688 }
 0x2c7   : > { %v690_v17 = vsub.f32 %v683_v46, %v689_v2 }
 0x2c9   : > { %v691_v18 = vmul.f32 1.442695, %v690_v17 }
 0x2ca   : > { %v855_v4 = vpop.xlane.xlu0 %854 }
 0x2cb   : > { %v856_v19 = vsub.f32 %v849_v49, %v855_v4 }
 0x2cd   : > { %v857_v21 = vmul.f32 1.442695, %v856_v19 }
 0x2ce   : > { %v1020_v20 = vpop.xlane.xlu1 %1019 }
 0x2cf   : > { %v1021_v22 = vsub.f32 %v1014_v52, %v1020_v20 }
 0x2d1   : > { %v1022_v23 = vmul.f32 1.442695, %v1021_v22 }
 0x2d2   : > { %v1185_v5 = vpop.xlane.xlu0 %1184 }
 0x2d3   : > { %v1186_v24 = vsub.f32 %v1179_v55, %v1185_v5 }
 0x2d5   : > { %v1187_v28 = vmul.f32 1.442695, %v1186_v24 }
 0x2d6   : > { %v1350_v25 = vpop.xlane.xlu1 %1349 }
 0x2d7   : > { %v1351_v29 = vsub.f32 %v1344_v58, %v1350_v25 }
 0x2d9   : > { %v1352_v32 = vmul.f32 1.442695, %v1351_v29  ;;  %v1805_v29 = vld [vmem:[%s2524_s4] sm:$0xff] }
 0x2da   : > { %v1515_v7 = vpop.xlane.xlu0 %1514 }
 0x2db   : > { %v1516_v8 = vsub.f32 %v1509_v61, %v1515_v7 }
 0x2dd   : > { %v1517_v9 = vmul.f32 1.442695, %v1516_v8 }
 0x2de   : > { %v369_v10 = vpop.permute.xlu0 %368 }
 0x2df   : > { %2216 = vpow2.f32 %v1517_v9  ;;  %v2432_v11 = vadd.f32 %v2389_v31, %v369_v10 }
 0x2e0   : > { %2218 = vpow2.f32 %v529_v16 }
 0x2e1   : > { %699 = vrot.lane.b32.xlu1 %v2432_v11, %s2261_s18  ;;  %2069 = vmatpush3.msra.mxu1 %v2432_v11  ;;  %2220 = vpow2.f32 %v691_v18 }
 0x2e2   : > { %2078 = vmatprep.subr.mxu1 %v2258_v6  ;;  %2222 = vpow2.f32 %v857_v21 }
 0x2e3   : > { %2224 = vpow2.f32 %v1022_v23 }
 0x2e4   : > { %2226 = vpow2.f32 %v1187_v28 }
 0x2e5   : > { %864 = vrot.lane.b32.xlu1 %v2432_v11, %s2263_s20  ;;  %2228 = vpow2.f32 %v1352_v32 }
 0x2e9   : > { %v2440_v12 = vpop.eup %2216  ;;  %1029 = vrot.lane.b32.xlu1 %v2432_v11, %s2265_s23 }
 0x2ea   : > { %v1519_v13 = vsel %vm524_vm3, %v2440_v12, 0.0  ;;  %v2219_v27 = vpop.eup %2218 }
 0x2eb   : > { %1520 = vadd.xlane.f32.xlu0 %v1519_v13  ;;  %v531_v30 = vsel %vm524_vm3, %v2219_v27, 0.0  ;;  %v2221_v31 = vpop.eup %2220 }
 0x2ec   : > { %v693_v33 = vsel %vm524_vm3, %v2221_v31, 0.0  ;;  %v2223_v34 = vpop.eup %2222 }
 0x2ed   : > { %v859_v35 = vsel %vm524_vm3, %v2223_v34, 0.0  ;;  %v2225_v36 = vpop.eup %2224 }
 0x2ee   : > { %v1024_v37 = vsel %vm524_vm3, %v2225_v36, 0.0  ;;  %v2227_v38 = vpop.eup %2226 }
 0x2ef   : > { %v1189_v39 = vsel %vm524_vm3, %v2227_v38, 0.0  ;;  %v2229_v40 = vpop.eup %2228 }
 0x2f0   : > { %v1354_v41 = vsel %vm524_vm3, %v2229_v40, 0.0 }
 0x301   : > { %1194 = vrot.lane.b32.xlu0 %v2432_v11, %s2267_s25  ;;  %s2281_s25 = smov 28  }
 0x30d   : > { %1679 = vmax.xlane.f32.xlu1 %v1678_v26 }
 0x311   : > { %532 = vadd.xlane.f32.xlu1 %v531_v30  ;;  %v1806_v30 = vld [vmem:[%s2524_s4 + $0x8] sm:$0xff] }
 0x312   : > { %v2167_v32 = vpack.c.bf16 %v1806_v30, %v1805_v29 }
 0x314   : > { %2168 = vmatpush3.bf16.msra.mxu0 %v2167_v32 }
 0x315   : > { %694 = vadd.xlane.f32.xlu1 %v693_v33  ;;  %v1808_v33 = vld [vmem:[%s2524_s4 + $0x18] sm:$0xff]  ;;  %2169 = vmatprep.subr.bf16.mxu0 %v2256_v3 }
 0x319   : > { %860 = vadd.xlane.f32.xlu1 %v859_v35 }
 0x31d   : > { %1025 = vadd.xlane.f32.xlu1 %v1024_v37 }
 0x321   : > { %1190 = vadd.xlane.f32.xlu1 %v1189_v39 }
 0x325   : > { %1355 = vadd.xlane.f32.xlu1 %v1354_v41 }
 0x336   : > { %1359 = vrot.lane.b32.xlu1 %v2432_v11, %s2269_s27 }
 0x33a   : > { %1524 = vrot.lane.b32.xlu1 %v2432_v11, %s2271_s29 }
 0x353   : > { %v700_v42 = vpop.permute.xlu1 %699 }
 0x357   : > { %v865_v43 = vpop.permute.xlu1 %864 }
 0x35b   : > { %v1030_v44 = vpop.permute.xlu1 %1029 }
 0x378   : > { %v1521_v62 = vpop.xlane.xlu0 %1520 }
 0x37c   : > { %v1195_v2 = vpop.permute.xlu0 %1194 }
 0x39a   : > { %v1680_v45 = vpop.xlane.xlu1 %1679 }
 0x39b   : > { %v1681_v46 = vsub.f32 %v2427_v0, %v1680_v45 }
 0x39d   : > { %v1682_v47 = vmul.f32 1.442695, %v1681_v46 }
 0x39e   : > { %v533_v48 = vpop.xlane.xlu1 %532 }
 0x39f   : > { %2230 = vpow2.f32 %v1682_v47 }
 0x3a0   : > { %2232 = vrcp.f32 %v533_v48 }
 0x3a2   : > { %v695_v49 = vpop.xlane.xlu1 %694 }
 0x3a3   : > { %2234 = vrcp.f32 %v695_v49 }
 0x3a6   : > { %v861_v50 = vpop.xlane.xlu1 %860 }
 0x3a7   : > { %2236 = vrcp.f32 %v861_v50  ;;  %v1990_v50 = vld [vmem:[%s2525_s5] ss:$0 sm:$0xff] }
 0x3a9   : > { %v2231_v51 = vpop.eup %2230 }
 0x3aa   : > { %v2233_v52 = vpop.eup %2232  ;;  %v1026_v53 = vpop.xlane.xlu1 %1025  ;;  %v1684_v54 = vsel %vm524_vm3, %v2231_v51, 0.0 }
 0x3ab   : > { %v535_v55 = vmul.f32 %v2233_v52, %v2219_v27  ;;  %2238 = vrcp.f32 %v1026_v53  ;;  %1685 = vadd.xlane.f32.xlu1 %v1684_v54 }
 0x3ad   : > { %v2235_v56 = vpop.eup %2234  ;;  %2071 = vmatmul.mubr.msk.f32.vlgmr.msra.gmra.mrb[4].mxu1 %vm524_vm3, %v535_v55 }
 0x3ae   : > { %v697_v57 = vmul.f32 %v2235_v56, %v2221_v31  ;;  %2079 = vmatpush3.msra.mxu1 %v700_v42  ;;  %v1191_v58 = vpop.xlane.xlu1 %1190  ;;  %2080 = vmatprep.mubr.msk.f32.mxu1 %vm2257_vm0, %v2258_v6  ;;  %v1807_v31 = vld [vmem:[%s2524_s4 + $0x10] sm:$0xff] }
 0x3af   : > { %2240 = vrcp.f32 %v1191_v58  ;;  %2088 = vmatprep.subr.mxu1 %v2258_v6 }
 0x3b1   : > { %v2237_v59 = vpop.eup %2236  ;;  %2081 = vmatmul.mubr.msk.f32.vlgmr.msra.gmra.mrb[6].mxu1 %vm524_vm3, %v697_v57 }
 0x3b2   : > { %v863_v60 = vmul.f32 %v2237_v59, %v2223_v34  ;;  %2089 = vmatpush3.msra.mxu1 %v865_v43  ;;  %v1356_v61 = vpop.xlane.xlu1 %1355  ;;  %2090 = vmatprep.mubr.msk.f32.mxu1 %vm2257_vm0, %v2258_v6  ;;  %v2170_v34 = vpack.c.bf16 %v1808_v33, %v1807_v31 }
 0x3b3   : > { %2242 = vrcp.f32 %v1356_v61  ;;  %2098 = vmatprep.subr.mxu1 %v2258_v6 }
 0x3b4   : > { %2244 = vrcp.f32 %v1521_v62  ;;  %2171 = vmatpush3.bf16.msra.mxu0 %v2170_v34 }
 0x3b5   : > { %v2239_v63 = vpop.eup %2238  ;;  %2091 = vmatmul.mubr.msk.f32.vlgmr.msra.gmra.mrb[8].mxu1 %vm524_vm3, %v863_v60 }
 0x3b6   : > { %v1028_v0 = vmul.f32 %v2239_v63, %v2225_v36  ;;  %2099 = vmatpush3.msra.mxu1 %v1030_v44  ;;  %2100 = vmatprep.mubr.msk.f32.mxu1 %vm2257_vm0, %v2258_v6  ;;  %v1360_v5 = vpop.permute.xlu1 %1359 }
 0x3b7   : > { %2108 = vmatprep.subr.mxu1 %v2258_v6 }
 0x3b9   : > { %v2241_v1 = vpop.eup %2240  ;;  %2101 = vmatmul.mubr.msk.f32.vlgmr.msra.gmra.mrb[10].mxu1 %vm524_vm3, %v1028_v0 }
 0x3ba   : > { %v1193_v4 = vmul.f32 %v2241_v1, %v2227_v38  ;;  %2109 = vmatpush3.msra.mxu1 %v1195_v2  ;;  %2110 = vmatprep.mubr.msk.f32.mxu1 %vm2257_vm0, %v2258_v6  ;;  %v1525_v10 = vpop.permute.xlu1 %1524 }
 0x3bb   : > { %2118 = vmatprep.subr.mxu1 %v2258_v6 }
 0x3bc   : > { %1689 = vrot.lane.b32.xlu1 %v2432_v11, %s2273_s9 }
 0x3bd   : > { %v2243_v7 = vpop.eup %2242  ;;  %2111 = vmatmul.mubr.msk.f32.vlgmr.msra.gmra.mrb[12].mxu1 %vm524_vm3, %v1193_v4 }
 0x3be   : > { %v1358_v8 = vmul.f32 %v2243_v7, %v2229_v40  ;;  %2119 = vmatpush3.msra.mxu1 %v1360_v5  ;;  %2120 = vmatprep.mubr.msk.f32.mxu1 %vm2257_vm0, %v2258_v6  ;;  %v2245_v9 = vpop.eup %2244 }
 0x3bf   : > { %2128 = vmatprep.subr.mxu1 %v2258_v6  ;;  %v1523_v11 = vmul.f32 %v2245_v9, %v2440_v12 }
 0x3c1   : > { %2121 = vmatmul.mubr.msk.f32.vlgmr.msra.gmra.mrb[14].mxu1 %vm524_vm3, %v1358_v8 }
 0x3c2   : > { %2129 = vmatpush3.msra.mxu1 %v1525_v10  ;;  %2130 = vmatprep.mubr.msk.f32.mxu1 %vm2257_vm0, %v2258_v6 }
 0x3c3   : > { %2138 = vmatprep.subr.mxu1 %v2258_v6 }
 0x3c5   : > { %2131 = vmatmul.mubr.msk.f32.vlgmr.msra.gmra.mrb[16].mxu1 %vm524_vm3, %v1523_v11 }
 0x3c6   : > { %2140 = vmatprep.mubr.msk.f32.mxu1 %vm2257_vm0, %v2258_v6 }
 0x438   : > { %v1686_v13 = vpop.xlane.xlu1 %1685 }
 0x439   : > { %2246 = vrcp.f32 %v1686_v13 }
 0x43c   : > { %v1690_v14 = vpop.permute.xlu1 %1689 }
 0x43d   : > { %2139 = vmatpush3.msra.mxu1 %v1690_v14 }
 0x443   : > { %v2247_v15 = vpop.eup %2246 }
 0x444   : > { %v1688_v16 = vmul.f32 %v2247_v15, %v2231_v51 }
 0x446   : > { %2141 = vmatmul.mubr.msk.f32.vlgmr.msra.gmra.mrb[18].mxu1 %vm524_vm3, %v1688_v16 }
 0x480   : > { %v605_v17 = vpop.f32.mrb[4].mxu1 }
 0x481   : > { %v2072_v18 = vpop.f32.mrb[5].mxu1 }
 0x484   : > { %v771_v19 = vpop.f32.mrb[6].mxu1 }
 0x485   : > { %1766 = vrot.lane.b32.xlu1 %v771_v19, %s2275_s7  ;;  %v2082_v12 = vpop.f32.mrb[7].mxu1 }
 0x488   : > { %v936_v20 = vpop.f32.mrb[8].mxu1 }
 0x489   : > { %1770 = vrot.lane.b32.xlu1 %v936_v20, %s2276_s11  ;;  %v2092_v21 = vpop.f32.mrb[9].mxu1 }
 0x48c   : > { %v1101_v22 = vpop.f32.mrb[10].mxu1 }
 0x48d   : > { %1774 = vrot.lane.b32.xlu1 %v1101_v22, %s2277_s12  ;;  %v2102_v6 = vpop.f32.mrb[11].mxu1 }
 0x490   : > { %v1266_v23 = vpop.f32.mrb[12].mxu1 }
 0x491   : > { %1778 = vrot.lane.b32.xlu0 %v1266_v23, %s2278_s13  ;;  %v2112_v24 = vpop.f32.mrb[13].mxu1 }
 0x494   : > { %v1431_v25 = vpop.f32.mrb[14].mxu1 }
 0x495   : > { %1782 = vrot.lane.b32.xlu1 %v1431_v25, %s2279_s14  ;;  %v2122_v26 = vpop.f32.mrb[15].mxu1 }
 0x498   : > { %v1596_v27 = vpop.f32.mrb[16].mxu1 }
 0x499   : > { %1786 = vrot.lane.b32.xlu0 %v1596_v27, %s2280_s15  ;;  %v2132_v28 = vpop.f32.mrb[17].mxu1 }
 0x4f7   : > { %v1767_v37 = vpop.permute.xlu1 %1766 }
 0x4f8   : > { %v1793_v41 = vsel %vm448_vm2, %v605_v17, %v1767_v37 }
 0x4fb   : > { %v1771_v38 = vpop.permute.xlu1 %1770 }
 0x4fc   : > { %v1794_v42 = vsel %vm524_vm3, %v1793_v41, %v1771_v38 }
 0x4ff   : > { %v1775_v39 = vpop.permute.xlu1 %1774 }
 0x500   : > { %v1796_v44 = vsel %vm1795_vm4, %v1794_v42, %v1775_v39 }
 0x503   : > { %v1779_v40 = vpop.permute.xlu0 %1778 }
 0x504   : > { %v1798_v45 = vsel %vm1797_vm5, %v1796_v44, %v1779_v40 }
 0x507   : > { %v1783_v43 = vpop.permute.xlu1 %1782 }
 0x508   : > { %v1800_v46 = vsel %vm1799_vm6, %v1798_v45, %v1783_v43 }
 0x50b   : > { %v1787_v3 = vpop.permute.xlu0 %1786 }
 0x50c   : > { %v1802_v47 = vsel %vm1801_vm7, %v1800_v46, %v1787_v3 }
 0x519   : > { %v1761_v35 = vpop.f32.mrb[18].mxu1 }
 0x51a   : > { %1790 = vrot.lane.b32.xlu1 %v1761_v35, %s2281_s25  ;;  %v2142_v36 = vpop.f32.mrb[19].mxu1 }
 0x58c   : > { %v1791_v48 = vpop.permute.xlu1 %1790 }
 0x58d   : > { %v1804_v49 = vsel %vm1803_vm8, %v1802_v47, %v1791_v48 }
 0x58e   : > { %2152 = vmatmul.mubr.msk.f32.vlgmr.msra.gmra.mrb[16].mxu0 %vm278_vm1, %v1804_v49 }
 0x661   : > { %v1885_v51 = vpop.f32.mrb[16].mxu0 }
 0x662   : > { %v1886_v52 = vadd.f32 %v1990_v50, %v1885_v51  ;;  %v2153_v53 = vpop.f32.mrb[17].mxu0 }
 0x664   : > { %1889 = vst.msk [vmem:[%s263_s30] sm:$0xff] %vm278_vm1, %v1886_v52 }
 0x665 PF: > { %s16_s21 = sadd.s32 1, %s2254_s21  }
 0x666   : > { %p13_p4 = scmp.ge.s32.totalorder %s16_s21, 4  }
 0x668   :  { %15 = sbr.rel (!%p13_p4) target bundleno = 1 (0x1), region = 77 }

// kernel: transformer_decoder_forward.16
= control target key start
LH: loop header
LB: loop body
LE: loop exit
PB: predicated region body
PF: predicated region fallthrough
CT: control target
= control target key end

     0   :  { %s2819_s27 = smov 0   ;;  %s3082_s0 = inlined_call_operand.vmem [shape: f32[2,8,32], index: 0, kind: input, shape index: {}]   ;;  %s3083_s1 = inlined_call_operand.vmem [shape: f32[2,8,32], index: 1, kind: input, shape index: {}]   ;;  %s3084_s2 = inlined_call_operand.vmem [shape: f32[2,16,32], index: 2, kind: input, shape index: {}]   ;;  %s3085_s3 = inlined_call_operand.vmem [shape: f32[2,16,32], index: 3, kind: input, shape index: {}]   ;;  %s3086_s4 = inlined_call_operand.vmem [shape: f32[32,96], index: 4, kind: input, shape index: {}]   ;;  %s3087_s5 = inlined_call_operand.vmem [shape: f32[1,96], index: 5, kind: input, shape index: {}]   ;;  %s3088_s6 = inlined_call_operand.vmem [shape: f32[32,32], index: 6, kind: input, shape index: {}]   ;;  %s3089_s7 = inlined_call_operand.vmem [shape: f32[1,32], index: 7, kind: input, shape index: {}]   ;;  %s3090_s8 = inlined_call_operand.vmem [shape: f32[2,8,32], index: 8, kind: output, shape index: {}]  }
   0x1 LB: > { %s2232_s28 = sadd.s32 4294967295, %s2753_s27   ;;  %p2236_p0 = scmp.ge.s32.totalorder %s2753_s27, 1  ;;  %s2753_s27 = sphi %s2819_s27, %s18_s27  }
   0x2   : > { %p290_p1 = scmp.lt.s32.totalorder %s2753_s27, 3 }
   0x4   : > { %p291_p2 = pnand %p2236_p0, %p290_p1 }
   0x5   : > { %v358_v0 = vld [vmem:[%s3086_s4] sm:$0xff] (!%p291_p2)  ;;  %v359_v1 = vld [vmem:[%s3086_s4 + $0x8] sm:$0xff] (!%p291_p2)  ;;  %v360_v2 = vld [vmem:[%s3086_s4 + $0x10] sm:$0xff] (!%p291_p2)  ;;  %p336_p3 = scmp.lt.s32.totalorder (!%p291_p2), %s2232_s28, 1  ;;  %v2755_v5 = vmov (!%p291_p2), 0.0|0.0   ;;  %s2756_s17 = smov (!%p291_p2), 96  }
   0x6   : > { %294 = sbr.rel (%p291_p2) target bundleno = 5178 (0x143a), region = 52  ;;  %v2625_v3 = vpack.i.bf16 (!%p291_p2), %v359_v1, %v358_v0  ;;  %v361_v4 = vld [vmem:[%s3086_s4 + $0x18] sm:$0xff] (!%p291_p2)  ;;  %2514 = vmatprep.subr.bf16.mxu0 (!%p291_p2), %v2755_v5  ;;  %v2515_v6 = vpack.c.bf16 (!%p291_p2), %v359_v1, %v358_v0  ;;  %v2845_v7 = vld [vmem:[%s3087_s5] ss:$0 sm:$0xff] (!%p291_p2)  ;;  %vm372_vm0 = vcmask (!%p291_p2), 261120   ;;  %vm2757_vm1 = vmmov (!%p291_p2), 0  }
   0x7   : > { %v2630_v8 = vpack.i.bf16 (!%p291_p2), %v361_v4, %v360_v2  ;;  %v2518_v9 = vpack.c.bf16 (!%p291_p2), %v361_v4, %v360_v2  ;;  %v2758_v10 = vmov (!%p291_p2), 0.0   ;;  %464 = vrot.lane.b32.xlu1 (!%p291_p2), %v2845_v7, %s2756_s17  ;;  %s2759_s9 = smov (!%p291_p2), 64   ;;  %vm647_vm2 = vcmask (!%p291_p2), 31744   ;;  %s2761_s13 = smov (!%p291_p2), 120  }
   0x8   : > { %2626 = vrot.lane.b32.xlu0 (!%p291_p2), %v2625_v3, %s2756_s17  ;;  %2516 = vmatpush3.bf16.msra.mxu0 (!%p291_p2), %v2515_v6  ;;  %vm2878_vm3 = vmpackc.low (!%p291_p2), %vm647_vm2, %vm647_vm2  ;;  %vm727_vm4 = vcmask (!%p291_p2), 130048   ;;  %s2762_s14 = smov (!%p291_p2), 116   ;;  %s2763_s15 = smov (!%p291_p2), 112   ;;  %vm2047_vm5 = vcmask (!%p291_p2), 64512   ;;  %vm2049_vm6 = vcmask (!%p291_p2), 97280   ;;  %vm2052_vm7 = vcmask (!%p291_p2), 162816  }
   0x9   : > { %2517 = vmatprep.subr.bf16.mxu0 (!%p291_p2), %v2755_v5  ;;  %2366 = vmatprep.mubr.msk.f32.mxu0 (!%p291_p2), %vm2757_vm1, %v2758_v10  ;;  %s2764_s16 = smov (!%p291_p2), 108   ;;  %s2767_s20 = smov (!%p291_p2), 8   ;;  %vm2054_vm8 = vcmask (!%p291_p2), 195584   ;;  %vm2056_vm9 = vcmask (!%p291_p2), 228352  }
   0xa   : > { %s2768_s21 = smov (!%p291_p2), 16   ;;  %s2770_s23 = smov (!%p291_p2), 4  }
   0xb   : > { %2636 = vrot.lane.b32.xlu1 (!%p291_p2), %v2625_v3, %s2759_s9  ;;  %s2771_s24 = smov (!%p291_p2), 12  }
   0xc   : > { %2631 = vrot.lane.b32.xlu0 (!%p291_p2), %v2630_v8, %s2756_s17  ;;  %2519 = vmatpush3.bf16.msra.mxu0 (!%p291_p2), %v2518_v9  ;;  %s2765_s17 = smov (!%p291_p2), 104  }
   0xd   : > { %s3094_s28 = smov (!%p336_p3, %s2232_s28), 1 }
   0xe   : > { %s2848_s18 = sshll.u32 %s3094_s28, 3  ;;  %s2286_s19 = sshll.u32 %s3094_s28, 4 }
   0xf   : > { %s348_s22 = scalar_lea.vmem %s3084_s2, %s2286_s19  ;;  %s339_s25 = scalar_lea.vmem %s3082_s0, %s2848_s18 }
  0x10   : > { %v446_v11 = vld [vmem:[%s348_s22] sm:$0xff]  ;;  %s343_s30 = scalar_lea.vmem %s3083_s1, %s2848_s18  ;;  %v447_v23 = vld [vmem:[%s348_s22 + $0x8] sm:$0xff]  ;;  %2641 = vrot.lane.b32.xlu0 %v2630_v8, %s2759_s9  ;;  %s353_s12 = scalar_lea.vmem %s3085_s3, %s2286_s19 }
  0x11   : > { %2377 = vmatprep.mubr.msk.f32.mxu1 %vm372_vm0, %v446_v11  ;;  %v363_v12 = vld [vmem:[%s339_s25] sm:$0xff]  ;;  %v549_v45 = vld [vmem:[%s353_s12 + $0x8] sm:$0xff]  ;;  %s2760_s28 = smov 124   ;;  %s2766_s19 = smov 100  }
  0x12   : > { %v364_v13 = vld [vmem:[%s343_s30] sm:$0xff]  ;;  %s2769_s22 = smov 24   ;;  %s2772_s25 = smov 20  }
  0x13   : > { %v365_v14 = vadd.f32 %v364_v13, %v363_v12  ;;  %v548_v38 = vld [vmem:[%s353_s12] sm:$0xff] }
  0x15   : > { %2367 = vmatmul.mubr.msk.f32.vlgmr.msra.gmra.mrb[0].mxu0 %vm372_vm0, %v365_v14 }
  0x16   : > { %2388 = vmatprep.mubr.msk.f32.mxu0 %vm372_vm0, %v548_v38 }
  0x79   : > { %v465_v26 = vpop.permute.xlu1 %464 }
  0x7a   : > { %v2627_v15 = vpop.permute.xlu0 %2626 }
  0x7b   : > { %v2629_v16 = vunpack.i.h.bf16 %v2627_v15  ;;  %v2628_v17 = vunpack.i.l.bf16 %v2627_v15 }
  0x7d   : > { %v2520_v18 = vpack.c.bf16 %v2629_v16, %v2628_v17  ;;  %v2637_v36 = vpop.permute.xlu1 %2636 }
  0x7e   : > { %v2632_v19 = vpop.permute.xlu0 %2631  ;;  %v2639_v39 = vunpack.i.h.bf16 %v2637_v36  ;;  %v2638_v40 = vunpack.i.l.bf16 %v2637_v36 }
  0x7f   : > { %v2634_v20 = vunpack.i.h.bf16 %v2632_v19  ;;  %v2633_v21 = vunpack.i.l.bf16 %v2632_v19  ;;  %2521 = vmatprep.subr.bf16.mxu1 %v2520_v18 }
  0x80   : > { %2523 = vmatpush3.bf16.msra.mxu1 %v2520_v18  ;;  %v2528_v43 = vpack.c.bf16 %v2639_v39, %v2638_v40 }
  0x81   : > { %v2524_v22 = vpack.c.bf16 %v2634_v20, %v2633_v21 }
  0x82   : > { %v2642_v37 = vpop.permute.xlu0 %2641  ;;  %2529 = vmatprep.subr.bf16.mxu0 %v2528_v43 }
  0x83   : > { %2525 = vmatprep.subr.bf16.mxu1 %v2524_v22  ;;  %v2644_v41 = vunpack.i.h.bf16 %v2642_v37  ;;  %v2643_v42 = vunpack.i.l.bf16 %v2642_v37  ;;  %2531 = vmatpush3.bf16.msra.mxu0 %v2528_v43 }
  0x84   : > { %2527 = vmatpush3.bf16.msra.mxu1 %v2524_v22 }
  0x85   : > { %2536 = vmatprep.subr.bf16.mxu1 %v2755_v5  ;;  %v2532_v44 = vpack.c.bf16 %v2644_v41, %v2643_v42 }
  0x87   : > { %2378 = vmatmul.mubr.msk.f32.vlgmr.msra.gmra.mrb[0].mxu1 %vm372_vm0, %v447_v23  ;;  %2533 = vmatprep.subr.bf16.mxu0 %v2532_v44 }
  0x88   : > { %2395 = vmatprep.mubr.msk.f32.mxu1 %vm2757_vm1, %v2758_v10  ;;  %2535 = vmatpush3.bf16.msra.mxu0 %v2532_v44 }
  0x89   : > { %2547 = vmatprep.subr.bf16.mxu0 %v2755_v5 }
  0x8b   : > { %2389 = vmatmul.mubr.msk.f32.vlgmr.msra.gmra.mrb[2].mxu0 %vm372_vm0, %v549_v45 }
  0x8c   : > { %2416 = vmatprep.mubr.msk.f32.mxu0 %vm2757_vm1, %v2758_v10 }
  0xe8   : > { %v442_v24 = vpop.f32.mrb[0].mxu0 }
  0xe9   : > { %v2368_v25 = vpop.f32.mrb[1].mxu0  ;;  %v443_v32 = vadd.f32 %v2845_v7, %v442_v24 }
  0xeb   : > { %v2888_v35 = vmul.f32 0.5, %v443_v32 }
 0x15a   : > { %v2379_v27 = vpop.f32.mrb[0].mxu1 }
 0x15b   : > { %v545_v28 = vadd.f32 %v2379_v27, %v465_v26  ;;  %v539_v29 = vpop.f32.mrb[1].mxu1 }
 0x15c   : > { %v540_v30 = vadd.f32 %v539_v29, %v465_v26 }
 0x15e   : > { %v2537_v33 = vpack.c.bf16 %v545_v28, %v540_v30  ;;  %v2883_v34 = vpack.i.bf16 %v545_v28, %v540_v30  ;;  %v2390_v54 = vpop.f32.mrb[2].mxu0 }
 0x15f   : > { %v637_v55 = vpop.f32.mrb[3].mxu0 }
 0x160   : > { %2539 = vmatpush3.bf16.xpose.msk.msra.mxu1 %vm2878_vm3, %v2537_v33 }
 0x161   : > { %2540 = vmatprep.subr.bf16.mxu1 %v2755_v5 }
 0x167   : > { %2396 = vmatmul.mubr.msk.f32.vlgmr.msra.gmra.mrb[2].mxu1 %vm647_vm2, %v2888_v35 }
 0x168   : > { %2402 = vmatprep.mubr.msk.f32.mxu1 %vm2757_vm1, %v2758_v10 }
 0x23a   : > { %v723_v46 = vpop.f32.mrb[2].mxu1 }
 0x23b   : > { %v2397_v47 = vpop.f32.mrb[3].mxu1  ;;  %v728_v48 = vsel %vm727_vm4, %v723_v46, -inf }
 0x23c   : > { %729 = vmax.xlane.f32.xlu1 %v728_v48 }
 0x24d   : > { %2646 = vrot.lane.b32.xlu1 %v2883_v34, %s2760_s28 }
 0x251   : > { %812 = vrot.lane.b32.xlu1 %v2888_v35, %s2760_s28 }
 0x2c9   : > { %v730_v49 = vpop.xlane.xlu1 %729 }
 0x2ca   : > { %v731_v50 = vsub.f32 %v723_v46, %v730_v49 }
 0x2cc   : > { %v732_v51 = vmul.f32 1.442695, %v731_v50 }
 0x2cd   : > { %v2647_v62 = vpop.permute.xlu1 %2646 }
 0x2ce   : > { %2715 = vpow2.f32 %v732_v51  ;;  %v2649_v0 = vunpack.i.h.bf16 %v2647_v62  ;;  %v2648_v1 = vunpack.i.l.bf16 %v2647_v62 }
 0x2d0   : > { %v2544_v3 = vpack.c.bf16 %v2649_v0, %v2648_v1 }
 0x2d1   : > { %v813_v4 = vpop.permute.xlu1 %812 }
 0x2d8   : > { %v2716_v52 = vpop.eup %2715 }
 0x2d9   : > { %v734_v53 = vsel %vm727_vm4, %v2716_v52, 0.0 }
 0x2da   : > { %735 = vadd.xlane.f32.xlu0 %v734_v53 }
 0x2f0   : > { %562 = vrot.lane.b32.xlu0 %v2845_v7, %s2759_s9 }
 0x367   : > { %v736_v56 = vpop.xlane.xlu0 %735 }
 0x368   : > { %2717 = vrcp.f32 %v736_v56 }
 0x36b   : > { %v563_v57 = vpop.permute.xlu0 %562 }
 0x36c   : > { %v638_v58 = vadd.f32 %v637_v55, %v563_v57  ;;  %v643_v59 = vadd.f32 %v2390_v54, %v563_v57 }
 0x36e   : > { %v2541_v60 = vpack.c.bf16 %v643_v59, %v638_v58  ;;  %v2912_v61 = vpack.i.bf16 %v643_v59, %v638_v58 }
 0x370   : > { %2542 = vmatpush3.bf16.msra.mxu1 %v2541_v60 }
 0x371   : > { %2543 = vmatprep.subr.bf16.mxu1 %v2755_v5 }
 0x372   : > { %v2718_v63 = vpop.eup %2717 }
 0x373   : > { %v738_v2 = vmul.f32 %v2718_v63, %v2716_v52 }
 0x375   : > { %2403 = vmatmul.mubr.msk.f32.vlgmr.msra.gmra.mrb[4].mxu1 %vm727_vm4, %v738_v2 }
 0x376   : > { %2409 = vmatprep.mubr.msk.f32.mxu1 %vm2757_vm1, %v2758_v10 }
 0x379   : > { %2546 = vmatpush3.bf16.xpose.msk.msra.mxu1 %vm2878_vm3, %v2544_v3 }
 0x37a   : > { %2554 = vmatprep.subr.bf16.mxu1 %v2755_v5 }
 0x380   : > { %2410 = vmatmul.mubr.msk.f32.vlgmr.msra.gmra.mrb[6].mxu1 %vm647_vm2, %v813_v4 }
 0x381   : > { %2430 = vmatprep.mubr.msk.f32.mxu1 %vm2757_vm1, %v2758_v10 }
 0x448   : > { %v2924_v6 = vpop.f32.mrb[4].mxu1 }
 0x449   : > { %v2404_v7 = vpop.f32.mrb[5].mxu1 }
 0x453   : > { %v890_v8 = vpop.f32.mrb[6].mxu1 }
 0x454   : > { %v2411_v9 = vpop.f32.mrb[7].mxu1  ;;  %v894_v11 = vsel %vm727_vm4, %v890_v8, -inf }
 0x455   : > { %895 = vmax.xlane.f32.xlu0 %v894_v11 }
 0x46b   : > { %2651 = vrot.lane.b32.xlu0 %v2912_v61, %s2760_s28 }
 0x46f   : > { %986 = vrot.lane.b32.xlu0 %v2888_v35, %s2761_s13 }
 0x4e2   : > { %v896_v12 = vpop.xlane.xlu0 %895 }
 0x4e3   : > { %v897_v13 = vsub.f32 %v890_v8, %v896_v12 }
 0x4e5   : > { %v898_v14 = vmul.f32 1.442695, %v897_v13 }
 0x4e6   : > { %v2652_v15 = vpop.permute.xlu0 %2651 }
 0x4e7   : > { %2719 = vpow2.f32 %v898_v14  ;;  %v2654_v16 = vunpack.i.h.bf16 %v2652_v15  ;;  %v2653_v17 = vunpack.i.l.bf16 %v2652_v15 }
 0x4e9   : > { %v2548_v18 = vpack.c.bf16 %v2654_v16, %v2653_v17 }
 0x4ea   : > { %v987_v28 = vpop.permute.xlu0 %986 }
 0x4eb   : > { %2549 = vmatpush3.bf16.msra.mxu0 %v2548_v18 }
 0x4ec   : > { %2550 = vmatprep.subr.bf16.mxu0 %v2755_v5 }
 0x4f1   : > { %v2720_v19 = vpop.eup %2719 }
 0x4f2   : > { %v900_v20 = vsel %vm727_vm4, %v2720_v19, 0.0 }
 0x4f3   : > { %901 = vadd.xlane.f32.xlu1 %v900_v20 }
 0x504   : > { %2656 = vrot.lane.b32.xlu1 %v2883_v34, %s2761_s13 }
 0x580   : > { %v902_v21 = vpop.xlane.xlu1 %901 }
 0x581   : > { %2721 = vrcp.f32 %v902_v21 }
 0x584   : > { %v2657_v22 = vpop.permute.xlu1 %2656 }
 0x585   : > { %v2659_v23 = vunpack.i.h.bf16 %v2657_v22  ;;  %v2658_v24 = vunpack.i.l.bf16 %v2657_v22 }
 0x587   : > { %v2551_v27 = vpack.c.bf16 %v2659_v23, %v2658_v24 }
 0x58b   : > { %v2722_v25 = vpop.eup %2721 }
 0x58c   : > { %v904_v26 = vmul.f32 %v2722_v25, %v2720_v19 }
 0x58e   : > { %2417 = vmatmul.mubr.msk.f32.vlgmr.msra.gmra.mrb[4].mxu0 %vm727_vm4, %v904_v26 }
 0x58f   : > { %2553 = vmatpush3.bf16.xpose.msk.msra.mxu0 %vm2878_vm3, %v2551_v27  ;;  %2423 = vmatprep.mubr.msk.f32.mxu0 %vm2757_vm1, %v2758_v10 }
 0x590   : > { %2561 = vmatprep.subr.bf16.mxu0 %v2755_v5 }
 0x596   : > { %2424 = vmatmul.mubr.msk.f32.vlgmr.msra.gmra.mrb[6].mxu0 %vm647_vm2, %v987_v28 }
 0x597   : > { %2444 = vmatprep.mubr.msk.f32.mxu0 %vm2757_vm1, %v2758_v10 }
 0x661   : > { %v2944_v29 = vpop.f32.mrb[4].mxu0 }
 0x662   : > { %v2418_v30 = vpop.f32.mrb[5].mxu0 }
 0x669   : > { %v1064_v32 = vpop.f32.mrb[6].mxu0 }
 0x66a   : > { %v2425_v33 = vpop.f32.mrb[7].mxu0  ;;  %v1068_v36 = vsel %vm727_vm4, %v1064_v32, -inf }
 0x66b   : > { %1069 = vmax.xlane.f32.xlu1 %v1068_v36 }
 0x67c   : > { %2666 = vrot.lane.b32.xlu1 %v2883_v34, %s2762_s14 }
 0x680   : > { %1158 = vrot.lane.b32.xlu1 %v2888_v35, %s2762_s14 }
 0x6f8   : > { %v1070_v37 = vpop.xlane.xlu1 %1069 }
 0x6f9   : > { %v1071_v38 = vsub.f32 %v1064_v32, %v1070_v37 }
 0x6fb   : > { %v1072_v39 = vmul.f32 1.442695, %v1071_v38 }
 0x6fc   : > { %v2667_v47 = vpop.permute.xlu1 %2666 }
 0x6fd   : > { %2723 = vpow2.f32 %v1072_v39  ;;  %v2669_v49 = vunpack.i.h.bf16 %v2667_v47  ;;  %v2668_v50 = vunpack.i.l.bf16 %v2667_v47 }
 0x6ff   : > { %v2558_v52 = vpack.c.bf16 %v2669_v49, %v2668_v50 }
 0x700   : > { %v1159_v53 = vpop.permute.xlu1 %1158 }
 0x707   : > { %v2724_v40 = vpop.eup %2723 }
 0x708   : > { %v1074_v41 = vsel %vm727_vm4, %v2724_v40, 0.0 }
 0x709   : > { %1075 = vadd.xlane.f32.xlu0 %v1074_v41 }
 0x71f   : > { %2661 = vrot.lane.b32.xlu0 %v2912_v61, %s2761_s13  ;;  %s2773_s13 = smov 28  }
 0x796   : > { %v1076_v42 = vpop.xlane.xlu0 %1075 }
 0x797   : > { %2725 = vrcp.f32 %v1076_v42 }
 0x79a   : > { %v2662_v43 = vpop.permute.xlu0 %2661 }
 0x79b   : > { %v2664_v44 = vunpack.i.h.bf16 %v2662_v43  ;;  %v2663_v45 = vunpack.i.l.bf16 %v2662_v43 }
 0x79d   : > { %v2555_v46 = vpack.c.bf16 %v2664_v44, %v2663_v45 }
 0x79f   : > { %2556 = vmatpush3.bf16.msra.mxu1 %v2555_v46 }
 0x7a0   : > { %2557 = vmatprep.subr.bf16.mxu1 %v2755_v5 }
 0x7a1   : > { %v2726_v48 = vpop.eup %2725 }
 0x7a2   : > { %v1078_v51 = vmul.f32 %v2726_v48, %v2724_v40 }
 0x7a4   : > { %2431 = vmatmul.mubr.msk.f32.vlgmr.msra.gmra.mrb[8].mxu1 %vm727_vm4, %v1078_v51 }
 0x7a5   : > { %2437 = vmatprep.mubr.msk.f32.mxu1 %vm2757_vm1, %v2758_v10 }
 0x7a8   : > { %2560 = vmatpush3.bf16.xpose.msk.msra.mxu1 %vm2878_vm3, %v2558_v52 }
 0x7a9   : > { %2568 = vmatprep.subr.bf16.mxu1 %v2755_v5 }
 0x7af   : > { %2438 = vmatmul.mubr.msk.f32.vlgmr.msra.gmra.mrb[10].mxu1 %vm647_vm2, %v1159_v53 }
 0x7b0   : > { %2458 = vmatprep.mubr.msk.f32.mxu1 %vm2757_vm1, %v2758_v10 }
 0x877   : > { %v2964_v54 = vpop.f32.mrb[8].mxu1 }
 0x878   : > { %v2432_v55 = vpop.f32.mrb[9].mxu1 }
 0x882   : > { %v1236_v56 = vpop.f32.mrb[10].mxu1 }
 0x883   : > { %v2439_v57 = vpop.f32.mrb[11].mxu1  ;;  %v1240_v58 = vsel %vm727_vm4, %v1236_v56, -inf }
 0x884   : > { %1241 = vmax.xlane.f32.xlu0 %v1240_v58 }
 0x89a   : > { %2671 = vrot.lane.b32.xlu0 %v2912_v61, %s2762_s14 }
 0x89e   : > { %1330 = vrot.lane.b32.xlu0 %v2888_v35, %s2763_s15 }
 0x911   : > { %v1242_v59 = vpop.xlane.xlu0 %1241 }
 0x912   : > { %v1243_v60 = vsub.f32 %v1236_v56, %v1242_v59 }
 0x914   : > { %v1244_v62 = vmul.f32 1.442695, %v1243_v60 }
 0x915   : > { %v2672_v63 = vpop.permute.xlu0 %2671 }
 0x916   : > { %2727 = vpow2.f32 %v1244_v62  ;;  %v2674_v0 = vunpack.i.h.bf16 %v2672_v63  ;;  %v2673_v1 = vunpack.i.l.bf16 %v2672_v63 }
 0x918   : > { %v2562_v2 = vpack.c.bf16 %v2674_v0, %v2673_v1 }
 0x919   : > { %v1331_v15 = vpop.permute.xlu0 %1330 }
 0x91a   : > { %2563 = vmatpush3.bf16.msra.mxu0 %v2562_v2 }
 0x91b   : > { %2564 = vmatprep.subr.bf16.mxu0 %v2755_v5 }
 0x920   : > { %v2728_v3 = vpop.eup %2727 }
 0x921   : > { %v1246_v4 = vsel %vm727_vm4, %v2728_v3, 0.0 }
 0x922   : > { %1247 = vadd.xlane.f32.xlu1 %v1246_v4 }
 0x933   : > { %2676 = vrot.lane.b32.xlu1 %v2883_v34, %s2763_s15 }
 0x9af   : > { %v1248_v7 = vpop.xlane.xlu1 %1247 }
 0x9b0   : > { %2729 = vrcp.f32 %v1248_v7 }
 0x9b3   : > { %v2677_v8 = vpop.permute.xlu1 %2676 }
 0x9b4   : > { %v2679_v9 = vunpack.i.h.bf16 %v2677_v8  ;;  %v2678_v11 = vunpack.i.l.bf16 %v2677_v8 }
 0x9b6   : > { %v2565_v14 = vpack.c.bf16 %v2679_v9, %v2678_v11 }
 0x9ba   : > { %v2730_v12 = vpop.eup %2729 }
 0x9bb   : > { %v1250_v13 = vmul.f32 %v2730_v12, %v2728_v3 }
 0x9bd   : > { %2445 = vmatmul.mubr.msk.f32.vlgmr.msra.gmra.mrb[8].mxu0 %vm727_vm4, %v1250_v13 }
 0x9be   : > { %2567 = vmatpush3.bf16.xpose.msk.msra.mxu0 %vm2878_vm3, %v2565_v14  ;;  %2451 = vmatprep.mubr.msk.f32.mxu0 %vm2757_vm1, %v2758_v10 }
 0x9bf   : > { %2575 = vmatprep.subr.bf16.mxu0 %v2755_v5 }
 0x9c5   : > { %2452 = vmatmul.mubr.msk.f32.vlgmr.msra.gmra.mrb[10].mxu0 %vm647_vm2, %v1331_v15 }
 0x9c6   : > { %2472 = vmatprep.mubr.msk.f32.mxu0 %vm2757_vm1, %v2758_v10 }
 0xa90   : > { %v2984_v16 = vpop.f32.mrb[8].mxu0 }
 0xa91   : > { %v2446_v17 = vpop.f32.mrb[9].mxu0 }
 0xa98   : > { %v1408_v18 = vpop.f32.mrb[10].mxu0 }
 0xa99   : > { %v2453_v19 = vpop.f32.mrb[11].mxu0  ;;  %v1412_v20 = vsel %vm727_vm4, %v1408_v18, -inf }
 0xa9a   : > { %1413 = vmax.xlane.f32.xlu1 %v1412_v20 }
 0xaab   : > { %2686 = vrot.lane.b32.xlu1 %v2883_v34, %s2764_s16 }
 0xaaf   : > { %1502 = vrot.lane.b32.xlu1 %v2888_v35, %s2764_s16 }
 0xb27   : > { %v1414_v21 = vpop.xlane.xlu1 %1413 }
 0xb28   : > { %v1415_v22 = vsub.f32 %v1408_v18, %v1414_v21 }
 0xb2a   : > { %v1416_v23 = vmul.f32 1.442695, %v1415_v22 }
 0xb2b   : > { %v2687_v33 = vpop.permute.xlu1 %2686 }
 0xb2c   : > { %2731 = vpow2.f32 %v1416_v23  ;;  %v2689_v37 = vunpack.i.h.bf16 %v2687_v33  ;;  %v2688_v38 = vunpack.i.l.bf16 %v2687_v33 }
 0xb2e   : > { %v2572_v40 = vpack.c.bf16 %v2689_v37, %v2688_v38 }
 0xb2f   : > { %v1503_v41 = vpop.permute.xlu1 %1502 }
 0xb36   : > { %v2732_v24 = vpop.eup %2731 }
 0xb37   : > { %v1418_v25 = vsel %vm727_vm4, %v2732_v24, 0.0 }
 0xb38   : > { %1419 = vadd.xlane.f32.xlu0 %v1418_v25 }
 0xb4e   : > { %2681 = vrot.lane.b32.xlu0 %v2912_v61, %s2763_s15 }
 0xbc5   : > { %v1420_v26 = vpop.xlane.xlu0 %1419 }
 0xbc6   : > { %2733 = vrcp.f32 %v1420_v26 }
 0xbc9   : > { %v2682_v27 = vpop.permute.xlu0 %2681 }
 0xbca   : > { %v2684_v28 = vunpack.i.h.bf16 %v2682_v27  ;;  %v2683_v30 = vunpack.i.l.bf16 %v2682_v27 }
 0xbcc   : > { %v2569_v32 = vpack.c.bf16 %v2684_v28, %v2683_v30 }
 0xbce   : > { %2570 = vmatpush3.bf16.msra.mxu1 %v2569_v32 }
 0xbcf   : > { %2571 = vmatprep.subr.bf16.mxu1 %v2755_v5 }
 0xbd0   : > { %v2734_v36 = vpop.eup %2733 }
 0xbd1   : > { %v1422_v39 = vmul.f32 %v2734_v36, %v2732_v24 }
 0xbd3   : > { %2459 = vmatmul.mubr.msk.f32.vlgmr.msra.gmra.mrb[12].mxu1 %vm727_vm4, %v1422_v39 }
 0xbd4   : > { %2465 = vmatprep.mubr.msk.f32.mxu1 %vm2757_vm1, %v2758_v10 }
 0xbd7   : > { %2574 = vmatpush3.bf16.xpose.msk.msra.mxu1 %vm2878_vm3, %v2572_v40 }
 0xbd8   : > { %2582 = vmatprep.subr.bf16.mxu1 %v2755_v5 }
 0xbde   : > { %2466 = vmatmul.mubr.msk.f32.vlgmr.msra.gmra.mrb[14].mxu1 %vm647_vm2, %v1503_v41 }
 0xbdf   : > { %2486 = vmatprep.mubr.msk.f32.mxu1 %vm2757_vm1, %v2758_v10 }
 0xca6   : > { %v3004_v42 = vpop.f32.mrb[12].mxu1 }
 0xca7   : > { %v2460_v43 = vpop.f32.mrb[13].mxu1 }
 0xcb1   : > { %v1580_v44 = vpop.f32.mrb[14].mxu1 }
 0xcb2   : > { %v2467_v45 = vpop.f32.mrb[15].mxu1  ;;  %v1584_v46 = vsel %vm727_vm4, %v1580_v44, -inf }
 0xcb3   : > { %1585 = vmax.xlane.f32.xlu0 %v1584_v46  ;;  %v2061_v46 = vld [vmem:[%s3088_s6 + $0x18] sm:$0xff] }
 0xcc9   : > { %2691 = vrot.lane.b32.xlu0 %v2912_v61, %s2764_s16 }
 0xccd   : > { %1674 = vrot.lane.b32.xlu0 %v2888_v35, %s2765_s17 }
 0xd40   : > { %v1586_v47 = vpop.xlane.xlu0 %1585 }
 0xd41   : > { %v1587_v48 = vsub.f32 %v1580_v44, %v1586_v47  ;;  %v2058_v44 = vld [vmem:[%s3088_s6] sm:$0xff] }
 0xd43   : > { %v1588_v49 = vmul.f32 1.442695, %v1587_v48 }
 0xd44   : > { %v2692_v50 = vpop.permute.xlu0 %2691 }
 0xd45   : > { %2735 = vpow2.f32 %v1588_v49  ;;  %v2694_v51 = vunpack.i.h.bf16 %v2692_v50  ;;  %v2693_v52 = vunpack.i.l.bf16 %v2692_v50 }
 0xd47   : > { %v2576_v53 = vpack.c.bf16 %v2694_v51, %v2693_v52 }
 0xd48   : > { %v1675_v1 = vpop.permute.xlu0 %1674 }
 0xd49   : > { %2577 = vmatpush3.bf16.msra.mxu0 %v2576_v53 }
 0xd4a   : > { %2578 = vmatprep.subr.bf16.mxu0 %v2755_v5 }
 0xd4f   : > { %v2736_v55 = vpop.eup %2735 }
 0xd50   : > { %v1590_v56 = vsel %vm727_vm4, %v2736_v55, 0.0 }
 0xd51   : > { %1591 = vadd.xlane.f32.xlu1 %v1590_v56 }
 0xd62   : > { %2696 = vrot.lane.b32.xlu1 %v2883_v34, %s2765_s17 }
 0xdde   : > { %v1592_v57 = vpop.xlane.xlu1 %1591 }
 0xddf   : > { %2737 = vrcp.f32 %v1592_v57 }
 0xde2   : > { %v2697_v58 = vpop.permute.xlu1 %2696 }
 0xde3   : > { %v2699_v59 = vunpack.i.h.bf16 %v2697_v58  ;;  %v2698_v60 = vunpack.i.l.bf16 %v2697_v58 }
 0xde5   : > { %v2579_v0 = vpack.c.bf16 %v2699_v59, %v2698_v60 }
 0xde9   : > { %v2738_v62 = vpop.eup %2737 }
 0xdea   : > { %v1594_v63 = vmul.f32 %v2738_v62, %v2736_v55 }
 0xdec   : > { %2473 = vmatmul.mubr.msk.f32.vlgmr.msra.gmra.mrb[12].mxu0 %vm727_vm4, %v1594_v63 }
 0xded   : > { %2581 = vmatpush3.bf16.xpose.msk.msra.mxu0 %vm2878_vm3, %v2579_v0  ;;  %2479 = vmatprep.mubr.msk.f32.mxu0 %vm2757_vm1, %v2758_v10 }
 0xdee   : > { %2589 = vmatprep.subr.bf16.mxu0 %v2755_v5 }
 0xdf4   : > { %2480 = vmatmul.mubr.msk.f32.vlgmr.msra.gmra.mrb[14].mxu0 %vm647_vm2, %v1675_v1 }
 0xdf5   : > { %2500 = vmatprep.mubr.msk.f32.mxu0 %vm2757_vm1, %v2758_v10 }
 0xebf   : > { %v3024_v2 = vpop.f32.mrb[12].mxu0 }
 0xec0   : > { %v2474_v3 = vpop.f32.mrb[13].mxu0 }
 0xec7   : > { %v1752_v4 = vpop.f32.mrb[14].mxu0 }
 0xec8   : > { %v2481_v7 = vpop.f32.mrb[15].mxu0  ;;  %v1756_v8 = vsel %vm727_vm4, %v1752_v4, -inf }
 0xec9   : > { %1757 = vmax.xlane.f32.xlu1 %v1756_v8 }
 0xeda   : > { %2706 = vrot.lane.b32.xlu1 %v2883_v34, %s2766_s19 }
 0xede   : > { %1846 = vrot.lane.b32.xlu1 %v2888_v35, %s2766_s19 }
 0xf56   : > { %v1758_v9 = vpop.xlane.xlu1 %1757 }
 0xf57   : > { %v1759_v11 = vsub.f32 %v1752_v4, %v1758_v9 }
 0xf59   : > { %v1760_v12 = vmul.f32 1.442695, %v1759_v11 }
 0xf5a   : > { %v2707_v20 = vpop.permute.xlu1 %2706 }
 0xf5b   : > { %2739 = vpow2.f32 %v1760_v12  ;;  %v2709_v21 = vunpack.i.h.bf16 %v2707_v20  ;;  %v2708_v22 = vunpack.i.l.bf16 %v2707_v20 }
 0xf5d   : > { %v2586_v24 = vpack.c.bf16 %v2709_v21, %v2708_v22 }
 0xf5e   : > { %v1847_v25 = vpop.permute.xlu1 %1846 }
 0xf65   : > { %v2740_v13 = vpop.eup %2739 }
 0xf66   : > { %v1762_v14 = vsel %vm727_vm4, %v2740_v13, 0.0 }
 0xf67   : > { %1763 = vadd.xlane.f32.xlu0 %v1762_v14 }
 0xf7d   : > { %2701 = vrot.lane.b32.xlu0 %v2912_v61, %s2765_s17 }
 0xff4   : > { %v1764_v15 = vpop.xlane.xlu0 %1763 }
 0xff5   : > { %2741 = vrcp.f32 %v1764_v15 }
 0xff8   : > { %v2702_v17 = vpop.permute.xlu0 %2701 }
 0xff9   : > { %v2704_v18 = vunpack.i.h.bf16 %v2702_v17  ;;  %v2703_v19 = vunpack.i.l.bf16 %v2702_v17 }
 0xffb   : > { %v2583_v34 = vpack.c.bf16 %v2704_v18, %v2703_v19 }
 0xffd   : > { %2584 = vmatpush3.bf16.msra.mxu1 %v2583_v34 }
 0xffe   : > { %2585 = vmatprep.subr.bf16.mxu1 %v2755_v5 }
 0xfff   : > { %v2742_v35 = vpop.eup %2741 }
0x1000   : > { %v1766_v23 = vmul.f32 %v2742_v35, %v2740_v13 }
0x1002   : > { %2487 = vmatmul.mubr.msk.f32.vlgmr.msra.gmra.mrb[16].mxu1 %vm727_vm4, %v1766_v23 }
0x1003   : > { %2493 = vmatprep.mubr.msk.f32.mxu1 %vm2757_vm1, %v2758_v10 }
0x1006   : > { %2588 = vmatpush3.bf16.xpose.msk.msra.mxu1 %vm2878_vm3, %v2586_v24 }
0x100d   : > { %2494 = vmatmul.mubr.msk.f32.vlgmr.msra.gmra.mrb[18].mxu1 %vm647_vm2, %v1847_v25 }
0x10d5   : > { %v1842_v26 = vpop.f32.mrb[16].mxu1 }
0x10d6   : > { %v2488_v27 = vpop.f32.mrb[17].mxu1 }
0x10e0   : > { %v1924_v28 = vpop.f32.mrb[18].mxu1 }
0x10e1   : > { %v2495_v30 = vpop.f32.mrb[19].mxu1  ;;  %v1928_v32 = vsel %vm727_vm4, %v1924_v28, -inf }
0x10e2   : > { %1929 = vmax.xlane.f32.xlu0 %v1928_v32 }
0x10f8   : > { %2711 = vrot.lane.b32.xlu0 %v2912_v61, %s2766_s19  ;;  %s357_s19 = scalar_lea.vmem %s3090_s8, %s2848_s18 }
0x10fc   : > { %2023 = vrot.lane.b32.xlu0 %v2964_v54, %s2767_s20 }
0x1100   : > { %2031 = vrot.lane.b32.xlu0 %v3004_v42, %s2768_s21 }
0x1104   : > { %2039 = vrot.lane.b32.xlu0 %v1842_v26, %s2769_s22 }
0x116f   : > { %v1930_v31 = vpop.xlane.xlu0 %1929 }
0x1170   : > { %v1931_v33 = vsub.f32 %v1924_v28, %v1930_v31 }
0x1172   : > { %v1932_v36 = vmul.f32 1.442695, %v1931_v33 }
0x1173   : > { %v2712_v37 = vpop.permute.xlu0 %2711 }
0x1174   : > { %2743 = vpow2.f32 %v1932_v36  ;;  %v2714_v38 = vunpack.i.h.bf16 %v2712_v37  ;;  %v2713_v39 = vunpack.i.l.bf16 %v2712_v37 }
0x1176   : > { %v2590_v40 = vpack.c.bf16 %v2714_v38, %v2713_v39 }
0x1177   : > { %v2024_v50 = vpop.permute.xlu0 %2023 }
0x1178   : > { %2591 = vmatpush3.bf16.msra.mxu0 %v2590_v40 }
0x1179   : > { %2592 = vmatprep.subr.bf16.mxu0 %v2755_v5 }
0x117b   : > { %v2032_v55 = vpop.permute.xlu0 %2031 }
0x117e   : > { %v2744_v61 = vpop.eup %2743 }
0x117f   : > { %v1934_v41 = vsel %vm727_vm4, %v2744_v61, 0.0  ;;  %v2040_v59 = vpop.permute.xlu0 %2039 }
0x1180   : > { %1935 = vadd.xlane.f32.xlu1 %v1934_v41 }
0x1191   : > { %2019 = vrot.lane.b32.xlu1 %v2944_v29, %s2770_s23  ;;  %v2059_v29 = vld [vmem:[%s3088_s6 + $0x8] sm:$0xff] }
0x1192   : > { %v2593_v45 = vpack.c.bf16 %v2059_v29, %v2058_v44 }
0x1195   : > { %2027 = vrot.lane.b32.xlu1 %v2984_v16, %s2771_s24  ;;  %v2060_v16 = vld [vmem:[%s3088_s6 + $0x10] sm:$0xff] }
0x1196   : > { %v2596_v47 = vpack.c.bf16 %v2061_v46, %v2060_v16 }
0x1199   : > { %2035 = vrot.lane.b32.xlu1 %v3024_v2, %s2772_s25 }
0x120d   : > { %v1936_v54 = vpop.xlane.xlu1 %1935 }
0x120e   : > { %2745 = vrcp.f32 %v1936_v54 }
0x1211   : > { %v2020_v49 = vpop.permute.xlu1 %2019 }
0x1212   : > { %v2046_v52 = vsel %vm647_vm2, %v2924_v6, %v2020_v49  ;;  %v2282_v6 = vld [vmem:[%s3089_s7] ss:$0 sm:$0xff] }
0x1213   : > { %v2048_v53 = vsel %vm2047_vm5, %v2046_v52, %v2024_v50 }
0x1215   : > { %v2028_v51 = vpop.permute.xlu1 %2027 }
0x1216   : > { %v2050_v56 = vsel %vm2049_vm6, %v2048_v53, %v2028_v51 }
0x1218   : > { %v2746_v42 = vpop.eup %2745 }
0x1219   : > { %v1938_v43 = vmul.f32 %v2746_v42, %v2744_v61  ;;  %v2036_v57 = vpop.permute.xlu1 %2035 }
0x121b   : > { %2501 = vmatmul.mubr.msk.f32.vlgmr.msra.gmra.mrb[16].mxu0 %vm727_vm4, %v1938_v43 }
0x121c   : > { %2511 = vmatprep.mubr.msk.f32.mxu0 %vm2757_vm1, %v2758_v10  ;;  %2594 = vmatpush3.bf16.msra.mxu0 %v2593_v45 }
0x121d   : > { %2595 = vmatprep.subr.bf16.mxu0 %v2755_v5  ;;  %v2051_v5 = vsel %vm727_vm4, %v2050_v56, %v2032_v55 }
0x121e   : > { %v2053_v58 = vsel %vm2052_vm7, %v2051_v5, %v2036_v57 }
0x121f   : > { %v2055_v60 = vsel %vm2054_vm8, %v2053_v58, %v2040_v59 }
0x1220   : > { %2597 = vmatpush3.bf16.msra.mxu0 %v2596_v47 }
0x12ee   : > { %v2014_v10 = vpop.f32.mrb[16].mxu0 }
0x12ef   : > { %2043 = vrot.lane.b32.xlu1 %v2014_v10, %s2773_s13  ;;  %v2502_v48 = vpop.f32.mrb[17].mxu0 }
0x1361   : > { %v2044_v62 = vpop.permute.xlu1 %2043 }
0x1362   : > { %v2057_v63 = vsel %vm2056_vm9, %v2055_v60, %v2044_v62 }
0x1363   : > { %2512 = vmatmul.mubr.msk.f32.vlgmr.msra.gmra.mrb[18].mxu0 %vm372_vm0, %v2057_v63 }
0x1436   : > { %v2138_v0 = vpop.f32.mrb[18].mxu0 }
0x1437   : > { %v2139_v1 = vadd.f32 %v2282_v6, %v2138_v0  ;;  %v2513_v2 = vpop.f32.mrb[19].mxu0 }
0x1439   : > { %2142 = vst.msk [vmem:[%s357_s19] sm:$0xff] %vm372_vm0, %v2139_v1 }
0x143a PF: > { %s18_s27 = sadd.s32 1, %s2753_s27  }
0x143b   : > { %p15_p4 = scmp.ge.s32.totalorder %s18_s27, 4  }
0x143d   :  { %17 = sbr.rel (!%p15_p4) target bundleno = 1 (0x1), region = 91 }

// kernel: transformer_decoder_forward.27
= control target key start
LH: loop header
LB: loop body
LE: loop exit
PB: predicated region body
PF: predicated region fallthrough
CT: control target
= control target key end

     0   :  { %vm12_vm0 = vcmask 261120   ;;  %v66_v18 = vmov 0.0   ;;  %s93_s0 = inlined_call_operand.vmem [shape: f32[16,32], index: 0, kind: input, shape index: {}]   ;;  %s94_s1 = inlined_call_operand.vmem [shape: f32[16,32], index: 1, kind: output, shape index: {}]  }
   0x1   :  { %v8_v0 = vld [vmem:[%s93_s0] sm:$0xff]  ;;  %v9_v1 = vld [vmem:[%s93_s0 + $0x8] sm:$0xff] }
   0x2   :  { %v10_v2 = vmul.f32 %v8_v0, %v8_v0  ;;  %v11_v3 = vmul.f32 %v9_v1, %v9_v1 }
   0x4   :  { %v13_v4 = vsel %vm12_vm0, %v10_v2, 0.0  ;;  %v16_v5 = vsel %vm12_vm0, %v11_v3, 0.0 }
   0x5   :  { %14 = vadd.xlane.f32.xlu0 %v13_v4 }
   0x9   :  { %17 = vadd.xlane.f32.xlu0 %v16_v5 }
  0x92   :  { %v15_v6 = vpop.xlane.xlu0 %14 }
  0x93   :  { %58 = vrsqrt.f32 %v15_v6  ;;  %vm21_vm1 = vcmp.eq.f32.partialorder %v15_v6, inf  ;;  %v24_v10 = vand.u32 2147483648, %v15_v6  ;;  %vm23_vm2 = vcmp.eq.f32.partialorder %v15_v6, 0.0 }
  0x96   :  { %v18_v7 = vpop.xlane.xlu0 %17 }
  0x97   :  { %60 = vrsqrt.f32 %v18_v7  ;;  %vm28_vm3 = vcmp.eq.f32.partialorder %v18_v7, inf  ;;  %v31_v15 = vand.u32 2147483648, %v18_v7  ;;  %vm30_vm5 = vcmp.eq.f32.partialorder %v18_v7, 0.0 }
  0x9d   :  { %v59_v8 = vpop.eup %58 }
  0x9e   :  { %v20_v9 = vmul.f32 %v59_v8, %v15_v6 }
  0xa0   :  { %v22_v11 = vsel %vm21_vm1, %v15_v6, %v20_v9 }
  0xa1   :  { %v61_v12 = vpop.eup %60  ;;  %v25_v13 = vsel %vm23_vm2, %v24_v10, %v22_v11 }
  0xa2   :  { %v27_v14 = vmul.f32 %v61_v12, %v18_v7  ;;  %vm33_vm4 = vcmp.eq.f32.partialorder %v25_v13, 0.0 }
  0xa3   :  { %v35_v19 = vsel %vm33_vm4, 1.0, %v66_v18 }
  0xa4   :  { %v29_v16 = vsel %vm28_vm3, %v18_v7, %v27_v14 }
  0xa5   :  { %v32_v17 = vsel %vm30_vm5, %v31_v15, %v29_v16 }
  0xa6   :  { %vm34_vm6 = vcmp.eq.f32.partialorder %v32_v17, 0.0 }
  0xa7   :  { %v36_v20 = vsel %vm34_vm6, 1.0, %v66_v18 }
  0xa8   :  { %v37_v21 = vmax.f32 %v35_v19, %v36_v20 }
  0xaa   :  { %v38_v22 = vrot.slane %v37_v21, 4 }
  0xac   :  { %v39_v23 = vmax.f32 %v37_v21, %v38_v22 }
  0xae   :  { %v40_v24 = vrot.slane %v39_v23, 2 }
  0xb0   :  { %v41_v25 = vmax.f32 %v39_v23, %v40_v24 }
  0xb2   :  { %v42_v26 = vrot.slane %v41_v25, 1 }
  0xb4   :  { %v43_v27 = vmax.f32 %v41_v25, %v42_v26 }
  0xb6   :  { %v44_v28 = vmul.f32 1e-10, %v43_v27 }
  0xb8   :  { %v45_v29 = vadd.f32 %v44_v28, %v25_v13  ;;  %v46_v30 = vadd.f32 %v44_v28, %v32_v17 }
  0xba   :  { %62 = vrcp.f32 %v45_v29 }
  0xbb   :  { %64 = vrcp.f32 %v46_v30 }
  0xc4   :  { %v63_v31 = vpop.eup %62 }
  0xc5   :  { %v65_v32 = vpop.eup %64  ;;  %v48_v33 = vmul.f32 %v63_v31, %v8_v0 }
  0xc6   :  { %v50_v34 = vmul.f32 %v65_v32, %v9_v1 }
  0xc7   :  { %51 = vst.msk [vmem:[%s94_s1] sm:$0xff] %vm12_vm0, %v48_v33 }
  0xc8   :  { %52 = vst.msk [vmem:[%s94_s1 + $0x8] sm:$0xff] %vm12_vm0, %v50_v34 }

// kernel: transformer_decoder_forward.26
= control target key start
LH: loop header
LB: loop body
LE: loop exit
PB: predicated region body
PF: predicated region fallthrough
CT: control target
= control target key end

     0   :  { %14 = vsyncpa [#allocation3], 0  ;;  %s3154_s0 = inlined_call_operand.vmem [shape: f32[2,8,32], index: 0, kind: input, shape index: {}]   ;;  %s3155_s1 = inlined_call_operand.vmem [shape: f32[2,8,32], index: 1, kind: input, shape index: {}]   ;;  %s3156_s2 = inlined_call_operand.vmem [shape: f32[2,16,32], index: 2, kind: input, shape index: {}]   ;;  %s3157_s3 = inlined_call_operand.vmem [shape: f32[2,16,32], index: 3, kind: input, shape index: {}]   ;;  %s3158_s4 = inlined_call_operand.vmem [shape: f32[2,8,16], index: 4, kind: input, shape index: {}]   ;;  %s3159_s5 = inlined_call_operand.vmem [shape: f32[32,64], index: 5, kind: input, shape index: {}]   ;;  %s3160_s6 = inlined_call_operand.vmem [shape: f32[1,64], index: 6, kind: input, shape index: {}]   ;;  %s3161_s7 = inlined_call_operand.vmem [shape: f32[2,8,32], index: 7, kind: output, shape index: {0}]   ;;  %s3162_s8 = inlined_call_operand.hbm [shape: f32[2,8,8,16], index: 8, kind: output, shape index: {1}]  }
   0x1   :  { %16 = vsyncpa [#allocation3 + $0x1], 0  ;;  %s2796_s27 = smov 0   ;;  %s2798_s28 = smov 0  }
   0x2   :  { %s2800_s29 = smov 0   ;;  %s2802_s30 = smov 0  }
   0x3 LB: > { %s2817_s9 = sadd.s32 4294967295, %s2729_s30   ;;  %s2170_s10 = sadd.s32 4294967294, %s2729_s30   ;;  %s2729_s30 = sphi %s2802_s30, %s3170_s30   ;;  %s2725_s29 = sphi %s2800_s29, %s3169_s29   ;;  %s2721_s28 = sphi %s2798_s28, %s3168_s28   ;;  %s2717_s27 = sphi %s2796_s27, %s3167_s27  }
   0x4   : > { %s2821_s11 = sadd.s32 1, %s2729_s30   ;;  %s227_s12 = sadd.s32 1, %s2725_s29 }
   0x5   : > { %s224_s13 = ssub.s32 %s2729_s30, %s2821_s11  ;;  %p237_p0 = scmp.ne.s32.totalorder %s2725_s29, %s2721_s28 }
   0x6   : > { %p225_p1 = scmp.eq.s32.totalorder %s224_s13, 0  ;;  %p238_p2 = scmp.eq.s32.totalorder %s2817_s9, 1 }
   0x7   : > { %p243_p3 = scmp.ne.s32.totalorder %s2721_s28, %s2717_s27  ;;  %p244_p4 = scmp.eq.s32.totalorder %s2170_s10, 1 }
   0x8   : > { %s2832_s14 = scalar_select %p225_p1, %s2725_s29, %s227_s12  }
   0x9   : > { %p2834_p5 = por %p238_p2, %p237_p0  ;;  %p2838_p6 = por %p244_p4, %p243_p3 }
   0xa   : > { %p2173_p7 = scmp.ge.s32.totalorder %s2729_s30, 1  ;;  %p305_p8 = scmp.lt.s32.totalorder %s2729_s30, 3 }
   0xc   : > { %p306_p9 = pnand %p2173_p7, %p305_p8 }
   0xd   : > { %v386_v0 = vld [vmem:[%s3159_s5] sm:$0xff] (!%p306_p9)  ;;  %v387_v1 = vld [vmem:[%s3159_s5 + $0x8] sm:$0xff] (!%p306_p9)  ;;  %v388_v2 = vld [vmem:[%s3159_s5 + $0x10] sm:$0xff] (!%p306_p9)  ;;  %p360_p10 = scmp.lt.s32.totalorder (!%p306_p9), %s2817_s9, 1  ;;  %v2731_v5 = vmov (!%p306_p9), 0.0|0.0   ;;  %s2732_s12 = smov (!%p306_p9), 96  }
   0xe   : > { %309 = sbr.rel (%p306_p9) target bundleno = 4979 (0x1373), region = 48  ;;  %v2555_v3 = vpack.i.bf16 (!%p306_p9), %v387_v1, %v386_v0  ;;  %v389_v4 = vld [vmem:[%s3159_s5 + $0x18] sm:$0xff] (!%p306_p9)  ;;  %2427 = vmatprep.subr.bf16.mxu0 (!%p306_p9), %v2731_v5  ;;  %v2428_v6 = vpack.c.bf16 (!%p306_p9), %v387_v1, %v386_v0  ;;  %v2183_v7 = vld [vmem:[%s3160_s6] ss:$0 sm:$0xff] (!%p306_p9)  ;;  %vm400_vm0 = vcmask (!%p306_p9), 261120   ;;  %vm2733_vm1 = vmmov (!%p306_p9), 0  }
   0xf   : > { %v2560_v8 = vpack.i.bf16 (!%p306_p9), %v389_v4, %v388_v2  ;;  %v2431_v9 = vpack.c.bf16 (!%p306_p9), %v389_v4, %v388_v2  ;;  %v2734_v10 = vmov (!%p306_p9), 0.0   ;;  %492 = vrot.lane.b32.xlu1 (!%p306_p9), %v2183_v7, %s2732_s12  ;;  %vm580_vm2 = vcmask (!%p306_p9), 31744   ;;  %s357_s21 = sand.u32 (!%p306_p9), 1, %s2721_s28   ;;  %s2736_s26 = smov (!%p306_p9), 120  }
  0x10   : > { %2556 = vrot.lane.b32.xlu0 (!%p306_p9), %v2555_v3, %s2732_s12  ;;  %2429 = vmatpush3.bf16.msra.mxu0 (!%p306_p9), %v2428_v6  ;;  %vm2895_vm3 = vmpackc.low (!%p306_p9), %vm580_vm2, %vm580_vm2  ;;  %vm660_vm4 = vcmask (!%p306_p9), 130048   ;;  %s2174_s24 = sshll.u32 (!%p306_p9), %s357_s21, 6  ;;  %s2739_s18 = smov (!%p306_p9), 108  }
  0x11   : > { %2430 = vmatprep.subr.bf16.mxu0 (!%p306_p9), %v2731_v5  ;;  %2301 = vmatprep.mubr.msk.f32.mxu0 (!%p306_p9), %vm2733_vm1, %v2734_v10  ;;  %s2740_s19 = smov (!%p306_p9), 104   ;;  %s2742_s22 = smov (!%p306_p9), 4  }
  0x14   : > { %2561 = vrot.lane.b32.xlu0 (!%p306_p9), %v2560_v8, %s2732_s12  ;;  %2432 = vmatpush3.bf16.msra.mxu0 (!%p306_p9), %v2431_v9  ;;  %s2735_s12 = smov (!%p306_p9), 124  }
  0x15   : > { %s2859_s25 = scalar_select %p360_p10, %s2817_s9, 1  ;;  %2441 = vmatprep.subr.bf16.mxu0 %v2731_v5 }
  0x17   : > { %s2865_s13 = sshll.u32 %s2859_s25, 3  ;;  %s2231_s17 = sshll.u32 %s2859_s25, 4 }
  0x18   : > { %s372_s20 = scalar_lea.vmem %s3156_s2, %s2231_s17  ;;  %s363_s23 = scalar_lea.vmem %s3154_s0, %s2865_s13 }
  0x19   : > { %v474_v11 = vld [vmem:[%s372_s20] sm:$0xff]  ;;  %s367_s10 = scalar_lea.vmem %s3155_s1, %s2865_s13  ;;  %v475_v23 = vld [vmem:[%s372_s20 + $0x8] sm:$0xff]  ;;  %s377_s20 = scalar_lea.vmem %s3157_s3, %s2231_s17 }
  0x1a   : > { %2312 = vmatprep.mubr.msk.f32.mxu1 %vm400_vm0, %v474_v11  ;;  %v391_v12 = vld [vmem:[%s363_s23] sm:$0xff]  ;;  %v577_v45 = vld [vmem:[%s377_s20 + $0x8] sm:$0xff]  ;;  %s381_s25 = scalar_lea.vmem %s3158_s4, %s2865_s13  ;;  %s2933_s17 = scalar_lea.vmem [#allocation2], %s2174_s24 }
  0x1b   : > { %v392_v13 = vld [vmem:[%s367_s10] sm:$0xff]  ;;  %s2737_s10 = smov 116   ;;  %s2743_s23 = smov 8  }
  0x1c   : > { %v393_v14 = vadd.f32 %v392_v13, %v391_v12  ;;  %v576_v44 = vld [vmem:[%s377_s20] sm:$0xff]  ;;  %s2741_s20 = smov 100   ;;  %s2745_s24 = smov 24  }
  0x1d   : > { %v2446_v46 = vpack.c.bf16 %v577_v45, %v576_v44  ;;  %v2929_v50 = vld [vmem:[%s381_s25] sm:$0xff]  ;;  %v2953_v3 = vpack.i.bf16 %v577_v45, %v576_v44  ;;  %s2744_s25 = smov 16  }
  0x1e   : > { %2302 = vmatmul.mubr.msk.f32.vlgmr.msra.gmra.mrb[0].mxu0 %vm400_vm0, %v393_v14 }
  0x1f   : > { %2319 = vmatprep.mubr.msk.f32.mxu0 %vm2733_vm1, %v2734_v10 }
  0x81   : > { %v493_v26 = vpop.permute.xlu1 %492 }
  0x82   : > { %v2557_v15 = vpop.permute.xlu0 %2556 }
  0x83   : > { %v2559_v16 = vunpack.i.h.bf16 %v2557_v15  ;;  %v2558_v17 = vunpack.i.l.bf16 %v2557_v15 }
  0x85   : > { %v2433_v18 = vpack.c.bf16 %v2559_v16, %v2558_v17 }
  0x86   : > { %v2562_v19 = vpop.permute.xlu0 %2561 }
  0x87   : > { %v2564_v20 = vunpack.i.h.bf16 %v2562_v19  ;;  %v2563_v21 = vunpack.i.l.bf16 %v2562_v19  ;;  %2434 = vmatprep.subr.bf16.mxu1 %v2433_v18 }
  0x88   : > { %2436 = vmatpush3.bf16.msra.mxu1 %v2433_v18 }
  0x89   : > { %v2437_v22 = vpack.c.bf16 %v2564_v20, %v2563_v21 }
  0x8b   : > { %2438 = vmatprep.subr.bf16.mxu1 %v2437_v22 }
  0x8c   : > { %2440 = vmatpush3.bf16.msra.mxu1 %v2437_v22 }
  0x8d   : > { %2445 = vmatprep.subr.bf16.mxu1 %v2731_v5 }
  0x8f   : > { %2313 = vmatmul.mubr.msk.f32.vlgmr.msra.gmra.mrb[0].mxu1 %vm400_vm0, %v475_v23 }
  0x90   : > { %2326 = vmatprep.mubr.msk.f32.mxu1 %vm2733_vm1, %v2734_v10  ;;  %2447 = vmatpush3.bf16.msra.mxu1 %v2446_v46 }
  0x91   : > { %2448 = vmatprep.subr.bf16.mxu1 %v2731_v5 }
  0xf1   : > { %v470_v24 = vpop.f32.mrb[0].mxu0 }
  0xf2   : > { %v2303_v25 = vpop.f32.mrb[1].mxu0  ;;  %v471_v32 = vadd.f32 %v2183_v7, %v470_v24 }
  0xf4   : > { %v2904_v35 = vmul.f32 0.5, %v471_v32 }
 0x162   : > { %v2314_v27 = vpop.f32.mrb[0].mxu1 }
 0x163   : > { %v573_v28 = vadd.f32 %v2314_v27, %v493_v26  ;;  %v567_v29 = vpop.f32.mrb[1].mxu1 }
 0x164   : > { %v568_v30 = vadd.f32 %v567_v29, %v493_v26 }
 0x166   : > { %v2442_v33 = vpack.c.bf16 %v573_v28, %v568_v30  ;;  %v2899_v34 = vpack.i.bf16 %v573_v28, %v568_v30 }
 0x168   : > { %2444 = vmatpush3.bf16.xpose.msk.msra.mxu0 %vm2895_vm3, %v2442_v33 }
 0x169   : > { %2452 = vmatprep.subr.bf16.mxu0 %v2731_v5 }
 0x16f   : > { %2320 = vmatmul.mubr.msk.f32.vlgmr.msra.gmra.mrb[2].mxu0 %vm580_vm2, %v2904_v35 }
 0x170   : > { %2340 = vmatprep.mubr.msk.f32.mxu0 %vm2733_vm1, %v2734_v10 }
 0x242   : > { %v656_v36 = vpop.f32.mrb[2].mxu0 }
 0x243   : > { %v2321_v37 = vpop.f32.mrb[3].mxu0  ;;  %v661_v38 = vsel %vm660_vm4, %v656_v36, -inf }
 0x244   : > { %662 = vmax.xlane.f32.xlu1 %v661_v38 }
 0x255   : > { %746 = vrot.lane.b32.xlu1 %v2904_v35, %s2735_s12 }
 0x2d1   : > { %v663_v39 = vpop.xlane.xlu1 %662 }
 0x2d2   : > { %v664_v40 = vsub.f32 %v656_v36, %v663_v39 }
 0x2d4   : > { %v665_v41 = vmul.f32 1.442695, %v664_v40 }
 0x2d5   : > { %v747_v56 = vpop.permute.xlu1 %746 }
 0x2d6   : > { %2635 = vpow2.f32 %v665_v41 }
 0x2e0   : > { %v2636_v42 = vpop.eup %2635 }
 0x2e1   : > { %v667_v43 = vsel %vm660_vm4, %v2636_v42, 0.0 }
 0x2e2   : > { %668 = vadd.xlane.f32.xlu0 %v667_v43 }
 0x2f8   : > { %2566 = vrot.lane.b32.xlu0 %v2899_v34, %s2735_s12 }
 0x36f   : > { %v669_v47 = vpop.xlane.xlu0 %668 }
 0x370   : > { %2637 = vrcp.f32 %v669_v47 }
 0x373   : > { %v2567_v48 = vpop.permute.xlu0 %2566 }
 0x374   : > { %v2569_v51 = vunpack.i.h.bf16 %v2567_v48  ;;  %v2568_v52 = vunpack.i.l.bf16 %v2567_v48 }
 0x376   : > { %v2449_v55 = vpack.c.bf16 %v2569_v51, %v2568_v52 }
 0x37a   : > { %v2638_v49 = vpop.eup %2637 }
 0x37b   : > { %v671_v53 = vmul.f32 %v2638_v49, %v2636_v42 }
 0x37d   : > { %v672_v54 = vmul.f32 %v671_v53, %v2929_v50 }
 0x37f   : > { %2327 = vmatmul.mubr.msk.f32.vlgmr.msra.gmra.mrb[2].mxu1 %vm660_vm4, %v672_v54  ;;  %2000 = vst.msk [vmem:[%s2933_s17] sm:$0xff] %vm660_vm4, %v672_v54 }
 0x380   : > { %2451 = vmatpush3.bf16.xpose.msk.msra.mxu1 %vm2895_vm3, %v2449_v55  ;;  %2333 = vmatprep.mubr.msk.f32.mxu1 %vm2733_vm1, %v2734_v10 }
 0x381   : > { %2459 = vmatprep.subr.bf16.mxu1 %v2731_v5 }
 0x387   : > { %2334 = vmatmul.mubr.msk.f32.vlgmr.msra.gmra.mrb[4].mxu1 %vm580_vm2, %v747_v56 }
 0x388   : > { %2354 = vmatprep.mubr.msk.f32.mxu1 %vm2733_vm1, %v2734_v10 }
 0x452   : > { %v2945_v57 = vpop.f32.mrb[2].mxu1 }
 0x453   : > { %v2328_v58 = vpop.f32.mrb[3].mxu1 }
 0x45a   : > { %v824_v59 = vpop.f32.mrb[4].mxu1 }
 0x45b   : > { %v2335_v60 = vpop.f32.mrb[5].mxu1  ;;  %v828_v61 = vsel %vm660_vm4, %v824_v59, -inf }
 0x45c   : > { %829 = vmax.xlane.f32.xlu1 %v828_v61 }
 0x46d   : > { %2576 = vrot.lane.b32.xlu1 %v2899_v34, %s2736_s26 }
 0x471   : > { %921 = vrot.lane.b32.xlu1 %v2904_v35, %s2736_s26 }
 0x4e9   : > { %v830_v62 = vpop.xlane.xlu1 %829 }
 0x4ea   : > { %v831_v63 = vsub.f32 %v824_v59, %v830_v62 }
 0x4ec   : > { %v832_v0 = vmul.f32 1.442695, %v831_v63 }
 0x4ed   : > { %v2577_v11 = vpop.permute.xlu1 %2576 }
 0x4ee   : > { %2639 = vpow2.f32 %v832_v0  ;;  %v2579_v13 = vunpack.i.h.bf16 %v2577_v11  ;;  %v2578_v14 = vunpack.i.l.bf16 %v2577_v11 }
 0x4f0   : > { %v2456_v17 = vpack.c.bf16 %v2579_v13, %v2578_v14 }
 0x4f1   : > { %v922_v18 = vpop.permute.xlu1 %921 }
 0x4f8   : > { %v2640_v1 = vpop.eup %2639 }
 0x4f9   : > { %v834_v2 = vsel %vm660_vm4, %v2640_v1, 0.0 }
 0x4fa   : > { %835 = vadd.xlane.f32.xlu0 %v834_v2 }
 0x510   : > { %2571 = vrot.lane.b32.xlu0 %v2953_v3, %s2735_s12  ;;  %s2738_s12 = smov 112  }
 0x587   : > { %v836_v4 = vpop.xlane.xlu0 %835 }
 0x588   : > { %2641 = vrcp.f32 %v836_v4 }
 0x58b   : > { %v2572_v6 = vpop.permute.xlu0 %2571 }
 0x58c   : > { %v2574_v7 = vunpack.i.h.bf16 %v2572_v6  ;;  %v2573_v8 = vunpack.i.l.bf16 %v2572_v6 }
 0x58e   : > { %v2453_v9 = vpack.c.bf16 %v2574_v7, %v2573_v8 }
 0x590   : > { %2454 = vmatpush3.bf16.msra.mxu0 %v2453_v9 }
 0x591   : > { %2455 = vmatprep.subr.bf16.mxu0 %v2731_v5 }
 0x592   : > { %v2642_v12 = vpop.eup %2641 }
 0x593   : > { %v838_v15 = vmul.f32 %v2642_v12, %v2640_v1 }
 0x595   : > { %v839_v16 = vmul.f32 %v838_v15, %v2929_v50 }
 0x597   : > { %2341 = vmatmul.mubr.msk.f32.vlgmr.msra.gmra.mrb[4].mxu0 %vm660_vm4, %v839_v16  ;;  %2219 = vst.msk [vmem:[%s2933_s17 + $0x8] sm:$0xff] %vm660_vm4, %v839_v16 }
 0x598   : > { %2347 = vmatprep.mubr.msk.f32.mxu0 %vm2733_vm1, %v2734_v10 }
 0x599   : > { %2458 = vmatpush3.bf16.xpose.msk.msra.mxu0 %vm2895_vm3, %v2456_v17 }
 0x59a   : > { %2466 = vmatprep.subr.bf16.mxu0 %v2731_v5 }
 0x5a0   : > { %2348 = vmatmul.mubr.msk.f32.vlgmr.msra.gmra.mrb[6].mxu0 %vm580_vm2, %v922_v18 }
 0x5a1   : > { %2368 = vmatprep.mubr.msk.f32.mxu0 %vm2733_vm1, %v2734_v10 }
 0x66a   : > { %v2970_v19 = vpop.f32.mrb[4].mxu0 }
 0x66b   : > { %v2342_v20 = vpop.f32.mrb[5].mxu0 }
 0x673   : > { %v999_v21 = vpop.f32.mrb[6].mxu0 }
 0x674   : > { %v2349_v22 = vpop.f32.mrb[7].mxu0  ;;  %v1003_v23 = vsel %vm660_vm4, %v999_v21, -inf }
 0x675   : > { %1004 = vmax.xlane.f32.xlu0 %v1003_v23 }
 0x68b   : > { %2581 = vrot.lane.b32.xlu0 %v2953_v3, %s2736_s26  ;;  %s2746_s26 = smov 12  }
 0x68f   : > { %1094 = vrot.lane.b32.xlu0 %v2904_v35, %s2737_s10 }
 0x702   : > { %v1005_v24 = vpop.xlane.xlu0 %1004 }
 0x703   : > { %v1006_v25 = vsub.f32 %v999_v21, %v1005_v24 }
 0x705   : > { %v1007_v26 = vmul.f32 1.442695, %v1006_v25 }
 0x706   : > { %v2582_v27 = vpop.permute.xlu0 %2581 }
 0x707   : > { %2643 = vpow2.f32 %v1007_v26  ;;  %v2584_v28 = vunpack.i.h.bf16 %v2582_v27  ;;  %v2583_v29 = vunpack.i.l.bf16 %v2582_v27 }
 0x709   : > { %v2460_v30 = vpack.c.bf16 %v2584_v28, %v2583_v29 }
 0x70a   : > { %v1095_v44 = vpop.permute.xlu0 %1094 }
 0x70b   : > { %2461 = vmatpush3.bf16.msra.mxu1 %v2460_v30 }
 0x70c   : > { %2462 = vmatprep.subr.bf16.mxu1 %v2731_v5 }
 0x711   : > { %v2644_v32 = vpop.eup %2643 }
 0x712   : > { %v1009_v33 = vsel %vm660_vm4, %v2644_v32, 0.0 }
 0x713   : > { %1010 = vadd.xlane.f32.xlu1 %v1009_v33 }
 0x724   : > { %2586 = vrot.lane.b32.xlu1 %v2899_v34, %s2737_s10 }
 0x7a0   : > { %v1011_v36 = vpop.xlane.xlu1 %1010 }
 0x7a1   : > { %2645 = vrcp.f32 %v1011_v36 }
 0x7a4   : > { %v2587_v37 = vpop.permute.xlu1 %2586 }
 0x7a5   : > { %v2589_v39 = vunpack.i.h.bf16 %v2587_v37  ;;  %v2588_v40 = vunpack.i.l.bf16 %v2587_v37 }
 0x7a7   : > { %v2463_v43 = vpack.c.bf16 %v2589_v39, %v2588_v40 }
 0x7ab   : > { %v2646_v38 = vpop.eup %2645 }
 0x7ac   : > { %v1013_v41 = vmul.f32 %v2646_v38, %v2644_v32 }
 0x7ae   : > { %v1014_v42 = vmul.f32 %v1013_v41, %v2929_v50 }
 0x7b0   : > { %2355 = vmatmul.mubr.msk.f32.vlgmr.msra.gmra.mrb[6].mxu1 %vm660_vm4, %v1014_v42  ;;  %2220 = vst.msk [vmem:[%s2933_s17 + $0x10] sm:$0xff] %vm660_vm4, %v1014_v42 }
 0x7b1   : > { %2465 = vmatpush3.bf16.xpose.msk.msra.mxu1 %vm2895_vm3, %v2463_v43  ;;  %2361 = vmatprep.mubr.msk.f32.mxu1 %vm2733_vm1, %v2734_v10 }
 0x7b2   : > { %2473 = vmatprep.subr.bf16.mxu1 %v2731_v5 }
 0x7b8   : > { %2362 = vmatmul.mubr.msk.f32.vlgmr.msra.gmra.mrb[8].mxu1 %vm580_vm2, %v1095_v44 }
 0x7b9   : > { %2382 = vmatprep.mubr.msk.f32.mxu1 %vm2733_vm1, %v2734_v10 }
 0x883   : > { %v2993_v45 = vpop.f32.mrb[6].mxu1 }
 0x884   : > { %v2356_v46 = vpop.f32.mrb[7].mxu1 }
 0x88b   : > { %v1172_v47 = vpop.f32.mrb[8].mxu1 }
 0x88c   : > { %v2363_v48 = vpop.f32.mrb[9].mxu1  ;;  %v1176_v49 = vsel %vm660_vm4, %v1172_v47, -inf }
 0x88d   : > { %1177 = vmax.xlane.f32.xlu1 %v1176_v49 }
 0x89e   : > { %2596 = vrot.lane.b32.xlu1 %v2899_v34, %s2738_s12 }
 0x8a2   : > { %1267 = vrot.lane.b32.xlu1 %v2904_v35, %s2738_s12 }
 0x91a   : > { %v1178_v51 = vpop.xlane.xlu1 %1177 }
 0x91b   : > { %v1179_v52 = vsub.f32 %v1172_v47, %v1178_v51 }
 0x91d   : > { %v1180_v53 = vmul.f32 1.442695, %v1179_v52 }
 0x91e   : > { %v2597_v62 = vpop.permute.xlu1 %2596 }
 0x91f   : > { %2647 = vpow2.f32 %v1180_v53  ;;  %v2599_v0 = vunpack.i.h.bf16 %v2597_v62  ;;  %v2598_v1 = vunpack.i.l.bf16 %v2597_v62 }
 0x921   : > { %v2470_v6 = vpack.c.bf16 %v2599_v0, %v2598_v1 }
 0x922   : > { %v1268_v7 = vpop.permute.xlu1 %1267 }
 0x929   : > { %v2648_v54 = vpop.eup %2647 }
 0x92a   : > { %v1182_v55 = vsel %vm660_vm4, %v2648_v54, 0.0 }
 0x92b   : > { %1183 = vadd.xlane.f32.xlu0 %v1182_v55 }
 0x941   : > { %2591 = vrot.lane.b32.xlu0 %v2953_v3, %s2737_s10  ;;  %s2747_s10 = smov 20  }
 0x9b8   : > { %v1184_v56 = vpop.xlane.xlu0 %1183 }
 0x9b9   : > { %2649 = vrcp.f32 %v1184_v56 }
 0x9bc   : > { %v2592_v58 = vpop.permute.xlu0 %2591 }
 0x9bd   : > { %v2594_v59 = vunpack.i.h.bf16 %v2592_v58  ;;  %v2593_v60 = vunpack.i.l.bf16 %v2592_v58 }
 0x9bf   : > { %v2467_v61 = vpack.c.bf16 %v2594_v59, %v2593_v60 }
 0x9c1   : > { %2468 = vmatpush3.bf16.msra.mxu0 %v2467_v61 }
 0x9c2   : > { %2469 = vmatprep.subr.bf16.mxu0 %v2731_v5 }
 0x9c3   : > { %v2650_v63 = vpop.eup %2649 }
 0x9c4   : > { %v1186_v2 = vmul.f32 %v2650_v63, %v2648_v54 }
 0x9c6   : > { %v1187_v4 = vmul.f32 %v1186_v2, %v2929_v50 }
 0x9c8   : > { %2369 = vmatmul.mubr.msk.f32.vlgmr.msra.gmra.mrb[8].mxu0 %vm660_vm4, %v1187_v4  ;;  %2221 = vst.msk [vmem:[%s2933_s17 + $0x18] sm:$0xff] %vm660_vm4, %v1187_v4 }
 0x9c9   : > { %2375 = vmatprep.mubr.msk.f32.mxu0 %vm2733_vm1, %v2734_v10 }
 0x9ca   : > { %2472 = vmatpush3.bf16.xpose.msk.msra.mxu0 %vm2895_vm3, %v2470_v6 }
 0x9cb   : > { %2480 = vmatprep.subr.bf16.mxu0 %v2731_v5 }
 0x9d1   : > { %2376 = vmatmul.mubr.msk.f32.vlgmr.msra.gmra.mrb[10].mxu0 %vm580_vm2, %v1268_v7 }
 0x9d2   : > { %2396 = vmatprep.mubr.msk.f32.mxu0 %vm2733_vm1, %v2734_v10 }
 0xa9b   : > { %v3016_v8 = vpop.f32.mrb[8].mxu0 }
 0xa9c   : > { %v2370_v9 = vpop.f32.mrb[9].mxu0 }
 0xaa4   : > { %v1345_v11 = vpop.f32.mrb[10].mxu0 }
 0xaa5   : > { %v2377_v12 = vpop.f32.mrb[11].mxu0  ;;  %v1349_v13 = vsel %vm660_vm4, %v1345_v11, -inf }
 0xaa6   : > { %1350 = vmax.xlane.f32.xlu0 %v1349_v13 }
 0xabc   : > { %2601 = vrot.lane.b32.xlu0 %v2953_v3, %s2738_s12  ;;  %s2233_s12 = sshll.u32 %s2817_s9, 10  ;;  %s2748_s9 = smov [#allocation2]  }
 0xac0   : > { %1440 = vrot.lane.b32.xlu0 %v2904_v35, %s2739_s18 }
 0xb33   : > { %v1351_v14 = vpop.xlane.xlu0 %1350 }
 0xb34   : > { %v1352_v15 = vsub.f32 %v1345_v11, %v1351_v14 }
 0xb36   : > { %v1353_v16 = vmul.f32 1.442695, %v1352_v15 }
 0xb37   : > { %v2602_v17 = vpop.permute.xlu0 %2601 }
 0xb38   : > { %2651 = vpow2.f32 %v1353_v16  ;;  %v2604_v18 = vunpack.i.h.bf16 %v2602_v17  ;;  %v2603_v20 = vunpack.i.l.bf16 %v2602_v17 }
 0xb3a   : > { %v2474_v21 = vpack.c.bf16 %v2604_v18, %v2603_v20 }
 0xb3b   : > { %v1441_v33 = vpop.permute.xlu0 %1440 }
 0xb3c   : > { %2475 = vmatpush3.bf16.msra.mxu1 %v2474_v21 }
 0xb3d   : > { %2476 = vmatprep.subr.bf16.mxu1 %v2731_v5 }
 0xb42   : > { %v2652_v22 = vpop.eup %2651 }
 0xb43   : > { %v1355_v23 = vsel %vm660_vm4, %v2652_v22, 0.0 }
 0xb44   : > { %1356 = vadd.xlane.f32.xlu1 %v1355_v23 }
 0xb55   : > { %2606 = vrot.lane.b32.xlu1 %v2899_v34, %s2739_s18 }
 0xbd1   : > { %v1357_v24 = vpop.xlane.xlu1 %1356 }
 0xbd2   : > { %2653 = vrcp.f32 %v1357_v24 }
 0xbd5   : > { %v2607_v25 = vpop.permute.xlu1 %2606 }
 0xbd6   : > { %v2609_v27 = vunpack.i.h.bf16 %v2607_v25  ;;  %v2608_v28 = vunpack.i.l.bf16 %v2607_v25 }
 0xbd8   : > { %v2477_v32 = vpack.c.bf16 %v2609_v27, %v2608_v28 }
 0xbdc   : > { %v2654_v26 = vpop.eup %2653 }
 0xbdd   : > { %v1359_v29 = vmul.f32 %v2654_v26, %v2652_v22 }
 0xbdf   : > { %v1360_v30 = vmul.f32 %v1359_v29, %v2929_v50 }
 0xbe1   : > { %2383 = vmatmul.mubr.msk.f32.vlgmr.msra.gmra.mrb[10].mxu1 %vm660_vm4, %v1360_v30  ;;  %2222 = vst.msk [vmem:[%s2933_s17 + $0x20] sm:$0xff] %vm660_vm4, %v1360_v30 }
 0xbe2   : > { %2479 = vmatpush3.bf16.xpose.msk.msra.mxu1 %vm2895_vm3, %v2477_v32  ;;  %2389 = vmatprep.mubr.msk.f32.mxu1 %vm2733_vm1, %v2734_v10 }
 0xbe3   : > { %2487 = vmatprep.subr.bf16.mxu1 %v2731_v5 }
 0xbe9   : > { %2390 = vmatmul.mubr.msk.f32.vlgmr.msra.gmra.mrb[12].mxu1 %vm580_vm2, %v1441_v33 }
 0xbea   : > { %2410 = vmatprep.mubr.msk.f32.mxu1 %vm2733_vm1, %v2734_v10 }
 0xcb4   : > { %v3039_v36 = vpop.f32.mrb[10].mxu1 }
 0xcb5   : > { %v2384_v37 = vpop.f32.mrb[11].mxu1 }
 0xcbc   : > { %v1518_v38 = vpop.f32.mrb[12].mxu1 }
 0xcbd   : > { %v2391_v39 = vpop.f32.mrb[13].mxu1  ;;  %v1522_v40 = vsel %vm660_vm4, %v1518_v38, -inf }
 0xcbe   : > { %1523 = vmax.xlane.f32.xlu1 %v1522_v40 }
 0xccf   : > { %2616 = vrot.lane.b32.xlu1 %v2899_v34, %s2740_s19 }
 0xcd3   : > { %1613 = vrot.lane.b32.xlu1 %v2904_v35, %s2740_s19 }
 0xd4b   : > { %v1524_v41 = vpop.xlane.xlu1 %1523 }
 0xd4c   : > { %v1525_v42 = vsub.f32 %v1518_v38, %v1524_v41 }
 0xd4e   : > { %v1526_v43 = vmul.f32 1.442695, %v1525_v42 }
 0xd4f   : > { %v2617_v53 = vpop.permute.xlu1 %2616 }
 0xd50   : > { %2655 = vpow2.f32 %v1526_v43  ;;  %v2619_v55 = vunpack.i.h.bf16 %v2617_v53  ;;  %v2618_v56 = vunpack.i.l.bf16 %v2617_v53 }
 0xd52   : > { %v2484_v60 = vpack.c.bf16 %v2619_v55, %v2618_v56 }
 0xd53   : > { %v1614_v61 = vpop.permute.xlu1 %1613 }
 0xd5a   : > { %v2656_v44 = vpop.eup %2655 }
 0xd5b   : > { %v1528_v46 = vsel %vm660_vm4, %v2656_v44, 0.0 }
 0xd5c   : > { %1529 = vadd.xlane.f32.xlu0 %v1528_v46 }
 0xd72   : > { %2611 = vrot.lane.b32.xlu0 %v2953_v3, %s2739_s18  ;;  %s2036_s18 = sshll.u32 %s2933_s17, 4  ;;  %s3100_s18 = int_to_ptr.vmem [resolvable:$true] %s2036_s18 }
 0xde9   : > { %v1530_v47 = vpop.xlane.xlu0 %1529 }
 0xdea   : > { %2657 = vrcp.f32 %v1530_v47 }
 0xded   : > { %v2612_v48 = vpop.permute.xlu0 %2611 }
 0xdee   : > { %v2614_v49 = vunpack.i.h.bf16 %v2612_v48  ;;  %v2613_v51 = vunpack.i.l.bf16 %v2612_v48 }
 0xdf0   : > { %v2481_v52 = vpack.c.bf16 %v2614_v49, %v2613_v51 }
 0xdf2   : > { %2482 = vmatpush3.bf16.msra.mxu0 %v2481_v52 }
 0xdf3   : > { %2483 = vmatprep.subr.bf16.mxu0 %v2731_v5 }
 0xdf4   : > { %v2658_v54 = vpop.eup %2657 }
 0xdf5   : > { %v1532_v58 = vmul.f32 %v2658_v54, %v2656_v44 }
 0xdf7   : > { %v1533_v59 = vmul.f32 %v1532_v58, %v2929_v50 }
 0xdf9   : > { %2397 = vmatmul.mubr.msk.f32.vlgmr.msra.gmra.mrb[12].mxu0 %vm660_vm4, %v1533_v59  ;;  %2223 = vst.msk [vmem:[%s2933_s17 + $0x28] sm:$0xff] %vm660_vm4, %v1533_v59 }
 0xdfa   : > { %2403 = vmatprep.mubr.msk.f32.mxu0 %vm2733_vm1, %v2734_v10 }
 0xdfb   : > { %2486 = vmatpush3.bf16.xpose.msk.msra.mxu0 %vm2895_vm3, %v2484_v60 }
 0xdfc   : > { %2494 = vmatprep.subr.bf16.mxu0 %v2731_v5 }
 0xe02   : > { %2404 = vmatmul.mubr.msk.f32.vlgmr.msra.gmra.mrb[14].mxu0 %vm580_vm2, %v1614_v61 }
 0xe03   : > { %2424 = vmatprep.mubr.msk.f32.mxu0 %vm2733_vm1, %v2734_v10 }
 0xecc   : > { %v1609_v62 = vpop.f32.mrb[12].mxu0 }
 0xecd   : > { %v2398_v63 = vpop.f32.mrb[13].mxu0 }
 0xed5   : > { %v1691_v0 = vpop.f32.mrb[14].mxu0 }
 0xed6   : > { %v2405_v1 = vpop.f32.mrb[15].mxu0  ;;  %v1695_v2 = vsel %vm660_vm4, %v1691_v0, -inf }
 0xed7   : > { %1696 = vmax.xlane.f32.xlu0 %v1695_v2 }
 0xeed   : > { %2621 = vrot.lane.b32.xlu0 %v2953_v3, %s2740_s19 }
 0xef1   : > { %1786 = vrot.lane.b32.xlu0 %v2904_v35, %s2741_s20 }
 0xf64   : > { %v1697_v4 = vpop.xlane.xlu0 %1696 }
 0xf65   : > { %v1698_v6 = vsub.f32 %v1691_v0, %v1697_v4 }
 0xf67   : > { %v1699_v7 = vmul.f32 1.442695, %v1698_v6 }
 0xf68   : > { %v2622_v9 = vpop.permute.xlu0 %2621 }
 0xf69   : > { %2659 = vpow2.f32 %v1699_v7  ;;  %v2624_v11 = vunpack.i.h.bf16 %v2622_v9  ;;  %v2623_v12 = vunpack.i.l.bf16 %v2622_v9 }
 0xf6b   : > { %v2488_v13 = vpack.c.bf16 %v2624_v11, %v2623_v12 }
 0xf6d   : > { %2489 = vmatpush3.bf16.msra.mxu1 %v2488_v13 }
 0xf6e   : > { %2490 = vmatprep.subr.bf16.mxu1 %v2731_v5  ;;  %v1787_v5 = vpop.permute.xlu0 %1786 }
 0xf73   : > { %v2660_v14 = vpop.eup %2659 }
 0xf74   : > { %v1701_v15 = vsel %vm660_vm4, %v2660_v14, 0.0 }
 0xf75   : > { %1702 = vadd.xlane.f32.xlu1 %v1701_v15 }
 0xf86   : > { %2626 = vrot.lane.b32.xlu1 %v2899_v34, %s2741_s20 }
0x1002   : > { %v1703_v35 = vpop.xlane.xlu1 %1702 }
0x1003   : > { %2661 = vrcp.f32 %v1703_v35 }
0x1006   : > { %v2627_v16 = vpop.permute.xlu1 %2626 }
0x1007   : > { %v2629_v18 = vunpack.i.h.bf16 %v2627_v16  ;;  %v2628_v20 = vunpack.i.l.bf16 %v2627_v16 }
0x1009   : > { %v2491_v23 = vpack.c.bf16 %v2629_v18, %v2628_v20 }
0x100d   : > { %v2662_v17 = vpop.eup %2661 }
0x100e   : > { %v1705_v21 = vmul.f32 %v2662_v17, %v2660_v14 }
0x1010   : > { %v1706_v22 = vmul.f32 %v1705_v21, %v2929_v50 }
0x1012   : > { %2411 = vmatmul.mubr.msk.f32.vlgmr.msra.gmra.mrb[14].mxu1 %vm660_vm4, %v1706_v22  ;;  %2224 = vst.msk [vmem:[%s2933_s17 + $0x30] sm:$0xff] %vm660_vm4, %v1706_v22 }
0x1013   : > { %2493 = vmatpush3.bf16.xpose.msk.msra.mxu1 %vm2895_vm3, %v2491_v23  ;;  %2417 = vmatprep.mubr.msk.f32.mxu1 %vm2733_vm1, %v2734_v10 }
0x101a   : > { %2418 = vmatmul.mubr.msk.f32.vlgmr.msra.gmra.mrb[16].mxu1 %vm580_vm2, %v1787_v5 }
0x10e5   : > { %v1782_v34 = vpop.f32.mrb[14].mxu1 }
0x10e6   : > { %v2412_v24 = vpop.f32.mrb[15].mxu1 }
0x10ed   : > { %v1864_v25 = vpop.f32.mrb[16].mxu1 }
0x10ee   : > { %v2419_v26 = vpop.f32.mrb[17].mxu1  ;;  %v1868_v27 = vsel %vm660_vm4, %v1864_v25, -inf }
0x10ef   : > { %1869 = vmax.xlane.f32.xlu1 %v1868_v27 }
0x1100   : > { %1960 = vrot.lane.b32.xlu1 %v2970_v19, %s2742_s22  ;;  %s3098_s22 = scalar_lea.hbm %s3162_s8, %s2233_s12 }
0x1104   : > { %1964 = vrot.lane.b32.xlu1 %v2993_v45, %s2743_s23 }
0x1108   : > { %1972 = vrot.lane.b32.xlu1 %v3039_v36, %s2744_s25  ;;  %s3104_s25 = scalar_lea.sflag [#allocation3], %s357_s21 }
0x110c   : > { %1980 = vrot.lane.b32.xlu1 %v1782_v34, %s2745_s24  ;;  %s2667_s24 = scalar_lea.vmem %s3100_s18, 1024 }
0x110d   : > { %p2668_p11 = scmp.ne.s32.totalorder %s3100_s18, %s2667_s24 }
0x110f   : > { %p2669_p12 = pnand %p2668_p11, %p2834_p5 }
0x1111   : > { %p2670_p13 = pneg %p2669_p12 }
0x117c   : > { %v1870_v10 = vpop.xlane.xlu1 %1869 }
0x117d   : > { %v1871_v31 = vsub.f32 %v1864_v25, %v1870_v10 }
0x117f   : > { %v1872_v28 = vmul.f32 1.442695, %v1871_v31 }
0x1181   : > { %2663 = vpow2.f32 %v1872_v28 }
0x118b   : > { %v2664_v29 = vpop.eup %2663 }
0x118c   : > { %v1874_v30 = vsel %vm660_vm4, %v2664_v29, 0.0 }
0x118d   : > { %1875 = vadd.xlane.f32.xlu0 %v1874_v30 }
0x11a3   : > { %2631 = vrot.lane.b32.xlu0 %v2953_v3, %s2741_s20 }
0x11a7   : > { %1968 = vrot.lane.b32.xlu0 %v3016_v8, %s2746_s26 }
0x11ab   : > { %1976 = vrot.lane.b32.xlu0 %v1609_v62, %s2747_s10 }
0x121a   : > { %v1876_v19 = vpop.xlane.xlu0 %1875 }
0x121b   : > { %2665 = vrcp.f32 %v1876_v19 }
0x121e   : > { %v2632_v45 = vpop.permute.xlu0 %2631 }
0x121f   : > { %v2634_v32 = vunpack.i.h.bf16 %v2632_v45  ;;  %v2633_v33 = vunpack.i.l.bf16 %v2632_v45 }
0x1221   : > { %v2495_v36 = vpack.c.bf16 %v2634_v32, %v2633_v33 }
0x1223   : > { %2496 = vmatpush3.bf16.msra.mxu0 %v2495_v36 }
0x1225   : > { %v2666_v37 = vpop.eup %2665 }
0x1226   : > { %v1878_v38 = vmul.f32 %v2666_v37, %v2664_v29 }
0x1228   : > { %v1879_v3 = vmul.f32 %v1878_v38, %v2929_v50 }
0x122a   : > { %2425 = vmatmul.mubr.msk.f32.vlgmr.msra.gmra.mrb[16].mxu0 %vm660_vm4, %v1879_v3  ;;  %2225 = vst.msk [vmem:[%s2933_s17 + $0x38] sm:$0xff] %vm660_vm4, %v1879_v3  ;;  %s2671_s17 = sshll.u32 %s2748_s9, 4  ;;  %s2672_s17 = int_to_ptr.vmem [resolvable:$false] %s2671_s17 }
0x122b   : > { %s2673_s26 = scalar_lea.vmem %s2672_s17, 2048  ;;  %p2674_p0 = scmp.lt.s32.totalorder %s3100_s18, %s2672_s17 }
0x122c   : > { %p2675_p1 = scmp.lt.s32.totalorder %s2673_s26, %s2667_s24 }
0x122e   : > { %p2676_p2 = por %p2675_p1, %p2674_p0 }
0x1230   : > { %p2677_p3 = pnand %p2676_p2, %p2670_p13 }
0x1232   : > { %2680 = shalt.err (!%p2677_p3)
}
0x1233   : > { %s2681_s21 = scalar_lea.hbm %s3098_s22, 1024  ;;  %s2685_s19 = scalar_lea.hbm %s3162_s8, 2048 }
0x1234   : > { %p2682_p4 = scmp.ne.s32.totalorder %s3098_s22, %s2681_s21  ;;  %p2686_p9 = scmp.lt.u32.totalorder %s3098_s22, %s3162_s8 }
0x1235   : > { %p2687_p10 = scmp.lt.u32.totalorder %s2685_s19, %s2681_s21  ;;  %p2689_p12 = scmp.lt.u32.totalorder %s2681_s21, %s3098_s22 }
0x1236   : > { %p2683_p7 = pnand %p2682_p4, %p2834_p5 }
0x1237   : > { %p2688_p11 = por %p2687_p10, %p2686_p9 }
0x1238   : > { %p2684_p8 = pneg %p2683_p7 }
0x1239   : > { %p2690_p13 = por %p2689_p12, %p2688_p11 }
0x123b   : > { %p2691_p0 = pnand %p2690_p13, %p2684_p8 }
0x123d   : > { %2694 = shalt.err (!%p2691_p0)
}
0x123e   : > { %s2749_s24 = smov 128   ;;  %s2750_s17 = smov 28   ;;  %v1961_v39 = vpop.permute.xlu1 %1960  ;;  %v1969_v41 = vpop.permute.xlu0 %1968  ;;  %vm1988_vm5 = vcmask 64512   ;;  %vm1990_vm6 = vcmask 97280   ;;  %vm1993_vm7 = vcmask 162816   ;;  %vm1995_vm8 = vcmask 195584  }
0x123f   : > { %2497 = dma.vmem_to_hbm [thread:$0]  (%p2834_p5), %s3100_s18, 1024, %s3098_s22, %s3104_s25, %s2749_s24, %s2749_s24, %s2743_s23   ;;  %v1987_v42 = vsel %vm580_vm2, %v2945_v57, %v1961_v39  ;;  %vm1997_vm9 = vcmask 228352  }
0x1240   : > { %s385_s18 = scalar_lea.vmem %s3161_s7, %s2865_s13 }
0x1242   : > { %v1965_v40 = vpop.permute.xlu1 %1964  ;;  %v1977_v47 = vpop.permute.xlu0 %1976 }
0x1243   : > { %v1989_v43 = vsel %vm1988_vm5, %v1987_v42, %v1965_v40 }
0x1244   : > { %v1991_v46 = vsel %vm1990_vm6, %v1989_v43, %v1969_v41 }
0x1246   : > { %v1973_v44 = vpop.permute.xlu1 %1972 }
0x1247   : > { %v1992_v48 = vsel %vm660_vm4, %v1991_v46, %v1973_v44 }
0x1248   : > { %v1994_v49 = vsel %vm1993_vm7, %v1992_v48, %v1977_v47 }
0x124a   : > { %v1981_v51 = vpop.permute.xlu1 %1980 }
0x124b   : > { %v1996_v52 = vsel %vm1995_vm8, %v1994_v49, %v1981_v51 }
0x12fd   : > { %v1955_v50 = vpop.f32.mrb[16].mxu0 }
0x12fe   : > { %1984 = vrot.lane.b32.xlu0 %v1955_v50, %s2750_s17  ;;  %v2426_v8 = vpop.f32.mrb[17].mxu0 }
0x1370   : > { %v1985_v53 = vpop.permute.xlu0 %1984 }
0x1371   : > { %v1998_v54 = vsel %vm1997_vm9, %v1996_v52, %v1985_v53 }
0x1372   : > { %1999 = vst.msk [vmem:[%s385_s18] sm:$0xff] %vm400_vm0, %v1998_v54 }
0x1373 PF: > { %p2503_p5 = scmp.ge.s32.totalorder %s2729_s30, 2  ;;  %s2058_s22 = sand.u32 1, %s2717_s27  }
0x1374   : > { %s2059_s25 = scalar_lea.sflag [#allocation3], %s2058_s22 }
0x1375   : > { %p2500_p1 = pnand %p2503_p5, %p2838_p6 }
0x1377   : > { %2712 = dma.done.wait (!%p2500_p1), %s2059_s25, 1024  }
0x1378   : > { %2714 = vsyncadd (!%p2500_p1), %s2059_s25, 4294966272  ;;  %p19_p2 = scmp.ge.s32.totalorder %s2821_s11, 4   ;;  %s3167_s27 = smov %s2721_s28 }
0x1379   : > { %s3168_s28 = smov %s2725_s29  ;;  %s3169_s29 = smov %s2832_s14 }
0x137a   : > { %s3170_s30 = smov %s2821_s11  ;;  %21 = sbr.rel (!%p19_p2) target bundleno = 3 (0x3), region = 114 }
0x1381   :  { %2064 = vsyncpa [#allocation3], 1 }
0x1382   :  { %2066 = vsyncpa [#allocation3 + $0x1], 1 }

</bundles_post_ra>
